<compile_context>
chip_gen: v6e
topology: v6e:2x2x1
jax: 0.10.0
libtpu: 0.0.40
codegen_flags: <defaults>
</compile_context>

<pallas_src>
import functools
import math

import jax
import jax.numpy as jnp
from jax.experimental import pallas as pl
from jax.experimental.pallas import tpu as pltpu

F32 = jnp.float32
BF16 = jnp.bfloat16
_VMEM = pl.BlockSpec(memory_space=pltpu.MemorySpace.VMEM)


# ------------------------------ fused kernel -------------------------------
def _make_fused_kernel(T, B_pad, H, num_layers):
    NL = num_layers
    H2, H3, H4, H8 = 2 * H, 3 * H, 4 * H, 8 * H
    TB = T * B_pad

    def dot(a, w):  # bf16 MXU operands, f32 accumulation
        return jnp.dot(a.astype(BF16), w, preferred_element_type=F32)

    def kernel(*refs):
        it = iter(refs)
        # ---- data ----
        base_ref = next(it)      # (T, B_pad, 3)  [cgm, cgm_diff, ts]
        ts_ref = next(it)        # (T, B_pad, 1)
        meals_ref = next(it)     # (T, B_pad, M)
        demo_ref = next(it)      # (B_pad, D)
        # ---- embedding weights ----
        meal_w = next(it); meal_b = next(it)
        demo_w = next(it); demo_b = next(it)
        # ---- encoder weights ----
        enc = []
        for l in range(NL):
            d = {}
            if l == 0:
                d['w_base'] = next(it); d['w_meal'] = next(it); d['w_demo'] = next(it)
            else:
                d['w_ih_lo'] = next(it); d['w_ih_hi'] = next(it)
            d['b'] = next(it); d['whh_f'] = next(it); d['whh_b'] = next(it)
            enc.append(d)
        # ---- head weights ----
        proj_parts = [next(it) for _ in range(2 * NL)]
        proj_b = next(it)
        # ---- decoder weights ----
        dw_ts = next(it); dw_meal = next(it); dw_demo = next(it)
        dec_b = next(it); dec_whh = next(it)
        dec_pw = next(it); dec_pb = next(it)
        # ---- outputs ----
        dec_out = next(it)       # (T, B_pad)
        qmean_out = next(it)     # (B_pad, H)
        qstd_out = next(it)      # (B_pad, H)
        # ---- scratch ----
        gates_scr = next(it)     # (T, B_pad, 8H)
        hseq_scr = next(it)      # (2, T, B_pad, H): [0]=fwd, [1]=bwd
        dech_scr = next(it)      # (T, B_pad, H)

        M = meals_ref.shape[-1]

        # ----- fused prologue: NaN-masked embeddings (shared by enc & dec) -----
        meals2d = meals_ref[...].reshape(TB, M)
        m_nan = jnp.any(jnp.isnan(meals2d), axis=-1, keepdims=True)
        meals_clean = jnp.where(m_nan, 0.0, meals2d)
        meal_emb = (dot(meals_clean, meal_w[...]) + meal_b[...]) \
            * (1.0 - m_nan.astype(F32))                         # (TB, E) f32

        demo2d = demo_ref[...]
        d_nan = jnp.any(jnp.isnan(demo2d), axis=-1, keepdims=True)
        demo_clean = jnp.where(d_nan, 0.0, demo2d)
        demo_emb = (dot(demo_clean, demo_w[...]) + demo_b[...]) \
            * (1.0 - d_nan.astype(F32))                         # (B_pad, E) f32

        # ----- bidirectional multi-layer encoder (fwd+bwd fused per layer) -----
        cells = []
        for l in range(NL):
            p = enc[l]
            # hoisted input projection: one GEMM covering all T steps, both dirs
            if l == 0:
                gi = dot(base_ref[...].reshape(TB, 3), p['w_base'][...])
                gi = gi + dot(meal_emb, p['w_meal'][...]) + p['b'][...]
                demo_g = dot(demo_emb, p['w_demo'][...])        # (B_pad, 8H)
                gates_scr[...] = (gi.reshape(T, B_pad, H8)
                                  + demo_g.reshape(1, B_pad, H8))
            else:
                gi = (dot(hseq_scr[0].reshape(TB, H), p['w_ih_lo'][...])
                      + dot(hseq_scr[1].reshape(TB, H), p['w_ih_hi'][...])
                      + p['b'][...])
                gates_scr[...] = gi.reshape(T, B_pad, H8)

            whh_f = p['whh_f'][...]
            whh_b = p['whh_b'][...]
            write_hseq = (l + 1 < NL)   # last layer's sequence output is unused

            h = jnp.zeros((2 * B_pad, H), F32)
            c = jnp.zeros((2 * B_pad, H), F32)
            for t in range(T):          # fully unrolled (T small & static)
                tb = T - 1 - t
                gf = gates_scr[t, :, 0:H4] + dot(h[0:B_pad], whh_f)
                gb = gates_scr[tb, :, H4:H8] + dot(h[B_pad:2 * B_pad], whh_b)
                g = jnp.concatenate([gf, gb], axis=0)           # (2*B_pad, 4H)
                sg = jax.nn.sigmoid(g[:, 0:H3])                 # [i | f | o]
                gg = jnp.tanh(g[:, H3:H4])                      # g gate
                c = sg[:, H:H2] * c + sg[:, 0:H] * gg
                h = sg[:, H2:H3] * jnp.tanh(c)
                if write_hseq:
                    hseq_scr[0, t] = h[0:B_pad]
                    hseq_scr[1, tb] = h[B_pad:2 * B_pad]
            cells.append(c[0:B_pad])           # final fwd cell of this layer
            cells.append(c[B_pad:2 * B_pad])   # final bwd cell of this layer

        # ----- non_seq_proj + chunk + softplus (threshold=20) -----
        y = dot(cells[0], proj_parts[0][...])
        for idx in range(1, 2 * NL):
            y = y + dot(cells[idx], proj_parts[idx][...])
        y = y + proj_b[...]
        q_mean = y[:, 0:H]
        raw = y[:, H:H2]
        q_std = jnp.where(raw > 20.0, raw,
                          jnp.log1p(jnp.exp(jnp.minimum(raw, 20.0))))
        qmean_out[...] = q_mean
        qstd_out[...] = q_std

        # ----- decoder: hoisted input projection (reuses embeddings) -----
        ts_col = ts_ref[...].reshape(TB, 1)
        gi_d = ts_col * dw_ts[...]                       # (TB,1)*(1,4H) VPU bcast
        gi_d = gi_d + dot(meal_emb, dw_meal[...]) + dec_b[...]
        demo_gd = dot(demo_emb, dw_demo[...])            # (B_pad, 4H)
        gates_scr[:, :, 0:H4] = (gi_d.reshape(T, B_pad, H4)
                                 + demo_gd.reshape(1, B_pad, H4))

        whh_d = dec_whh[...]
        h = jnp.zeros((B_pad, H), F32)
        c = q_mean                                       # eval: sample == mean
        for t in range(T):
            g = gates_scr[t, :, 0:H4] + dot(h, whh_d)
            sg = jax.nn.sigmoid(g[:, 0:H3])
            gg = jnp.tanh(g[:, H3:H4])
            c = sg[:, H:H2] * c + sg[:, 0:H] * gg
            h = sg[:, H2:H3] * jnp.tanh(c)
            dech_scr[t] = h

        # ----- fused decoder_proj: VPU multiply + cross-lane reduce (no N=1 GEMM)
        w_row = dec_pw[...].reshape(1, 1, H)
        dec = jnp.sum(dech_scr[...] * w_row, axis=-1) + dec_pb[...]   # (T, B_pad)
        dec_out[...] = dec

    return kernel


# ------------------------------- parameters --------------------------------
def init_params(key, meal_size, demographics_size, embedding_size,
                hidden_size, num_layers):
    E, H, NL = embedding_size, hidden_size, num_layers
    enc_in = 1 + 1 + 1 + E + E
    dec_in = 1 + E + E
    keys = iter(jax.random.split(key, 256))

    def unif(shape, fan):
        k = 1.0 / math.sqrt(fan)
        return jax.random.uniform(next(keys), shape, F32, -k, k)

    p = {}
    p['meal_w'] = unif((E, meal_size), meal_size)           # Conv1d k=1 weight
    p['meal_b'] = unif((E,), meal_size)
    p['demo_w'] = unif((E, demographics_size), demographics_size)
    p['demo_b'] = unif((E,), demographics_size)

    enc = []
    for layer in range(NL):
        isz = enc_in if layer == 0 else 2 * H
        lp = {}
        for d in ('f', 'b'):
            lp['w_ih_' + d] = unif((4 * H, isz), H)
            lp['w_hh_' + d] = unif((4 * H, H), H)
            lp['b_ih_' + d] = unif((4 * H,), H)
            lp['b_hh_' + d] = unif((4 * H,), H)
        enc.append(lp)
    p['encoder'] = enc

    p['proj_w'] = unif((2 * H, 2 * H * NL), 2 * H * NL)
    p['proj_b'] = unif((2 * H,), 2 * H * NL)

    p['dec_w_ih'] = unif((4 * H, dec_in), H)
    p['dec_w_hh'] = unif((4 * H, H), H)
    p['dec_b_ih'] = unif((4 * H,), H)
    p['dec_b_hh'] = unif((4 * H,), H)

    p['dec_proj_w'] = unif((1, H), H)
    p['dec_proj_b'] = unif((1,), H)
    return p


# --------------------------------- forward ---------------------------------
def forward(params, cgm, timestamps, meals, demographics,
            hidden_size, num_layers, embedding_size):
    B, T, _ = cgm.shape
    H, E, NL = hidden_size, embedding_size, num_layers
    B_pad = ((B + 7) // 8) * 8          # pad batch to a full sublane

    # ---- tiny XLA glue: diff, layout to (T, B_pad, F) ----
    cgm_diff = jnp.concatenate([cgm[:, :1, :], cgm[:, 1:, :] - cgm[:, :-1, :]],
                               axis=1)
    base = jnp.concatenate([cgm, cgm_diff, timestamps], axis=-1)   # (B, T, 3)

    def to_tbf(x):
        x = jnp.transpose(x, (1, 0, 2))
        return jnp.pad(x, ((0, 0), (0, B_pad - B), (0, 0)))

    base_t = to_tbf(base)
    ts_t = to_tbf(timestamps)
    meals_t = to_tbf(meals)
    demo_p = jnp.pad(demographics, ((0, B_pad - B), (0, 0)))

    # ---- weight prep: gate perm [i,f,g,o]->[i,f,o,g], transpose, bf16 cast ----
    def perm(w):
        i, f, g, o = jnp.split(w, 4, axis=0)
        return jnp.concatenate([i, f, o, g], axis=0)

    args = [base_t, ts_t, meals_t, demo_p,
            params['meal_w'].T.astype(BF16), params['meal_b'].reshape(1, -1),
            params['demo_w'].T.astype(BF16), params['demo_b'].reshape(1, -1)]

    for l in range(NL):
        p = params['encoder'][l]
        w_ih_all = jnp.concatenate([perm(p['w_ih_f']).T, perm(p['w_ih_b']).T],
                                   axis=1)                       # (I, 8H)
        b_all = jnp.concatenate([perm(p['b_ih_f'] + p['b_hh_f']),
                                 perm(p['b_ih_b'] + p['b_hh_b'])]).reshape(1, -1)
        if l == 0:
            # input feature order: [cgm, diff, ts | meal(E) | demo(E)]
            args += [w_ih_all[0:3].astype(BF16),
                     w_ih_all[3:3 + E].astype(BF16),
                     w_ih_all[3 + E:3 + 2 * E].astype(BF16)]
        else:
            args += [w_ih_all[0:H].astype(BF16),        # fwd half of prev layer
                     w_ih_all[H:2 * H].astype(BF16)]    # bwd half of prev layer
        args += [b_all,
                 perm(p['w_hh_f']).T.astype(BF16),
                 perm(p['w_hh_b']).T.astype(BF16)]

    proj_w_t = params['proj_w'].T                               # (2*NL*H, 2H)
    args += [proj_w_t[i * H:(i + 1) * H].astype(BF16) for i in range(2 * NL)]
    args += [params['proj_b'].reshape(1, -1)]

    dec_w_ih = perm(params['dec_w_ih']).T                       # (dec_in, 4H)
    args += [dec_w_ih[0:1],                                     # ts row (VPU, f32)
             dec_w_ih[1:1 + E].astype(BF16),
             dec_w_ih[1 + E:1 + 2 * E].astype(BF16),
             perm(params['dec_b_ih'] + params['dec_b_hh']).reshape(1, -1),
             perm(params['dec_w_hh']).T.astype(BF16),
             params['dec_proj_w'].reshape(1, -1),
             params['dec_proj_b'].reshape(1, 1)]

    kernel = _make_fused_kernel(T, B_pad, H, NL)
    dec_tb, q_mean_p, q_std_p = pl.pallas_call(
        kernel,
        out_shape=(jax.ShapeDtypeStruct((T, B_pad), F32),
                   jax.ShapeDtypeStruct((B_pad, H), F32),
                   jax.ShapeDtypeStruct((B_pad, H), F32)),
        in_specs=[_VMEM] * len(args),
        out_specs=(_VMEM, _VMEM, _VMEM),
        scratch_shapes=[pltpu.VMEM((T, B_pad, 8 * H), F32),
                        pltpu.VMEM((2, T, B_pad, H), F32),
                        pltpu.VMEM((T, B_pad, H), F32)],
    )(*args)

    decoding = jnp.transpose(dec_tb[:, :B])[:, :, None]          # (B, T, 1)
    return decoding, (q_mean_p[:B], q_std_p[:B])


# ----------------------------------- main -----------------------------------
if __name__ == "__main__":
    meal_size, demographics_size, embedding_size = 4, 3, 8
    hidden_size, num_layers = 32, 2
    B, T = 2, 8

    key = jax.random.PRNGKey(0)
    kp, kc, km, kd = jax.random.split(key, 4)
    params = init_params(kp, meal_size, demographics_size, embedding_size,
                         hidden_size, num_layers)

    cgm = jax.random.normal(kc, (B, T, 1), F32)
    timestamps = jnp.tile(jnp.arange(T, dtype=F32)[None, :, None], (B, 1, 1)) / T
    meals = jax.random.normal(km, (B, T, meal_size), F32)
    meals = meals.at[0, 3, :].set(jnp.nan)          # exercise NanWrapper
    demographics = jax.random.normal(kd, (B, demographics_size), F32)
    demographics = demographics.at[1, 0].set(jnp.nan)

    fwd = jax.jit(functools.partial(forward, hidden_size=hidden_size,
                                    num_layers=num_layers,
                                    embedding_size=embedding_size))
    decoding, (q_mean, q_std) = fwd(params, cgm, timestamps, meals, demographics)
    jax.block_until_ready((decoding, q_mean, q_std))

    assert decoding.shape == (B, T, 1)
    assert q_mean.shape == (B, hidden_size) and q_std.shape == (B, hidden_size)
    assert not bool(jnp.any(jnp.isnan(decoding)))
    assert not bool(jnp.any(jnp.isnan(q_mean)))
    assert bool(jnp.all(q_std > 0))
    print("KERNEL_OK")
</pallas_src>

<mosaic_0001>
module attributes {stable_mosaic.version = 11 : i64} {
  func.func @kernel(%arg0: memref<8x8x3xf32, #tpu.memory_space<vmem>>, %arg1: memref<8x8x1xf32, #tpu.memory_space<vmem>>, %arg2: memref<8x8x4xf32, #tpu.memory_space<vmem>>, %arg3: memref<8x3xf32, #tpu.memory_space<vmem>>, %arg4: memref<4x8xbf16, #tpu.memory_space<vmem>>, %arg5: memref<1x8xf32, #tpu.memory_space<vmem>>, %arg6: memref<3x8xbf16, #tpu.memory_space<vmem>>, %arg7: memref<1x8xf32, #tpu.memory_space<vmem>>, %arg8: memref<3x256xbf16, #tpu.memory_space<vmem>>, %arg9: memref<8x256xbf16, #tpu.memory_space<vmem>>, %arg10: memref<8x256xbf16, #tpu.memory_space<vmem>>, %arg11: memref<1x256xf32, #tpu.memory_space<vmem>>, %arg12: memref<32x128xbf16, #tpu.memory_space<vmem>>, %arg13: memref<32x128xbf16, #tpu.memory_space<vmem>>, %arg14: memref<32x256xbf16, #tpu.memory_space<vmem>>, %arg15: memref<32x256xbf16, #tpu.memory_space<vmem>>, %arg16: memref<1x256xf32, #tpu.memory_space<vmem>>, %arg17: memref<32x128xbf16, #tpu.memory_space<vmem>>, %arg18: memref<32x128xbf16, #tpu.memory_space<vmem>>, %arg19: memref<32x64xbf16, #tpu.memory_space<vmem>>, %arg20: memref<32x64xbf16, #tpu.memory_space<vmem>>, %arg21: memref<32x64xbf16, #tpu.memory_space<vmem>>, %arg22: memref<32x64xbf16, #tpu.memory_space<vmem>>, %arg23: memref<1x64xf32, #tpu.memory_space<vmem>>, %arg24: memref<1x128xf32, #tpu.memory_space<vmem>>, %arg25: memref<8x128xbf16, #tpu.memory_space<vmem>>, %arg26: memref<8x128xbf16, #tpu.memory_space<vmem>>, %arg27: memref<1x128xf32, #tpu.memory_space<vmem>>, %arg28: memref<32x128xbf16, #tpu.memory_space<vmem>>, %arg29: memref<1x32xf32, #tpu.memory_space<vmem>>, %arg30: memref<1x1xf32, #tpu.memory_space<vmem>>, %arg31: memref<8x8xf32, #tpu.memory_space<vmem>>, %arg32: memref<8x32xf32, #tpu.memory_space<vmem>>, %arg33: memref<8x32xf32, #tpu.memory_space<vmem>>, %arg34: memref<8x8x256xf32, #tpu.memory_space<vmem>>, %arg35: memref<2x8x8x32xf32, #tpu.memory_space<vmem>>, %arg36: memref<8x8x32xf32, #tpu.memory_space<vmem>>) attributes {dimension_semantics = [], scalar_prefetch = 0 : i64, scratch_operands = 3 : i64, tpu.core_type = #tpu.core_type<tc>} {
    %c0 = arith.constant 0 : index
    %c0_0 = arith.constant 0 : index
    %c0_1 = arith.constant 0 : index
    %0 = vector.load %arg2[%c0, %c0_0, %c0_1] : memref<8x8x4xf32, #tpu.memory_space<vmem>>, vector<8x8x4xf32>
    %1 = vector.shape_cast %0 : vector<8x8x4xf32> to vector<64x4xf32>
    %2 = arith.cmpf one, %1, %1 : vector<64x4xf32>
    %cst = arith.constant 1.000000e+00 : f32
    %cst_2 = arith.constant 0.000000e+00 : f32
    %3 = vector.broadcast %cst : f32 to vector<64x4xf32>
    %4 = vector.broadcast %cst_2 : f32 to vector<64x4xf32>
    %5 = arith.select %2, %3, %4 : vector<64x4xi1>, vector<64x4xf32>
    %cst_3 = arith.constant dense<0xFF800000> : vector<64xf32>
    %6 = vector.multi_reduction <maximumf>, %5, %cst_3 [1] : vector<64x4xf32> to vector<64xf32>
    %cst_4 = arith.constant 0.000000e+00 : f32
    %7 = vector.broadcast %cst_4 : f32 to vector<64xf32>
    %8 = arith.cmpf ogt, %6, %7 : vector<64xf32>
    %9 = vector.shape_cast %8 : vector<64xi1> to vector<64x1xi1>
    %cst_5 = arith.constant 0.000000e+00 : f32
    %10 = vector.shape_cast %9 : vector<64x1xi1> to vector<64x1xi1>
    %11 = vector.broadcast %10 : vector<64x1xi1> to vector<64x4xi1>
    %12 = vector.broadcast %cst_5 : f32 to vector<64x4xf32>
    %13 = arith.select %11, %12, %1 : vector<64x4xi1>, vector<64x4xf32>
    %c0_6 = arith.constant 0 : index
    %c0_7 = arith.constant 0 : index
    %14 = vector.load %arg4[%c0_6, %c0_7] : memref<4x8xbf16, #tpu.memory_space<vmem>>, vector<4x8xbf16>
    %15 = arith.truncf %13 : vector<64x4xf32> to vector<64x4xbf16>
    %cst_8 = arith.constant dense<0.000000e+00> : vector<64x8xf32>
    %16 = tpu.matmul %15, %14, %cst_8 {dimension_numbers = #tpu.dot_dimension_numbers<[1], [0], [0], [1], [0, 0, 1, 1], [], []>} : vector<64x4xbf16>, vector<4x8xbf16>, vector<64x8xf32> -> vector<64x8xf32>
    %c0_9 = arith.constant 0 : index
    %c0_10 = arith.constant 0 : index
    %17 = vector.load %arg5[%c0_9, %c0_10] : memref<1x8xf32, #tpu.memory_space<vmem>>, vector<1x8xf32>
    %18 = vector.broadcast %17 : vector<1x8xf32> to vector<64x8xf32>
    %19 = arith.addf %16, %18 : vector<64x8xf32>
    %20 = arith.extui %9 : vector<64x1xi1> to vector<64x1xi32>
    %21 = arith.sitofp %20 : vector<64x1xi32> to vector<64x1xf32>
    %cst_11 = arith.constant 1.000000e+00 : f32
    %22 = vector.broadcast %cst_11 : f32 to vector<64x1xf32>
    %23 = arith.subf %22, %21 : vector<64x1xf32>
    %24 = vector.broadcast %23 : vector<64x1xf32> to vector<64x8xf32>
    %25 = arith.mulf %19, %24 : vector<64x8xf32>
    %c0_12 = arith.constant 0 : index
    %c0_13 = arith.constant 0 : index
    %26 = vector.load %arg3[%c0_12, %c0_13] : memref<8x3xf32, #tpu.memory_space<vmem>>, vector<8x3xf32>
    %27 = arith.cmpf one, %26, %26 : vector<8x3xf32>
    %cst_14 = arith.constant 1.000000e+00 : f32
    %cst_15 = arith.constant 0.000000e+00 : f32
    %28 = vector.broadcast %cst_14 : f32 to vector<8x3xf32>
    %29 = vector.broadcast %cst_15 : f32 to vector<8x3xf32>
    %30 = arith.select %27, %28, %29 : vector<8x3xi1>, vector<8x3xf32>
    %cst_16 = arith.constant dense<0xFF800000> : vector<8xf32>
    %31 = vector.multi_reduction <maximumf>, %30, %cst_16 [1] : vector<8x3xf32> to vector<8xf32>
    %cst_17 = arith.constant 0.000000e+00 : f32
    %32 = vector.broadcast %cst_17 : f32 to vector<8xf32>
    %33 = arith.cmpf ogt, %31, %32 : vector<8xf32>
    %34 = vector.shape_cast %33 : vector<8xi1> to vector<8x1xi1>
    %cst_18 = arith.constant 0.000000e+00 : f32
    %35 = vector.shape_cast %34 : vector<8x1xi1> to vector<8x1xi1>
    %36 = vector.broadcast %35 : vector<8x1xi1> to vector<8x3xi1>
    %37 = vector.broadcast %cst_18 : f32 to vector<8x3xf32>
    %38 = arith.select %36, %37, %26 : vector<8x3xi1>, vector<8x3xf32>
    %c0_19 = arith.constant 0 : index
    %c0_20 = arith.constant 0 : index
    %39 = vector.load %arg6[%c0_19, %c0_20] : memref<3x8xbf16, #tpu.memory_space<vmem>>, vector<3x8xbf16>
    %40 = arith.truncf %38 : vector<8x3xf32> to vector<8x3xbf16>
    %cst_21 = arith.constant dense<0.000000e+00> : vector<8x8xf32>
    %41 = tpu.matmul %40, %39, %cst_21 {dimension_numbers = #tpu.dot_dimension_numbers<[1], [0], [0], [1], [0, 0, 1, 1], [], []>} : vector<8x3xbf16>, vector<3x8xbf16>, vector<8x8xf32> -> vector<8x8xf32>
    %c0_22 = arith.constant 0 : index
    %c0_23 = arith.constant 0 : index
    %42 = vector.load %arg7[%c0_22, %c0_23] : memref<1x8xf32, #tpu.memory_space<vmem>>, vector<1x8xf32>
    %43 = vector.broadcast %42 : vector<1x8xf32> to vector<8x8xf32>
    %44 = arith.addf %41, %43 : vector<8x8xf32>
    %45 = arith.extui %34 : vector<8x1xi1> to vector<8x1xi32>
    %46 = arith.sitofp %45 : vector<8x1xi32> to vector<8x1xf32>
    %cst_24 = arith.constant 1.000000e+00 : f32
    %47 = vector.broadcast %cst_24 : f32 to vector<8x1xf32>
    %48 = arith.subf %47, %46 : vector<8x1xf32>
    %49 = vector.broadcast %48 : vector<8x1xf32> to vector<8x8xf32>
    %50 = arith.mulf %44, %49 : vector<8x8xf32>
    %c0_25 = arith.constant 0 : index
    %c0_26 = arith.constant 0 : index
    %c0_27 = arith.constant 0 : index
    %51 = vector.load %arg0[%c0_25, %c0_26, %c0_27] : memref<8x8x3xf32, #tpu.memory_space<vmem>>, vector<8x8x3xf32>
    %52 = vector.shape_cast %51 : vector<8x8x3xf32> to vector<64x3xf32>
    %c0_28 = arith.constant 0 : index
    %c0_29 = arith.constant 0 : index
    %53 = vector.load %arg8[%c0_28, %c0_29] : memref<3x256xbf16, #tpu.memory_space<vmem>>, vector<3x256xbf16>
    %54 = arith.truncf %52 : vector<64x3xf32> to vector<64x3xbf16>
    %cst_30 = arith.constant dense<0.000000e+00> : vector<64x256xf32>
    %55 = tpu.matmul %54, %53, %cst_30 {dimension_numbers = #tpu.dot_dimension_numbers<[1], [0], [0], [1], [0, 0, 1, 1], [], []>} : vector<64x3xbf16>, vector<3x256xbf16>, vector<64x256xf32> -> vector<64x256xf32>
    %c0_31 = arith.constant 0 : index
    %c0_32 = arith.constant 0 : index
    %56 = vector.load %arg9[%c0_31, %c0_32] : memref<8x256xbf16, #tpu.memory_space<vmem>>, vector<8x256xbf16>
    %57 = arith.truncf %25 : vector<64x8xf32> to vector<64x8xbf16>
    %cst_33 = arith.constant dense<0.000000e+00> : vector<64x256xf32>
    %58 = tpu.matmul %57, %56, %cst_33 {dimension_numbers = #tpu.dot_dimension_numbers<[1], [0], [0], [1], [0, 0, 1, 1], [], []>} : vector<64x8xbf16>, vector<8x256xbf16>, vector<64x256xf32> -> vector<64x256xf32>
    %59 = arith.addf %55, %58 : vector<64x256xf32>
    %c0_34 = arith.constant 0 : index
    %c0_35 = arith.constant 0 : index
    %60 = vector.load %arg11[%c0_34, %c0_35] : memref<1x256xf32, #tpu.memory_space<vmem>>, vector<1x256xf32>
    %61 = vector.broadcast %60 : vector<1x256xf32> to vector<64x256xf32>
    %62 = arith.addf %59, %61 : vector<64x256xf32>
    %c0_36 = arith.constant 0 : index
    %c0_37 = arith.constant 0 : index
    %63 = vector.load %arg10[%c0_36, %c0_37] : memref<8x256xbf16, #tpu.memory_space<vmem>>, vector<8x256xbf16>
    %64 = arith.truncf %50 : vector<8x8xf32> to vector<8x8xbf16>
    %cst_38 = arith.constant dense<0.000000e+00> : vector<8x256xf32>
    %65 = tpu.matmul %64, %63, %cst_38 {dimension_numbers = #tpu.dot_dimension_numbers<[1], [0], [0], [1], [0, 0, 1, 1], [], []>} : vector<8x8xbf16>, vector<8x256xbf16>, vector<8x256xf32> -> vector<8x256xf32>
    %66 = vector.shape_cast %62 : vector<64x256xf32> to vector<8x8x256xf32>
    %67 = vector.shape_cast %65 : vector<8x256xf32> to vector<1x8x256xf32>
    %68 = vector.broadcast %67 : vector<1x8x256xf32> to vector<8x8x256xf32>
    %69 = arith.addf %66, %68 : vector<8x8x256xf32>
    %c0_39 = arith.constant 0 : index
    %c0_40 = arith.constant 0 : index
    %c0_41 = arith.constant 0 : index
    %70 = vector.load %arg34[%c0_39, %c0_40, %c0_41] : memref<8x8x256xf32, #tpu.memory_space<vmem>>, vector<8x8x256xf32>
    tpu.vector_store %arg34[%c0_39, %c0_40, %c0_41], %69 {strides = array<i32>} : memref<8x8x256xf32, #tpu.memory_space<vmem>>, vector<8x8x256xf32>,
    %c0_42 = arith.constant 0 : index
    %c0_43 = arith.constant 0 : index
    %71 = vector.load %arg12[%c0_42, %c0_43] : memref<32x128xbf16, #tpu.memory_space<vmem>>, vector<32x128xbf16>
    %c0_44 = arith.constant 0 : index
    %c0_45 = arith.constant 0 : index
    %72 = vector.load %arg13[%c0_44, %c0_45] : memref<32x128xbf16, #tpu.memory_space<vmem>>, vector<32x128xbf16>
    %cst_46 = arith.constant 0.000000e+00 : f32
    %73 = vector.broadcast %cst_46 : f32 to vector<16x32xf32>
    %cst_47 = arith.constant 0.000000e+00 : f32
    %74 = vector.broadcast %cst_47 : f32 to vector<16x32xf32>
    %c0_48 = arith.constant 0 : index
    %c0_49 = arith.constant 0 : index
    %c0_50 = arith.constant 0 : index
    %75 = vector.load %arg34[%c0_48, %c0_49, %c0_50] : memref<8x8x256xf32, #tpu.memory_space<vmem>>, vector<1x8x128xf32>
    %76 = vector.shape_cast %75 : vector<1x8x128xf32> to vector<8x128xf32>
    %77 = vector.extract_strided_slice %73 {offsets = [0, 0], sizes = [8, 32], strides = [1, 1]} : vector<16x32xf32> to vector<8x32xf32>
    %78 = arith.truncf %77 : vector<8x32xf32> to vector<8x32xbf16>
    %cst_51 = arith.constant dense<0.000000e+00> : vector<8x128xf32>
    %79 = tpu.matmul %78, %71, %cst_51 {dimension_numbers = #tpu.dot_dimension_numbers<[1], [0], [0], [1], [0, 0, 1, 1], [], []>} : vector<8x32xbf16>, vector<32x128xbf16>, vector<8x128xf32> -> vector<8x128xf32>
    %80 = arith.addf %76, %79 : vector<8x128xf32>
    %c7 = arith.constant 7 : index
    %c0_52 = arith.constant 0 : index
    %c128 = arith.constant 128 : index
    %81 = vector.load %arg34[%c7, %c0_52, %c128] : memref<8x8x256xf32, #tpu.memory_space<vmem>>, vector<1x8x128xf32>
    %82 = vector.shape_cast %81 : vector<1x8x128xf32> to vector<8x128xf32>
    %83 = vector.extract_strided_slice %73 {offsets = [8, 0], sizes = [8, 32], strides = [1, 1]} : vector<16x32xf32> to vector<8x32xf32>
    %84 = arith.truncf %83 : vector<8x32xf32> to vector<8x32xbf16>
    %cst_53 = arith.constant dense<0.000000e+00> : vector<8x128xf32>
    %85 = tpu.matmul %84, %72, %cst_53 {dimension_numbers = #tpu.dot_dimension_numbers<[1], [0], [0], [1], [0, 0, 1, 1], [], []>} : vector<8x32xbf16>, vector<32x128xbf16>, vector<8x128xf32> -> vector<8x128xf32>
    %86 = arith.addf %82, %85 : vector<8x128xf32>
    %87 = tpu.concatenate %80, %86 in 0 : vector<8x128xf32>, vector<8x128xf32> -> vector<16x128xf32>
    %88 = vector.extract_strided_slice %87 {offsets = [0, 0], sizes = [16, 96], strides = [1, 1]} : vector<16x128xf32> to vector<16x96xf32>
    %89 = arith.negf %88 : vector<16x96xf32>
    %90 = math.exp %89 : vector<16x96xf32>
    %cst_54 = arith.constant 1.000000e+00 : f32
    %91 = vector.broadcast %cst_54 : f32 to vector<16x96xf32>
    %92 = arith.addf %91, %90 : vector<16x96xf32>
    %93 = arith.divf %91, %92 : vector<16x96xf32>
    %94 = vector.extract_strided_slice %87 {offsets = [0, 96], sizes = [16, 32], strides = [1, 1]} : vector<16x128xf32> to vector<16x32xf32>
    %95 = math.tanh %94 : vector<16x32xf32>
    %96 = vector.extract_strided_slice %93 {offsets = [0, 32], sizes = [16, 32], strides = [1, 1]} : vector<16x96xf32> to vector<16x32xf32>
    %97 = arith.mulf %96, %74 : vector<16x32xf32>
    %98 = vector.extract_strided_slice %93 {offsets = [0, 0], sizes = [16, 32], strides = [1, 1]} : vector<16x96xf32> to vector<16x32xf32>
    %99 = arith.mulf %98, %95 : vector<16x32xf32>
    %100 = arith.addf %97, %99 : vector<16x32xf32>
    %101 = vector.extract_strided_slice %93 {offsets = [0, 64], sizes = [16, 32], strides = [1, 1]} : vector<16x96xf32> to vector<16x32xf32>
    %102 = math.tanh %100 : vector<16x32xf32>
    %103 = arith.mulf %101, %102 : vector<16x32xf32>
    %104 = vector.extract_strided_slice %103 {offsets = [0, 0], sizes = [8, 32], strides = [1, 1]} : vector<16x32xf32> to vector<8x32xf32>
    %c0_55 = arith.constant 0 : index
    %c0_56 = arith.constant 0 : index
    %c0_57 = arith.constant 0 : index
    %c0_58 = arith.constant 0 : index
    %105 = vector.load %arg35[%c0_55, %c0_56, %c0_57, %c0_58] : memref<2x8x8x32xf32, #tpu.memory_space<vmem>>, vector<1x1x8x32xf32>
    %106 = vector.shape_cast %105 : vector<1x1x8x32xf32> to vector<8x32xf32>
    %107 = vector.shape_cast %104 : vector<8x32xf32> to vector<1x1x8x32xf32>
    tpu.vector_store %arg35[%c0_55, %c0_56, %c0_57, %c0_58], %107 {strides = array<i32>} : memref<2x8x8x32xf32, #tpu.memory_space<vmem>>, vector<1x1x8x32xf32>,
    %108 = vector.extract_strided_slice %103 {offsets = [8, 0], sizes = [8, 32], strides = [1, 1]} : vector<16x32xf32> to vector<8x32xf32>
    %c1 = arith.constant 1 : index
    %c7_59 = arith.constant 7 : index
    %c0_60 = arith.constant 0 : index
    %c0_61 = arith.constant 0 : index
    %109 = vector.load %arg35[%c1, %c7_59, %c0_60, %c0_61] : memref<2x8x8x32xf32, #tpu.memory_space<vmem>>, vector<1x1x8x32xf32>
    %110 = vector.shape_cast %109 : vector<1x1x8x32xf32> to vector<8x32xf32>
    %111 = vector.shape_cast %108 : vector<8x32xf32> to vector<1x1x8x32xf32>
    tpu.vector_store %arg35[%c1, %c7_59, %c0_60, %c0_61], %111 {strides = array<i32>} : memref<2x8x8x32xf32, #tpu.memory_space<vmem>>, vector<1x1x8x32xf32>,
    %c1_62 = arith.constant 1 : index
    %c0_63 = arith.constant 0 : index
    %c0_64 = arith.constant 0 : index
    %112 = vector.load %arg34[%c1_62, %c0_63, %c0_64] : memref<8x8x256xf32, #tpu.memory_space<vmem>>, vector<1x8x128xf32>
    %113 = vector.shape_cast %112 : vector<1x8x128xf32> to vector<8x128xf32>
    %114 = vector.extract_strided_slice %103 {offsets = [0, 0], sizes = [8, 32], strides = [1, 1]} : vector<16x32xf32> to vector<8x32xf32>
    %115 = arith.truncf %114 : vector<8x32xf32> to vector<8x32xbf16>
    %cst_65 = arith.constant dense<0.000000e+00> : vector<8x128xf32>
    %116 = tpu.matmul %115, %71, %cst_65 {dimension_numbers = #tpu.dot_dimension_numbers<[1], [0], [0], [1], [0, 0, 1, 1], [], []>} : vector<8x32xbf16>, vector<32x128xbf16>, vector<8x128xf32> -> vector<8x128xf32>
    %117 = arith.addf %113, %116 : vector<8x128xf32>
    %c6 = arith.constant 6 : index
    %c0_66 = arith.constant 0 : index
    %c128_67 = arith.constant 128 : index
    %118 = vector.load %arg34[%c6, %c0_66, %c128_67] : memref<8x8x256xf32, #tpu.memory_space<vmem>>, vector<1x8x128xf32>
    %119 = vector.shape_cast %118 : vector<1x8x128xf32> to vector<8x128xf32>
    %120 = vector.extract_strided_slice %103 {offsets = [8, 0], sizes = [8, 32], strides = [1, 1]} : vector<16x32xf32> to vector<8x32xf32>
    %121 = arith.truncf %120 : vector<8x32xf32> to vector<8x32xbf16>
    %cst_68 = arith.constant dense<0.000000e+00> : vector<8x128xf32>
    %122 = tpu.matmul %121, %72, %cst_68 {dimension_numbers = #tpu.dot_dimension_numbers<[1], [0], [0], [1], [0, 0, 1, 1], [], []>} : vector<8x32xbf16>, vector<32x128xbf16>, vector<8x128xf32> -> vector<8x128xf32>
    %123 = arith.addf %119, %122 : vector<8x128xf32>
    %124 = tpu.concatenate %117, %123 in 0 : vector<8x128xf32>, vector<8x128xf32> -> vector<16x128xf32>
    %125 = vector.extract_strided_slice %124 {offsets = [0, 0], sizes = [16, 96], strides = [1, 1]} : vector<16x128xf32> to vector<16x96xf32>
    %126 = arith.negf %125 : vector<16x96xf32>
    %127 = math.exp %126 : vector<16x96xf32>
    %cst_69 = arith.constant 1.000000e+00 : f32
    %128 = vector.broadcast %cst_69 : f32 to vector<16x96xf32>
    %129 = arith.addf %128, %127 : vector<16x96xf32>
    %130 = arith.divf %128, %129 : vector<16x96xf32>
    %131 = vector.extract_strided_slice %124 {offsets = [0, 96], sizes = [16, 32], strides = [1, 1]} : vector<16x128xf32> to vector<16x32xf32>
    %132 = math.tanh %131 : vector<16x32xf32>
    %133 = vector.extract_strided_slice %130 {offsets = [0, 32], sizes = [16, 32], strides = [1, 1]} : vector<16x96xf32> to vector<16x32xf32>
    %134 = arith.mulf %133, %100 : vector<16x32xf32>
    %135 = vector.extract_strided_slice %130 {offsets = [0, 0], sizes = [16, 32], strides = [1, 1]} : vector<16x96xf32> to vector<16x32xf32>
    %136 = arith.mulf %135, %132 : vector<16x32xf32>
    %137 = arith.addf %134, %136 : vector<16x32xf32>
    %138 = vector.extract_strided_slice %130 {offsets = [0, 64], sizes = [16, 32], strides = [1, 1]} : vector<16x96xf32> to vector<16x32xf32>
    %139 = math.tanh %137 : vector<16x32xf32>
    %140 = arith.mulf %138, %139 : vector<16x32xf32>
    %141 = vector.extract_strided_slice %140 {offsets = [0, 0], sizes = [8, 32], strides = [1, 1]} : vector<16x32xf32> to vector<8x32xf32>
    %c0_70 = arith.constant 0 : index
    %c1_71 = arith.constant 1 : index
    %c0_72 = arith.constant 0 : index
    %c0_73 = arith.constant 0 : index
    %142 = vector.load %arg35[%c0_70, %c1_71, %c0_72, %c0_73] : memref<2x8x8x32xf32, #tpu.memory_space<vmem>>, vector<1x1x8x32xf32>
    %143 = vector.shape_cast %142 : vector<1x1x8x32xf32> to vector<8x32xf32>
    %144 = vector.shape_cast %141 : vector<8x32xf32> to vector<1x1x8x32xf32>
    tpu.vector_store %arg35[%c0_70, %c1_71, %c0_72, %c0_73], %144 {strides = array<i32>} : memref<2x8x8x32xf32, #tpu.memory_space<vmem>>, vector<1x1x8x32xf32>,
    %145 = vector.extract_strided_slice %140 {offsets = [8, 0], sizes = [8, 32], strides = [1, 1]} : vector<16x32xf32> to vector<8x32xf32>
    %c1_74 = arith.constant 1 : index
    %c6_75 = arith.constant 6 : index
    %c0_76 = arith.constant 0 : index
    %c0_77 = arith.constant 0 : index
    %146 = vector.load %arg35[%c1_74, %c6_75, %c0_76, %c0_77] : memref<2x8x8x32xf32, #tpu.memory_space<vmem>>, vector<1x1x8x32xf32>
    %147 = vector.shape_cast %146 : vector<1x1x8x32xf32> to vector<8x32xf32>
    %148 = vector.shape_cast %145 : vector<8x32xf32> to vector<1x1x8x32xf32>
    tpu.vector_store %arg35[%c1_74, %c6_75, %c0_76, %c0_77], %148 {strides = array<i32>} : memref<2x8x8x32xf32, #tpu.memory_space<vmem>>, vector<1x1x8x32xf32>,
    %c2 = arith.constant 2 : index
    %c0_78 = arith.constant 0 : index
    %c0_79 = arith.constant 0 : index
    %149 = vector.load %arg34[%c2, %c0_78, %c0_79] : memref<8x8x256xf32, #tpu.memory_space<vmem>>, vector<1x8x128xf32>
    %150 = vector.shape_cast %149 : vector<1x8x128xf32> to vector<8x128xf32>
    %151 = vector.extract_strided_slice %140 {offsets = [0, 0], sizes = [8, 32], strides = [1, 1]} : vector<16x32xf32> to vector<8x32xf32>
    %152 = arith.truncf %151 : vector<8x32xf32> to vector<8x32xbf16>
    %cst_80 = arith.constant dense<0.000000e+00> : vector<8x128xf32>
    %153 = tpu.matmul %152, %71, %cst_80 {dimension_numbers = #tpu.dot_dimension_numbers<[1], [0], [0], [1], [0, 0, 1, 1], [], []>} : vector<8x32xbf16>, vector<32x128xbf16>, vector<8x128xf32> -> vector<8x128xf32>
    %154 = arith.addf %150, %153 : vector<8x128xf32>
    %c5 = arith.constant 5 : index
    %c0_81 = arith.constant 0 : index
    %c128_82 = arith.constant 128 : index
    %155 = vector.load %arg34[%c5, %c0_81, %c128_82] : memref<8x8x256xf32, #tpu.memory_space<vmem>>, vector<1x8x128xf32>
    %156 = vector.shape_cast %155 : vector<1x8x128xf32> to vector<8x128xf32>
    %157 = vector.extract_strided_slice %140 {offsets = [8, 0], sizes = [8, 32], strides = [1, 1]} : vector<16x32xf32> to vector<8x32xf32>
    %158 = arith.truncf %157 : vector<8x32xf32> to vector<8x32xbf16>
    %cst_83 = arith.constant dense<0.000000e+00> : vector<8x128xf32>
    %159 = tpu.matmul %158, %72, %cst_83 {dimension_numbers = #tpu.dot_dimension_numbers<[1], [0], [0], [1], [0, 0, 1, 1], [], []>} : vector<8x32xbf16>, vector<32x128xbf16>, vector<8x128xf32> -> vector<8x128xf32>
    %160 = arith.addf %156, %159 : vector<8x128xf32>
    %161 = tpu.concatenate %154, %160 in 0 : vector<8x128xf32>, vector<8x128xf32> -> vector<16x128xf32>
    %162 = vector.extract_strided_slice %161 {offsets = [0, 0], sizes = [16, 96], strides = [1, 1]} : vector<16x128xf32> to vector<16x96xf32>
    %163 = arith.negf %162 : vector<16x96xf32>
    %164 = math.exp %163 : vector<16x96xf32>
    %cst_84 = arith.constant 1.000000e+00 : f32
    %165 = vector.broadcast %cst_84 : f32 to vector<16x96xf32>
    %166 = arith.addf %165, %164 : vector<16x96xf32>
    %167 = arith.divf %165, %166 : vector<16x96xf32>
    %168 = vector.extract_strided_slice %161 {offsets = [0, 96], sizes = [16, 32], strides = [1, 1]} : vector<16x128xf32> to vector<16x32xf32>
    %169 = math.tanh %168 : vector<16x32xf32>
    %170 = vector.extract_strided_slice %167 {offsets = [0, 32], sizes = [16, 32], strides = [1, 1]} : vector<16x96xf32> to vector<16x32xf32>
    %171 = arith.mulf %170, %137 : vector<16x32xf32>
    %172 = vector.extract_strided_slice %167 {offsets = [0, 0], sizes = [16, 32], strides = [1, 1]} : vector<16x96xf32> to vector<16x32xf32>
    %173 = arith.mulf %172, %169 : vector<16x32xf32>
    %174 = arith.addf %171, %173 : vector<16x32xf32>
    %175 = vector.extract_strided_slice %167 {offsets = [0, 64], sizes = [16, 32], strides = [1, 1]} : vector<16x96xf32> to vector<16x32xf32>
    %176 = math.tanh %174 : vector<16x32xf32>
    %177 = arith.mulf %175, %176 : vector<16x32xf32>
    %178 = vector.extract_strided_slice %177 {offsets = [0, 0], sizes = [8, 32], strides = [1, 1]} : vector<16x32xf32> to vector<8x32xf32>
    %c0_85 = arith.constant 0 : index
    %c2_86 = arith.constant 2 : index
    %c0_87 = arith.constant 0 : index
    %c0_88 = arith.constant 0 : index
    %179 = vector.load %arg35[%c0_85, %c2_86, %c0_87, %c0_88] : memref<2x8x8x32xf32, #tpu.memory_space<vmem>>, vector<1x1x8x32xf32>
    %180 = vector.shape_cast %179 : vector<1x1x8x32xf32> to vector<8x32xf32>
    %181 = vector.shape_cast %178 : vector<8x32xf32> to vector<1x1x8x32xf32>
    tpu.vector_store %arg35[%c0_85, %c2_86, %c0_87, %c0_88], %181 {strides = array<i32>} : memref<2x8x8x32xf32, #tpu.memory_space<vmem>>, vector<1x1x8x32xf32>,
    %182 = vector.extract_strided_slice %177 {offsets = [8, 0], sizes = [8, 32], strides = [1, 1]} : vector<16x32xf32> to vector<8x32xf32>
    %c1_89 = arith.constant 1 : index
    %c5_90 = arith.constant 5 : index
    %c0_91 = arith.constant 0 : index
    %c0_92 = arith.constant 0 : index
    %183 = vector.load %arg35[%c1_89, %c5_90, %c0_91, %c0_92] : memref<2x8x8x32xf32, #tpu.memory_space<vmem>>, vector<1x1x8x32xf32>
    %184 = vector.shape_cast %183 : vector<1x1x8x32xf32> to vector<8x32xf32>
    %185 = vector.shape_cast %182 : vector<8x32xf32> to vector<1x1x8x32xf32>
    tpu.vector_store %arg35[%c1_89, %c5_90, %c0_91, %c0_92], %185 {strides = array<i32>} : memref<2x8x8x32xf32, #tpu.memory_space<vmem>>, vector<1x1x8x32xf32>,
    %c3 = arith.constant 3 : index
    %c0_93 = arith.constant 0 : index
    %c0_94 = arith.constant 0 : index
    %186 = vector.load %arg34[%c3, %c0_93, %c0_94] : memref<8x8x256xf32, #tpu.memory_space<vmem>>, vector<1x8x128xf32>
    %187 = vector.shape_cast %186 : vector<1x8x128xf32> to vector<8x128xf32>
    %188 = vector.extract_strided_slice %177 {offsets = [0, 0], sizes = [8, 32], strides = [1, 1]} : vector<16x32xf32> to vector<8x32xf32>
    %189 = arith.truncf %188 : vector<8x32xf32> to vector<8x32xbf16>
    %cst_95 = arith.constant dense<0.000000e+00> : vector<8x128xf32>
    %190 = tpu.matmul %189, %71, %cst_95 {dimension_numbers = #tpu.dot_dimension_numbers<[1], [0], [0], [1], [0, 0, 1, 1], [], []>} : vector<8x32xbf16>, vector<32x128xbf16>, vector<8x128xf32> -> vector<8x128xf32>
    %191 = arith.addf %187, %190 : vector<8x128xf32>
    %c4 = arith.constant 4 : index
    %c0_96 = arith.constant 0 : index
    %c128_97 = arith.constant 128 : index
    %192 = vector.load %arg34[%c4, %c0_96, %c128_97] : memref<8x8x256xf32, #tpu.memory_space<vmem>>, vector<1x8x128xf32>
    %193 = vector.shape_cast %192 : vector<1x8x128xf32> to vector<8x128xf32>
    %194 = vector.extract_strided_slice %177 {offsets = [8, 0], sizes = [8, 32], strides = [1, 1]} : vector<16x32xf32> to vector<8x32xf32>
    %195 = arith.truncf %194 : vector<8x32xf32> to vector<8x32xbf16>
    %cst_98 = arith.constant dense<0.000000e+00> : vector<8x128xf32>
    %196 = tpu.matmul %195, %72, %cst_98 {dimension_numbers = #tpu.dot_dimension_numbers<[1], [0], [0], [1], [0, 0, 1, 1], [], []>} : vector<8x32xbf16>, vector<32x128xbf16>, vector<8x128xf32> -> vector<8x128xf32>
    %197 = arith.addf %193, %196 : vector<8x128xf32>
    %198 = tpu.concatenate %191, %197 in 0 : vector<8x128xf32>, vector<8x128xf32> -> vector<16x128xf32>
    %199 = vector.extract_strided_slice %198 {offsets = [0, 0], sizes = [16, 96], strides = [1, 1]} : vector<16x128xf32> to vector<16x96xf32>
    %200 = arith.negf %199 : vector<16x96xf32>
    %201 = math.exp %200 : vector<16x96xf32>
    %cst_99 = arith.constant 1.000000e+00 : f32
    %202 = vector.broadcast %cst_99 : f32 to vector<16x96xf32>
    %203 = arith.addf %202, %201 : vector<16x96xf32>
    %204 = arith.divf %202, %203 : vector<16x96xf32>
    %205 = vector.extract_strided_slice %198 {offsets = [0, 96], sizes = [16, 32], strides = [1, 1]} : vector<16x128xf32> to vector<16x32xf32>
    %206 = math.tanh %205 : vector<16x32xf32>
    %207 = vector.extract_strided_slice %204 {offsets = [0, 32], sizes = [16, 32], strides = [1, 1]} : vector<16x96xf32> to vector<16x32xf32>
    %208 = arith.mulf %207, %174 : vector<16x32xf32>
    %209 = vector.extract_strided_slice %204 {offsets = [0, 0], sizes = [16, 32], strides = [1, 1]} : vector<16x96xf32> to vector<16x32xf32>
    %210 = arith.mulf %209, %206 : vector<16x32xf32>
    %211 = arith.addf %208, %210 : vector<16x32xf32>
    %212 = vector.extract_strided_slice %204 {offsets = [0, 64], sizes = [16, 32], strides = [1, 1]} : vector<16x96xf32> to vector<16x32xf32>
    %213 = math.tanh %211 : vector<16x32xf32>
    %214 = arith.mulf %212, %213 : vector<16x32xf32>
    %215 = vector.extract_strided_slice %214 {offsets = [0, 0], sizes = [8, 32], strides = [1, 1]} : vector<16x32xf32> to vector<8x32xf32>
    %c0_100 = arith.constant 0 : index
    %c3_101 = arith.constant 3 : index
    %c0_102 = arith.constant 0 : index
    %c0_103 = arith.constant 0 : index
    %216 = vector.load %arg35[%c0_100, %c3_101, %c0_102, %c0_103] : memref<2x8x8x32xf32, #tpu.memory_space<vmem>>, vector<1x1x8x32xf32>
    %217 = vector.shape_cast %216 : vector<1x1x8x32xf32> to vector<8x32xf32>
    %218 = vector.shape_cast %215 : vector<8x32xf32> to vector<1x1x8x32xf32>
    tpu.vector_store %arg35[%c0_100, %c3_101, %c0_102, %c0_103], %218 {strides = array<i32>} : memref<2x8x8x32xf32, #tpu.memory_space<vmem>>, vector<1x1x8x32xf32>,
    %219 = vector.extract_strided_slice %214 {offsets = [8, 0], sizes = [8, 32], strides = [1, 1]} : vector<16x32xf32> to vector<8x32xf32>
    %c1_104 = arith.constant 1 : index
    %c4_105 = arith.constant 4 : index
    %c0_106 = arith.constant 0 : index
    %c0_107 = arith.constant 0 : index
    %220 = vector.load %arg35[%c1_104, %c4_105, %c0_106, %c0_107] : memref<2x8x8x32xf32, #tpu.memory_space<vmem>>, vector<1x1x8x32xf32>
    %221 = vector.shape_cast %220 : vector<1x1x8x32xf32> to vector<8x32xf32>
    %222 = vector.shape_cast %219 : vector<8x32xf32> to vector<1x1x8x32xf32>
    tpu.vector_store %arg35[%c1_104, %c4_105, %c0_106, %c0_107], %222 {strides = array<i32>} : memref<2x8x8x32xf32, #tpu.memory_space<vmem>>, vector<1x1x8x32xf32>,
    %c4_108 = arith.constant 4 : index
    %c0_109 = arith.constant 0 : index
    %c0_110 = arith.constant 0 : index
    %223 = vector.load %arg34[%c4_108, %c0_109, %c0_110] : memref<8x8x256xf32, #tpu.memory_space<vmem>>, vector<1x8x128xf32>
    %224 = vector.shape_cast %223 : vector<1x8x128xf32> to vector<8x128xf32>
    %225 = vector.extract_strided_slice %214 {offsets = [0, 0], sizes = [8, 32], strides = [1, 1]} : vector<16x32xf32> to vector<8x32xf32>
    %226 = arith.truncf %225 : vector<8x32xf32> to vector<8x32xbf16>
    %cst_111 = arith.constant dense<0.000000e+00> : vector<8x128xf32>
    %227 = tpu.matmul %226, %71, %cst_111 {dimension_numbers = #tpu.dot_dimension_numbers<[1], [0], [0], [1], [0, 0, 1, 1], [], []>} : vector<8x32xbf16>, vector<32x128xbf16>, vector<8x128xf32> -> vector<8x128xf32>
    %228 = arith.addf %224, %227 : vector<8x128xf32>
    %c3_112 = arith.constant 3 : index
    %c0_113 = arith.constant 0 : index
    %c128_114 = arith.constant 128 : index
    %229 = vector.load %arg34[%c3_112, %c0_113, %c128_114] : memref<8x8x256xf32, #tpu.memory_space<vmem>>, vector<1x8x128xf32>
    %230 = vector.shape_cast %229 : vector<1x8x128xf32> to vector<8x128xf32>
    %231 = vector.extract_strided_slice %214 {offsets = [8, 0], sizes = [8, 32], strides = [1, 1]} : vector<16x32xf32> to vector<8x32xf32>
    %232 = arith.truncf %231 : vector<8x32xf32> to vector<8x32xbf16>
    %cst_115 = arith.constant dense<0.000000e+00> : vector<8x128xf32>
    %233 = tpu.matmul %232, %72, %cst_115 {dimension_numbers = #tpu.dot_dimension_numbers<[1], [0], [0], [1], [0, 0, 1, 1], [], []>} : vector<8x32xbf16>, vector<32x128xbf16>, vector<8x128xf32> -> vector<8x128xf32>
    %234 = arith.addf %230, %233 : vector<8x128xf32>
    %235 = tpu.concatenate %228, %234 in 0 : vector<8x128xf32>, vector<8x128xf32> -> vector<16x128xf32>
    %236 = vector.extract_strided_slice %235 {offsets = [0, 0], sizes = [16, 96], strides = [1, 1]} : vector<16x128xf32> to vector<16x96xf32>
    %237 = arith.negf %236 : vector<16x96xf32>
    %238 = math.exp %237 : vector<16x96xf32>
    %cst_116 = arith.constant 1.000000e+00 : f32
    %239 = vector.broadcast %cst_116 : f32 to vector<16x96xf32>
    %240 = arith.addf %239, %238 : vector<16x96xf32>
    %241 = arith.divf %239, %240 : vector<16x96xf32>
    %242 = vector.extract_strided_slice %235 {offsets = [0, 96], sizes = [16, 32], strides = [1, 1]} : vector<16x128xf32> to vector<16x32xf32>
    %243 = math.tanh %242 : vector<16x32xf32>
    %244 = vector.extract_strided_slice %241 {offsets = [0, 32], sizes = [16, 32], strides = [1, 1]} : vector<16x96xf32> to vector<16x32xf32>
    %245 = arith.mulf %244, %211 : vector<16x32xf32>
    %246 = vector.extract_strided_slice %241 {offsets = [0, 0], sizes = [16, 32], strides = [1, 1]} : vector<16x96xf32> to vector<16x32xf32>
    %247 = arith.mulf %246, %243 : vector<16x32xf32>
    %248 = arith.addf %245, %247 : vector<16x32xf32>
    %249 = vector.extract_strided_slice %241 {offsets = [0, 64], sizes = [16, 32], strides = [1, 1]} : vector<16x96xf32> to vector<16x32xf32>
    %250 = math.tanh %248 : vector<16x32xf32>
    %251 = arith.mulf %249, %250 : vector<16x32xf32>
    %252 = vector.extract_strided_slice %251 {offsets = [0, 0], sizes = [8, 32], strides = [1, 1]} : vector<16x32xf32> to vector<8x32xf32>
    %c0_117 = arith.constant 0 : index
    %c4_118 = arith.constant 4 : index
    %c0_119 = arith.constant 0 : index
    %c0_120 = arith.constant 0 : index
    %253 = vector.load %arg35[%c0_117, %c4_118, %c0_119, %c0_120] : memref<2x8x8x32xf32, #tpu.memory_space<vmem>>, vector<1x1x8x32xf32>
    %254 = vector.shape_cast %253 : vector<1x1x8x32xf32> to vector<8x32xf32>
    %255 = vector.shape_cast %252 : vector<8x32xf32> to vector<1x1x8x32xf32>
    tpu.vector_store %arg35[%c0_117, %c4_118, %c0_119, %c0_120], %255 {strides = array<i32>} : memref<2x8x8x32xf32, #tpu.memory_space<vmem>>, vector<1x1x8x32xf32>,
    %256 = vector.extract_strided_slice %251 {offsets = [8, 0], sizes = [8, 32], strides = [1, 1]} : vector<16x32xf32> to vector<8x32xf32>
    %c1_121 = arith.constant 1 : index
    %c3_122 = arith.constant 3 : index
    %c0_123 = arith.constant 0 : index
    %c0_124 = arith.constant 0 : index
    %257 = vector.load %arg35[%c1_121, %c3_122, %c0_123, %c0_124] : memref<2x8x8x32xf32, #tpu.memory_space<vmem>>, vector<1x1x8x32xf32>
    %258 = vector.shape_cast %257 : vector<1x1x8x32xf32> to vector<8x32xf32>
    %259 = vector.shape_cast %256 : vector<8x32xf32> to vector<1x1x8x32xf32>
    tpu.vector_store %arg35[%c1_121, %c3_122, %c0_123, %c0_124], %259 {strides = array<i32>} : memref<2x8x8x32xf32, #tpu.memory_space<vmem>>, vector<1x1x8x32xf32>,
    %c5_125 = arith.constant 5 : index
    %c0_126 = arith.constant 0 : index
    %c0_127 = arith.constant 0 : index
    %260 = vector.load %arg34[%c5_125, %c0_126, %c0_127] : memref<8x8x256xf32, #tpu.memory_space<vmem>>, vector<1x8x128xf32>
    %261 = vector.shape_cast %260 : vector<1x8x128xf32> to vector<8x128xf32>
    %262 = vector.extract_strided_slice %251 {offsets = [0, 0], sizes = [8, 32], strides = [1, 1]} : vector<16x32xf32> to vector<8x32xf32>
    %263 = arith.truncf %262 : vector<8x32xf32> to vector<8x32xbf16>
    %cst_128 = arith.constant dense<0.000000e+00> : vector<8x128xf32>
    %264 = tpu.matmul %263, %71, %cst_128 {dimension_numbers = #tpu.dot_dimension_numbers<[1], [0], [0], [1], [0, 0, 1, 1], [], []>} : vector<8x32xbf16>, vector<32x128xbf16>, vector<8x128xf32> -> vector<8x128xf32>
    %265 = arith.addf %261, %264 : vector<8x128xf32>
    %c2_129 = arith.constant 2 : index
    %c0_130 = arith.constant 0 : index
    %c128_131 = arith.constant 128 : index
    %266 = vector.load %arg34[%c2_129, %c0_130, %c128_131] : memref<8x8x256xf32, #tpu.memory_space<vmem>>, vector<1x8x128xf32>
    %267 = vector.shape_cast %266 : vector<1x8x128xf32> to vector<8x128xf32>
    %268 = vector.extract_strided_slice %251 {offsets = [8, 0], sizes = [8, 32], strides = [1, 1]} : vector<16x32xf32> to vector<8x32xf32>
    %269 = arith.truncf %268 : vector<8x32xf32> to vector<8x32xbf16>
    %cst_132 = arith.constant dense<0.000000e+00> : vector<8x128xf32>
    %270 = tpu.matmul %269, %72, %cst_132 {dimension_numbers = #tpu.dot_dimension_numbers<[1], [0], [0], [1], [0, 0, 1, 1], [], []>} : vector<8x32xbf16>, vector<32x128xbf16>, vector<8x128xf32> -> vector<8x128xf32>
    %271 = arith.addf %267, %270 : vector<8x128xf32>
    %272 = tpu.concatenate %265, %271 in 0 : vector<8x128xf32>, vector<8x128xf32> -> vector<16x128xf32>
    %273 = vector.extract_strided_slice %272 {offsets = [0, 0], sizes = [16, 96], strides = [1, 1]} : vector<16x128xf32> to vector<16x96xf32>
    %274 = arith.negf %273 : vector<16x96xf32>
    %275 = math.exp %274 : vector<16x96xf32>
    %cst_133 = arith.constant 1.000000e+00 : f32
    %276 = vector.broadcast %cst_133 : f32 to vector<16x96xf32>
    %277 = arith.addf %276, %275 : vector<16x96xf32>
    %278 = arith.divf %276, %277 : vector<16x96xf32>
    %279 = vector.extract_strided_slice %272 {offsets = [0, 96], sizes = [16, 32], strides = [1, 1]} : vector<16x128xf32> to vector<16x32xf32>
    %280 = math.tanh %279 : vector<16x32xf32>
    %281 = vector.extract_strided_slice %278 {offsets = [0, 32], sizes = [16, 32], strides = [1, 1]} : vector<16x96xf32> to vector<16x32xf32>
    %282 = arith.mulf %281, %248 : vector<16x32xf32>
    %283 = vector.extract_strided_slice %278 {offsets = [0, 0], sizes = [16, 32], strides = [1, 1]} : vector<16x96xf32> to vector<16x32xf32>
    %284 = arith.mulf %283, %280 : vector<16x32xf32>
    %285 = arith.addf %282, %284 : vector<16x32xf32>
    %286 = vector.extract_strided_slice %278 {offsets = [0, 64], sizes = [16, 32], strides = [1, 1]} : vector<16x96xf32> to vector<16x32xf32>
    %287 = math.tanh %285 : vector<16x32xf32>
    %288 = arith.mulf %286, %287 : vector<16x32xf32>
    %289 = vector.extract_strided_slice %288 {offsets = [0, 0], sizes = [8, 32], strides = [1, 1]} : vector<16x32xf32> to vector<8x32xf32>
    %c0_134 = arith.constant 0 : index
    %c5_135 = arith.constant 5 : index
    %c0_136 = arith.constant 0 : index
    %c0_137 = arith.constant 0 : index
    %290 = vector.load %arg35[%c0_134, %c5_135, %c0_136, %c0_137] : memref<2x8x8x32xf32, #tpu.memory_space<vmem>>, vector<1x1x8x32xf32>
    %291 = vector.shape_cast %290 : vector<1x1x8x32xf32> to vector<8x32xf32>
    %292 = vector.shape_cast %289 : vector<8x32xf32> to vector<1x1x8x32xf32>
    tpu.vector_store %arg35[%c0_134, %c5_135, %c0_136, %c0_137], %292 {strides = array<i32>} : memref<2x8x8x32xf32, #tpu.memory_space<vmem>>, vector<1x1x8x32xf32>,
    %293 = vector.extract_strided_slice %288 {offsets = [8, 0], sizes = [8, 32], strides = [1, 1]} : vector<16x32xf32> to vector<8x32xf32>
    %c1_138 = arith.constant 1 : index
    %c2_139 = arith.constant 2 : index
    %c0_140 = arith.constant 0 : index
    %c0_141 = arith.constant 0 : index
    %294 = vector.load %arg35[%c1_138, %c2_139, %c0_140, %c0_141] : memref<2x8x8x32xf32, #tpu.memory_space<vmem>>, vector<1x1x8x32xf32>
    %295 = vector.shape_cast %294 : vector<1x1x8x32xf32> to vector<8x32xf32>
    %296 = vector.shape_cast %293 : vector<8x32xf32> to vector<1x1x8x32xf32>
    tpu.vector_store %arg35[%c1_138, %c2_139, %c0_140, %c0_141], %296 {strides = array<i32>} : memref<2x8x8x32xf32, #tpu.memory_space<vmem>>, vector<1x1x8x32xf32>,
    %c6_142 = arith.constant 6 : index
    %c0_143 = arith.constant 0 : index
    %c0_144 = arith.constant 0 : index
    %297 = vector.load %arg34[%c6_142, %c0_143, %c0_144] : memref<8x8x256xf32, #tpu.memory_space<vmem>>, vector<1x8x128xf32>
    %298 = vector.shape_cast %297 : vector<1x8x128xf32> to vector<8x128xf32>
    %299 = vector.extract_strided_slice %288 {offsets = [0, 0], sizes = [8, 32], strides = [1, 1]} : vector<16x32xf32> to vector<8x32xf32>
    %300 = arith.truncf %299 : vector<8x32xf32> to vector<8x32xbf16>
    %cst_145 = arith.constant dense<0.000000e+00> : vector<8x128xf32>
    %301 = tpu.matmul %300, %71, %cst_145 {dimension_numbers = #tpu.dot_dimension_numbers<[1], [0], [0], [1], [0, 0, 1, 1], [], []>} : vector<8x32xbf16>, vector<32x128xbf16>, vector<8x128xf32> -> vector<8x128xf32>
    %302 = arith.addf %298, %301 : vector<8x128xf32>
    %c1_146 = arith.constant 1 : index
    %c0_147 = arith.constant 0 : index
    %c128_148 = arith.constant 128 : index
    %303 = vector.load %arg34[%c1_146, %c0_147, %c128_148] : memref<8x8x256xf32, #tpu.memory_space<vmem>>, vector<1x8x128xf32>
    %304 = vector.shape_cast %303 : vector<1x8x128xf32> to vector<8x128xf32>
    %305 = vector.extract_strided_slice %288 {offsets = [8, 0], sizes = [8, 32], strides = [1, 1]} : vector<16x32xf32> to vector<8x32xf32>
    %306 = arith.truncf %305 : vector<8x32xf32> to vector<8x32xbf16>
    %cst_149 = arith.constant dense<0.000000e+00> : vector<8x128xf32>
    %307 = tpu.matmul %306, %72, %cst_149 {dimension_numbers = #tpu.dot_dimension_numbers<[1], [0], [0], [1], [0, 0, 1, 1], [], []>} : vector<8x32xbf16>, vector<32x128xbf16>, vector<8x128xf32> -> vector<8x128xf32>
    %308 = arith.addf %304, %307 : vector<8x128xf32>
    %309 = tpu.concatenate %302, %308 in 0 : vector<8x128xf32>, vector<8x128xf32> -> vector<16x128xf32>
    %310 = vector.extract_strided_slice %309 {offsets = [0, 0], sizes = [16, 96], strides = [1, 1]} : vector<16x128xf32> to vector<16x96xf32>
    %311 = arith.negf %310 : vector<16x96xf32>
    %312 = math.exp %311 : vector<16x96xf32>
    %cst_150 = arith.constant 1.000000e+00 : f32
    %313 = vector.broadcast %cst_150 : f32 to vector<16x96xf32>
    %314 = arith.addf %313, %312 : vector<16x96xf32>
    %315 = arith.divf %313, %314 : vector<16x96xf32>
    %316 = vector.extract_strided_slice %309 {offsets = [0, 96], sizes = [16, 32], strides = [1, 1]} : vector<16x128xf32> to vector<16x32xf32>
    %317 = math.tanh %316 : vector<16x32xf32>
    %318 = vector.extract_strided_slice %315 {offsets = [0, 32], sizes = [16, 32], strides = [1, 1]} : vector<16x96xf32> to vector<16x32xf32>
    %319 = arith.mulf %318, %285 : vector<16x32xf32>
    %320 = vector.extract_strided_slice %315 {offsets = [0, 0], sizes = [16, 32], strides = [1, 1]} : vector<16x96xf32> to vector<16x32xf32>
    %321 = arith.mulf %320, %317 : vector<16x32xf32>
    %322 = arith.addf %319, %321 : vector<16x32xf32>
    %323 = vector.extract_strided_slice %315 {offsets = [0, 64], sizes = [16, 32], strides = [1, 1]} : vector<16x96xf32> to vector<16x32xf32>
    %324 = math.tanh %322 : vector<16x32xf32>
    %325 = arith.mulf %323, %324 : vector<16x32xf32>
    %326 = vector.extract_strided_slice %325 {offsets = [0, 0], sizes = [8, 32], strides = [1, 1]} : vector<16x32xf32> to vector<8x32xf32>
    %c0_151 = arith.constant 0 : index
    %c6_152 = arith.constant 6 : index
    %c0_153 = arith.constant 0 : index
    %c0_154 = arith.constant 0 : index
    %327 = vector.load %arg35[%c0_151, %c6_152, %c0_153, %c0_154] : memref<2x8x8x32xf32, #tpu.memory_space<vmem>>, vector<1x1x8x32xf32>
    %328 = vector.shape_cast %327 : vector<1x1x8x32xf32> to vector<8x32xf32>
    %329 = vector.shape_cast %326 : vector<8x32xf32> to vector<1x1x8x32xf32>
    tpu.vector_store %arg35[%c0_151, %c6_152, %c0_153, %c0_154], %329 {strides = array<i32>} : memref<2x8x8x32xf32, #tpu.memory_space<vmem>>, vector<1x1x8x32xf32>,
    %330 = vector.extract_strided_slice %325 {offsets = [8, 0], sizes = [8, 32], strides = [1, 1]} : vector<16x32xf32> to vector<8x32xf32>
    %c1_155 = arith.constant 1 : index
    %c1_156 = arith.constant 1 : index
    %c0_157 = arith.constant 0 : index
    %c0_158 = arith.constant 0 : index
    %331 = vector.load %arg35[%c1_155, %c1_156, %c0_157, %c0_158] : memref<2x8x8x32xf32, #tpu.memory_space<vmem>>, vector<1x1x8x32xf32>
    %332 = vector.shape_cast %331 : vector<1x1x8x32xf32> to vector<8x32xf32>
    %333 = vector.shape_cast %330 : vector<8x32xf32> to vector<1x1x8x32xf32>
    tpu.vector_store %arg35[%c1_155, %c1_156, %c0_157, %c0_158], %333 {strides = array<i32>} : memref<2x8x8x32xf32, #tpu.memory_space<vmem>>, vector<1x1x8x32xf32>,
    %c7_159 = arith.constant 7 : index
    %c0_160 = arith.constant 0 : index
    %c0_161 = arith.constant 0 : index
    %334 = vector.load %arg34[%c7_159, %c0_160, %c0_161] : memref<8x8x256xf32, #tpu.memory_space<vmem>>, vector<1x8x128xf32>
    %335 = vector.shape_cast %334 : vector<1x8x128xf32> to vector<8x128xf32>
    %336 = vector.extract_strided_slice %325 {offsets = [0, 0], sizes = [8, 32], strides = [1, 1]} : vector<16x32xf32> to vector<8x32xf32>
    %337 = arith.truncf %336 : vector<8x32xf32> to vector<8x32xbf16>
    %cst_162 = arith.constant dense<0.000000e+00> : vector<8x128xf32>
    %338 = tpu.matmul %337, %71, %cst_162 {dimension_numbers = #tpu.dot_dimension_numbers<[1], [0], [0], [1], [0, 0, 1, 1], [], []>} : vector<8x32xbf16>, vector<32x128xbf16>, vector<8x128xf32> -> vector<8x128xf32>
    %339 = arith.addf %335, %338 : vector<8x128xf32>
    %c0_163 = arith.constant 0 : index
    %c0_164 = arith.constant 0 : index
    %c128_165 = arith.constant 128 : index
    %340 = vector.load %arg34[%c0_163, %c0_164, %c128_165] : memref<8x8x256xf32, #tpu.memory_space<vmem>>, vector<1x8x128xf32>
    %341 = vector.shape_cast %340 : vector<1x8x128xf32> to vector<8x128xf32>
    %342 = vector.extract_strided_slice %325 {offsets = [8, 0], sizes = [8, 32], strides = [1, 1]} : vector<16x32xf32> to vector<8x32xf32>
    %343 = arith.truncf %342 : vector<8x32xf32> to vector<8x32xbf16>
    %cst_166 = arith.constant dense<0.000000e+00> : vector<8x128xf32>
    %344 = tpu.matmul %343, %72, %cst_166 {dimension_numbers = #tpu.dot_dimension_numbers<[1], [0], [0], [1], [0, 0, 1, 1], [], []>} : vector<8x32xbf16>, vector<32x128xbf16>, vector<8x128xf32> -> vector<8x128xf32>
    %345 = arith.addf %341, %344 : vector<8x128xf32>
    %346 = tpu.concatenate %339, %345 in 0 : vector<8x128xf32>, vector<8x128xf32> -> vector<16x128xf32>
    %347 = vector.extract_strided_slice %346 {offsets = [0, 0], sizes = [16, 96], strides = [1, 1]} : vector<16x128xf32> to vector<16x96xf32>
    %348 = arith.negf %347 : vector<16x96xf32>
    %349 = math.exp %348 : vector<16x96xf32>
    %cst_167 = arith.constant 1.000000e+00 : f32
    %350 = vector.broadcast %cst_167 : f32 to vector<16x96xf32>
    %351 = arith.addf %350, %349 : vector<16x96xf32>
    %352 = arith.divf %350, %351 : vector<16x96xf32>
    %353 = vector.extract_strided_slice %346 {offsets = [0, 96], sizes = [16, 32], strides = [1, 1]} : vector<16x128xf32> to vector<16x32xf32>
    %354 = math.tanh %353 : vector<16x32xf32>
    %355 = vector.extract_strided_slice %352 {offsets = [0, 32], sizes = [16, 32], strides = [1, 1]} : vector<16x96xf32> to vector<16x32xf32>
    %356 = arith.mulf %355, %322 : vector<16x32xf32>
    %357 = vector.extract_strided_slice %352 {offsets = [0, 0], sizes = [16, 32], strides = [1, 1]} : vector<16x96xf32> to vector<16x32xf32>
    %358 = arith.mulf %357, %354 : vector<16x32xf32>
    %359 = arith.addf %356, %358 : vector<16x32xf32>
    %360 = vector.extract_strided_slice %352 {offsets = [0, 64], sizes = [16, 32], strides = [1, 1]} : vector<16x96xf32> to vector<16x32xf32>
    %361 = math.tanh %359 : vector<16x32xf32>
    %362 = arith.mulf %360, %361 : vector<16x32xf32>
    %363 = vector.extract_strided_slice %362 {offsets = [0, 0], sizes = [8, 32], strides = [1, 1]} : vector<16x32xf32> to vector<8x32xf32>
    %c0_168 = arith.constant 0 : index
    %c7_169 = arith.constant 7 : index
    %c0_170 = arith.constant 0 : index
    %c0_171 = arith.constant 0 : index
    %364 = vector.load %arg35[%c0_168, %c7_169, %c0_170, %c0_171] : memref<2x8x8x32xf32, #tpu.memory_space<vmem>>, vector<1x1x8x32xf32>
    %365 = vector.shape_cast %364 : vector<1x1x8x32xf32> to vector<8x32xf32>
    %366 = vector.shape_cast %363 : vector<8x32xf32> to vector<1x1x8x32xf32>
    tpu.vector_store %arg35[%c0_168, %c7_169, %c0_170, %c0_171], %366 {strides = array<i32>} : memref<2x8x8x32xf32, #tpu.memory_space<vmem>>, vector<1x1x8x32xf32>,
    %367 = vector.extract_strided_slice %362 {offsets = [8, 0], sizes = [8, 32], strides = [1, 1]} : vector<16x32xf32> to vector<8x32xf32>
    %c1_172 = arith.constant 1 : index
    %c0_173 = arith.constant 0 : index
    %c0_174 = arith.constant 0 : index
    %c0_175 = arith.constant 0 : index
    %368 = vector.load %arg35[%c1_172, %c0_173, %c0_174, %c0_175] : memref<2x8x8x32xf32, #tpu.memory_space<vmem>>, vector<1x1x8x32xf32>
    %369 = vector.shape_cast %368 : vector<1x1x8x32xf32> to vector<8x32xf32>
    %370 = vector.shape_cast %367 : vector<8x32xf32> to vector<1x1x8x32xf32>
    tpu.vector_store %arg35[%c1_172, %c0_173, %c0_174, %c0_175], %370 {strides = array<i32>} : memref<2x8x8x32xf32, #tpu.memory_space<vmem>>, vector<1x1x8x32xf32>,
    %371 = vector.extract_strided_slice %359 {offsets = [0, 0], sizes = [8, 32], strides = [1, 1]} : vector<16x32xf32> to vector<8x32xf32>
    %372 = vector.extract_strided_slice %359 {offsets = [8, 0], sizes = [8, 32], strides = [1, 1]} : vector<16x32xf32> to vector<8x32xf32>
    %c0_176 = arith.constant 0 : index
    %c0_177 = arith.constant 0 : index
    %c0_178 = arith.constant 0 : index
    %c0_179 = arith.constant 0 : index
    %373 = vector.load %arg35[%c0_176, %c0_177, %c0_178, %c0_179] : memref<2x8x8x32xf32, #tpu.memory_space<vmem>>, vector<1x8x8x32xf32>
    %374 = vector.shape_cast %373 : vector<1x8x8x32xf32> to vector<8x8x32xf32>
    %375 = vector.shape_cast %374 : vector<8x8x32xf32> to vector<64x32xf32>
    %c0_180 = arith.constant 0 : index
    %c0_181 = arith.constant 0 : index
    %376 = vector.load %arg14[%c0_180, %c0_181] : memref<32x256xbf16, #tpu.memory_space<vmem>>, vector<32x256xbf16>
    %377 = arith.truncf %375 : vector<64x32xf32> to vector<64x32xbf16>
    %cst_182 = arith.constant dense<0.000000e+00> : vector<64x256xf32>
    %378 = tpu.matmul %377, %376, %cst_182 {dimension_numbers = #tpu.dot_dimension_numbers<[1], [0], [0], [1], [0, 0, 1, 1], [], []>} : vector<64x32xbf16>, vector<32x256xbf16>, vector<64x256xf32> -> vector<64x256xf32>
    %c1_183 = arith.constant 1 : index
    %c0_184 = arith.constant 0 : index
    %c0_185 = arith.constant 0 : index
    %c0_186 = arith.constant 0 : index
    %379 = vector.load %arg35[%c1_183, %c0_184, %c0_185, %c0_186] : memref<2x8x8x32xf32, #tpu.memory_space<vmem>>, vector<1x8x8x32xf32>
    %380 = vector.shape_cast %379 : vector<1x8x8x32xf32> to vector<8x8x32xf32>
    %381 = vector.shape_cast %380 : vector<8x8x32xf32> to vector<64x32xf32>
    %c0_187 = arith.constant 0 : index
    %c0_188 = arith.constant 0 : index
    %382 = vector.load %arg15[%c0_187, %c0_188] : memref<32x256xbf16, #tpu.memory_space<vmem>>, vector<32x256xbf16>
    %383 = arith.truncf %381 : vector<64x32xf32> to vector<64x32xbf16>
    %cst_189 = arith.constant dense<0.000000e+00> : vector<64x256xf32>
    %384 = tpu.matmul %383, %382, %cst_189 {dimension_numbers = #tpu.dot_dimension_numbers<[1], [0], [0], [1], [0, 0, 1, 1], [], []>} : vector<64x32xbf16>, vector<32x256xbf16>, vector<64x256xf32> -> vector<64x256xf32>
    %385 = arith.addf %378, %384 : vector<64x256xf32>
    %c0_190 = arith.constant 0 : index
    %c0_191 = arith.constant 0 : index
    %386 = vector.load %arg16[%c0_190, %c0_191] : memref<1x256xf32, #tpu.memory_space<vmem>>, vector<1x256xf32>
    %387 = vector.broadcast %386 : vector<1x256xf32> to vector<64x256xf32>
    %388 = arith.addf %385, %387 : vector<64x256xf32>
    %389 = vector.shape_cast %388 : vector<64x256xf32> to vector<8x8x256xf32>
    %c0_192 = arith.constant 0 : index
    %c0_193 = arith.constant 0 : index
    %c0_194 = arith.constant 0 : index
    %390 = vector.load %arg34[%c0_192, %c0_193, %c0_194] : memref<8x8x256xf32, #tpu.memory_space<vmem>>, vector<8x8x256xf32>
    tpu.vector_store %arg34[%c0_192, %c0_193, %c0_194], %389 {strides = array<i32>} : memref<8x8x256xf32, #tpu.memory_space<vmem>>, vector<8x8x256xf32>,
    %c0_195 = arith.constant 0 : index
    %c0_196 = arith.constant 0 : index
    %391 = vector.load %arg17[%c0_195, %c0_196] : memref<32x128xbf16, #tpu.memory_space<vmem>>, vector<32x128xbf16>
    %c0_197 = arith.constant 0 : index
    %c0_198 = arith.constant 0 : index
    %392 = vector.load %arg18[%c0_197, %c0_198] : memref<32x128xbf16, #tpu.memory_space<vmem>>, vector<32x128xbf16>
    %cst_199 = arith.constant 0.000000e+00 : f32
    %393 = vector.broadcast %cst_199 : f32 to vector<16x32xf32>
    %cst_200 = arith.constant 0.000000e+00 : f32
    %394 = vector.broadcast %cst_200 : f32 to vector<16x32xf32>
    %c0_201 = arith.constant 0 : index
    %c0_202 = arith.constant 0 : index
    %c0_203 = arith.constant 0 : index
    %395 = vector.load %arg34[%c0_201, %c0_202, %c0_203] : memref<8x8x256xf32, #tpu.memory_space<vmem>>, vector<1x8x128xf32>
    %396 = vector.shape_cast %395 : vector<1x8x128xf32> to vector<8x128xf32>
    %397 = vector.extract_strided_slice %393 {offsets = [0, 0], sizes = [8, 32], strides = [1, 1]} : vector<16x32xf32> to vector<8x32xf32>
    %398 = arith.truncf %397 : vector<8x32xf32> to vector<8x32xbf16>
    %cst_204 = arith.constant dense<0.000000e+00> : vector<8x128xf32>
    %399 = tpu.matmul %398, %391, %cst_204 {dimension_numbers = #tpu.dot_dimension_numbers<[1], [0], [0], [1], [0, 0, 1, 1], [], []>} : vector<8x32xbf16>, vector<32x128xbf16>, vector<8x128xf32> -> vector<8x128xf32>
    %400 = arith.addf %396, %399 : vector<8x128xf32>
    %c7_205 = arith.constant 7 : index
    %c0_206 = arith.constant 0 : index
    %c128_207 = arith.constant 128 : index
    %401 = vector.load %arg34[%c7_205, %c0_206, %c128_207] : memref<8x8x256xf32, #tpu.memory_space<vmem>>, vector<1x8x128xf32>
    %402 = vector.shape_cast %401 : vector<1x8x128xf32> to vector<8x128xf32>
    %403 = vector.extract_strided_slice %393 {offsets = [8, 0], sizes = [8, 32], strides = [1, 1]} : vector<16x32xf32> to vector<8x32xf32>
    %404 = arith.truncf %403 : vector<8x32xf32> to vector<8x32xbf16>
    %cst_208 = arith.constant dense<0.000000e+00> : vector<8x128xf32>
    %405 = tpu.matmul %404, %392, %cst_208 {dimension_numbers = #tpu.dot_dimension_numbers<[1], [0], [0], [1], [0, 0, 1, 1], [], []>} : vector<8x32xbf16>, vector<32x128xbf16>, vector<8x128xf32> -> vector<8x128xf32>
    %406 = arith.addf %402, %405 : vector<8x128xf32>
    %407 = tpu.concatenate %400, %406 in 0 : vector<8x128xf32>, vector<8x128xf32> -> vector<16x128xf32>
    %408 = vector.extract_strided_slice %407 {offsets = [0, 0], sizes = [16, 96], strides = [1, 1]} : vector<16x128xf32> to vector<16x96xf32>
    %409 = arith.negf %408 : vector<16x96xf32>
    %410 = math.exp %409 : vector<16x96xf32>
    %cst_209 = arith.constant 1.000000e+00 : f32
    %411 = vector.broadcast %cst_209 : f32 to vector<16x96xf32>
    %412 = arith.addf %411, %410 : vector<16x96xf32>
    %413 = arith.divf %411, %412 : vector<16x96xf32>
    %414 = vector.extract_strided_slice %407 {offsets = [0, 96], sizes = [16, 32], strides = [1, 1]} : vector<16x128xf32> to vector<16x32xf32>
    %415 = math.tanh %414 : vector<16x32xf32>
    %416 = vector.extract_strided_slice %413 {offsets = [0, 32], sizes = [16, 32], strides = [1, 1]} : vector<16x96xf32> to vector<16x32xf32>
    %417 = arith.mulf %416, %394 : vector<16x32xf32>
    %418 = vector.extract_strided_slice %413 {offsets = [0, 0], sizes = [16, 32], strides = [1, 1]} : vector<16x96xf32> to vector<16x32xf32>
    %419 = arith.mulf %418, %415 : vector<16x32xf32>
    %420 = arith.addf %417, %419 : vector<16x32xf32>
    %421 = vector.extract_strided_slice %413 {offsets = [0, 64], sizes = [16, 32], strides = [1, 1]} : vector<16x96xf32> to vector<16x32xf32>
    %422 = math.tanh %420 : vector<16x32xf32>
    %423 = arith.mulf %421, %422 : vector<16x32xf32>
    %c1_210 = arith.constant 1 : index
    %c0_211 = arith.constant 0 : index
    %c0_212 = arith.constant 0 : index
    %424 = vector.load %arg34[%c1_210, %c0_211, %c0_212] : memref<8x8x256xf32, #tpu.memory_space<vmem>>, vector<1x8x128xf32>
    %425 = vector.shape_cast %424 : vector<1x8x128xf32> to vector<8x128xf32>
    %426 = vector.extract_strided_slice %423 {offsets = [0, 0], sizes = [8, 32], strides = [1, 1]} : vector<16x32xf32> to vector<8x32xf32>
    %427 = arith.truncf %426 : vector<8x32xf32> to vector<8x32xbf16>
    %cst_213 = arith.constant dense<0.000000e+00> : vector<8x128xf32>
    %428 = tpu.matmul %427, %391, %cst_213 {dimension_numbers = #tpu.dot_dimension_numbers<[1], [0], [0], [1], [0, 0, 1, 1], [], []>} : vector<8x32xbf16>, vector<32x128xbf16>, vector<8x128xf32> -> vector<8x128xf32>
    %429 = arith.addf %425, %428 : vector<8x128xf32>
    %c6_214 = arith.constant 6 : index
    %c0_215 = arith.constant 0 : index
    %c128_216 = arith.constant 128 : index
    %430 = vector.load %arg34[%c6_214, %c0_215, %c128_216] : memref<8x8x256xf32, #tpu.memory_space<vmem>>, vector<1x8x128xf32>
    %431 = vector.shape_cast %430 : vector<1x8x128xf32> to vector<8x128xf32>
    %432 = vector.extract_strided_slice %423 {offsets = [8, 0], sizes = [8, 32], strides = [1, 1]} : vector<16x32xf32> to vector<8x32xf32>
    %433 = arith.truncf %432 : vector<8x32xf32> to vector<8x32xbf16>
    %cst_217 = arith.constant dense<0.000000e+00> : vector<8x128xf32>
    %434 = tpu.matmul %433, %392, %cst_217 {dimension_numbers = #tpu.dot_dimension_numbers<[1], [0], [0], [1], [0, 0, 1, 1], [], []>} : vector<8x32xbf16>, vector<32x128xbf16>, vector<8x128xf32> -> vector<8x128xf32>
    %435 = arith.addf %431, %434 : vector<8x128xf32>
    %436 = tpu.concatenate %429, %435 in 0 : vector<8x128xf32>, vector<8x128xf32> -> vector<16x128xf32>
    %437 = vector.extract_strided_slice %436 {offsets = [0, 0], sizes = [16, 96], strides = [1, 1]} : vector<16x128xf32> to vector<16x96xf32>
    %438 = arith.negf %437 : vector<16x96xf32>
    %439 = math.exp %438 : vector<16x96xf32>
    %cst_218 = arith.constant 1.000000e+00 : f32
    %440 = vector.broadcast %cst_218 : f32 to vector<16x96xf32>
    %441 = arith.addf %440, %439 : vector<16x96xf32>
    %442 = arith.divf %440, %441 : vector<16x96xf32>
    %443 = vector.extract_strided_slice %436 {offsets = [0, 96], sizes = [16, 32], strides = [1, 1]} : vector<16x128xf32> to vector<16x32xf32>
    %444 = math.tanh %443 : vector<16x32xf32>
    %445 = vector.extract_strided_slice %442 {offsets = [0, 32], sizes = [16, 32], strides = [1, 1]} : vector<16x96xf32> to vector<16x32xf32>
    %446 = arith.mulf %445, %420 : vector<16x32xf32>
    %447 = vector.extract_strided_slice %442 {offsets = [0, 0], sizes = [16, 32], strides = [1, 1]} : vector<16x96xf32> to vector<16x32xf32>
    %448 = arith.mulf %447, %444 : vector<16x32xf32>
    %449 = arith.addf %446, %448 : vector<16x32xf32>
    %450 = vector.extract_strided_slice %442 {offsets = [0, 64], sizes = [16, 32], strides = [1, 1]} : vector<16x96xf32> to vector<16x32xf32>
    %451 = math.tanh %449 : vector<16x32xf32>
    %452 = arith.mulf %450, %451 : vector<16x32xf32>
    %c2_219 = arith.constant 2 : index
    %c0_220 = arith.constant 0 : index
    %c0_221 = arith.constant 0 : index
    %453 = vector.load %arg34[%c2_219, %c0_220, %c0_221] : memref<8x8x256xf32, #tpu.memory_space<vmem>>, vector<1x8x128xf32>
    %454 = vector.shape_cast %453 : vector<1x8x128xf32> to vector<8x128xf32>
    %455 = vector.extract_strided_slice %452 {offsets = [0, 0], sizes = [8, 32], strides = [1, 1]} : vector<16x32xf32> to vector<8x32xf32>
    %456 = arith.truncf %455 : vector<8x32xf32> to vector<8x32xbf16>
    %cst_222 = arith.constant dense<0.000000e+00> : vector<8x128xf32>
    %457 = tpu.matmul %456, %391, %cst_222 {dimension_numbers = #tpu.dot_dimension_numbers<[1], [0], [0], [1], [0, 0, 1, 1], [], []>} : vector<8x32xbf16>, vector<32x128xbf16>, vector<8x128xf32> -> vector<8x128xf32>
    %458 = arith.addf %454, %457 : vector<8x128xf32>
    %c5_223 = arith.constant 5 : index
    %c0_224 = arith.constant 0 : index
    %c128_225 = arith.constant 128 : index
    %459 = vector.load %arg34[%c5_223, %c0_224, %c128_225] : memref<8x8x256xf32, #tpu.memory_space<vmem>>, vector<1x8x128xf32>
    %460 = vector.shape_cast %459 : vector<1x8x128xf32> to vector<8x128xf32>
    %461 = vector.extract_strided_slice %452 {offsets = [8, 0], sizes = [8, 32], strides = [1, 1]} : vector<16x32xf32> to vector<8x32xf32>
    %462 = arith.truncf %461 : vector<8x32xf32> to vector<8x32xbf16>
    %cst_226 = arith.constant dense<0.000000e+00> : vector<8x128xf32>
    %463 = tpu.matmul %462, %392, %cst_226 {dimension_numbers = #tpu.dot_dimension_numbers<[1], [0], [0], [1], [0, 0, 1, 1], [], []>} : vector<8x32xbf16>, vector<32x128xbf16>, vector<8x128xf32> -> vector<8x128xf32>
    %464 = arith.addf %460, %463 : vector<8x128xf32>
    %465 = tpu.concatenate %458, %464 in 0 : vector<8x128xf32>, vector<8x128xf32> -> vector<16x128xf32>
    %466 = vector.extract_strided_slice %465 {offsets = [0, 0], sizes = [16, 96], strides = [1, 1]} : vector<16x128xf32> to vector<16x96xf32>
    %467 = arith.negf %466 : vector<16x96xf32>
    %468 = math.exp %467 : vector<16x96xf32>
    %cst_227 = arith.constant 1.000000e+00 : f32
    %469 = vector.broadcast %cst_227 : f32 to vector<16x96xf32>
    %470 = arith.addf %469, %468 : vector<16x96xf32>
    %471 = arith.divf %469, %470 : vector<16x96xf32>
    %472 = vector.extract_strided_slice %465 {offsets = [0, 96], sizes = [16, 32], strides = [1, 1]} : vector<16x128xf32> to vector<16x32xf32>
    %473 = math.tanh %472 : vector<16x32xf32>
    %474 = vector.extract_strided_slice %471 {offsets = [0, 32], sizes = [16, 32], strides = [1, 1]} : vector<16x96xf32> to vector<16x32xf32>
    %475 = arith.mulf %474, %449 : vector<16x32xf32>
    %476 = vector.extract_strided_slice %471 {offsets = [0, 0], sizes = [16, 32], strides = [1, 1]} : vector<16x96xf32> to vector<16x32xf32>
    %477 = arith.mulf %476, %473 : vector<16x32xf32>
    %478 = arith.addf %475, %477 : vector<16x32xf32>
    %479 = vector.extract_strided_slice %471 {offsets = [0, 64], sizes = [16, 32], strides = [1, 1]} : vector<16x96xf32> to vector<16x32xf32>
    %480 = math.tanh %478 : vector<16x32xf32>
    %481 = arith.mulf %479, %480 : vector<16x32xf32>
    %c3_228 = arith.constant 3 : index
    %c0_229 = arith.constant 0 : index
    %c0_230 = arith.constant 0 : index
    %482 = vector.load %arg34[%c3_228, %c0_229, %c0_230] : memref<8x8x256xf32, #tpu.memory_space<vmem>>, vector<1x8x128xf32>
    %483 = vector.shape_cast %482 : vector<1x8x128xf32> to vector<8x128xf32>
    %484 = vector.extract_strided_slice %481 {offsets = [0, 0], sizes = [8, 32], strides = [1, 1]} : vector<16x32xf32> to vector<8x32xf32>
    %485 = arith.truncf %484 : vector<8x32xf32> to vector<8x32xbf16>
    %cst_231 = arith.constant dense<0.000000e+00> : vector<8x128xf32>
    %486 = tpu.matmul %485, %391, %cst_231 {dimension_numbers = #tpu.dot_dimension_numbers<[1], [0], [0], [1], [0, 0, 1, 1], [], []>} : vector<8x32xbf16>, vector<32x128xbf16>, vector<8x128xf32> -> vector<8x128xf32>
    %487 = arith.addf %483, %486 : vector<8x128xf32>
    %c4_232 = arith.constant 4 : index
    %c0_233 = arith.constant 0 : index
    %c128_234 = arith.constant 128 : index
    %488 = vector.load %arg34[%c4_232, %c0_233, %c128_234] : memref<8x8x256xf32, #tpu.memory_space<vmem>>, vector<1x8x128xf32>
    %489 = vector.shape_cast %488 : vector<1x8x128xf32> to vector<8x128xf32>
    %490 = vector.extract_strided_slice %481 {offsets = [8, 0], sizes = [8, 32], strides = [1, 1]} : vector<16x32xf32> to vector<8x32xf32>
    %491 = arith.truncf %490 : vector<8x32xf32> to vector<8x32xbf16>
    %cst_235 = arith.constant dense<0.000000e+00> : vector<8x128xf32>
    %492 = tpu.matmul %491, %392, %cst_235 {dimension_numbers = #tpu.dot_dimension_numbers<[1], [0], [0], [1], [0, 0, 1, 1], [], []>} : vector<8x32xbf16>, vector<32x128xbf16>, vector<8x128xf32> -> vector<8x128xf32>
    %493 = arith.addf %489, %492 : vector<8x128xf32>
    %494 = tpu.concatenate %487, %493 in 0 : vector<8x128xf32>, vector<8x128xf32> -> vector<16x128xf32>
    %495 = vector.extract_strided_slice %494 {offsets = [0, 0], sizes = [16, 96], strides = [1, 1]} : vector<16x128xf32> to vector<16x96xf32>
    %496 = arith.negf %495 : vector<16x96xf32>
    %497 = math.exp %496 : vector<16x96xf32>
    %cst_236 = arith.constant 1.000000e+00 : f32
    %498 = vector.broadcast %cst_236 : f32 to vector<16x96xf32>
    %499 = arith.addf %498, %497 : vector<16x96xf32>
    %500 = arith.divf %498, %499 : vector<16x96xf32>
    %501 = vector.extract_strided_slice %494 {offsets = [0, 96], sizes = [16, 32], strides = [1, 1]} : vector<16x128xf32> to vector<16x32xf32>
    %502 = math.tanh %501 : vector<16x32xf32>
    %503 = vector.extract_strided_slice %500 {offsets = [0, 32], sizes = [16, 32], strides = [1, 1]} : vector<16x96xf32> to vector<16x32xf32>
    %504 = arith.mulf %503, %478 : vector<16x32xf32>
    %505 = vector.extract_strided_slice %500 {offsets = [0, 0], sizes = [16, 32], strides = [1, 1]} : vector<16x96xf32> to vector<16x32xf32>
    %506 = arith.mulf %505, %502 : vector<16x32xf32>
    %507 = arith.addf %504, %506 : vector<16x32xf32>
    %508 = vector.extract_strided_slice %500 {offsets = [0, 64], sizes = [16, 32], strides = [1, 1]} : vector<16x96xf32> to vector<16x32xf32>
    %509 = math.tanh %507 : vector<16x32xf32>
    %510 = arith.mulf %508, %509 : vector<16x32xf32>
    %c4_237 = arith.constant 4 : index
    %c0_238 = arith.constant 0 : index
    %c0_239 = arith.constant 0 : index
    %511 = vector.load %arg34[%c4_237, %c0_238, %c0_239] : memref<8x8x256xf32, #tpu.memory_space<vmem>>, vector<1x8x128xf32>
    %512 = vector.shape_cast %511 : vector<1x8x128xf32> to vector<8x128xf32>
    %513 = vector.extract_strided_slice %510 {offsets = [0, 0], sizes = [8, 32], strides = [1, 1]} : vector<16x32xf32> to vector<8x32xf32>
    %514 = arith.truncf %513 : vector<8x32xf32> to vector<8x32xbf16>
    %cst_240 = arith.constant dense<0.000000e+00> : vector<8x128xf32>
    %515 = tpu.matmul %514, %391, %cst_240 {dimension_numbers = #tpu.dot_dimension_numbers<[1], [0], [0], [1], [0, 0, 1, 1], [], []>} : vector<8x32xbf16>, vector<32x128xbf16>, vector<8x128xf32> -> vector<8x128xf32>
    %516 = arith.addf %512, %515 : vector<8x128xf32>
    %c3_241 = arith.constant 3 : index
    %c0_242 = arith.constant 0 : index
    %c128_243 = arith.constant 128 : index
    %517 = vector.load %arg34[%c3_241, %c0_242, %c128_243] : memref<8x8x256xf32, #tpu.memory_space<vmem>>, vector<1x8x128xf32>
    %518 = vector.shape_cast %517 : vector<1x8x128xf32> to vector<8x128xf32>
    %519 = vector.extract_strided_slice %510 {offsets = [8, 0], sizes = [8, 32], strides = [1, 1]} : vector<16x32xf32> to vector<8x32xf32>
    %520 = arith.truncf %519 : vector<8x32xf32> to vector<8x32xbf16>
    %cst_244 = arith.constant dense<0.000000e+00> : vector<8x128xf32>
    %521 = tpu.matmul %520, %392, %cst_244 {dimension_numbers = #tpu.dot_dimension_numbers<[1], [0], [0], [1], [0, 0, 1, 1], [], []>} : vector<8x32xbf16>, vector<32x128xbf16>, vector<8x128xf32> -> vector<8x128xf32>
    %522 = arith.addf %518, %521 : vector<8x128xf32>
    %523 = tpu.concatenate %516, %522 in 0 : vector<8x128xf32>, vector<8x128xf32> -> vector<16x128xf32>
    %524 = vector.extract_strided_slice %523 {offsets = [0, 0], sizes = [16, 96], strides = [1, 1]} : vector<16x128xf32> to vector<16x96xf32>
    %525 = arith.negf %524 : vector<16x96xf32>
    %526 = math.exp %525 : vector<16x96xf32>
    %cst_245 = arith.constant 1.000000e+00 : f32
    %527 = vector.broadcast %cst_245 : f32 to vector<16x96xf32>
    %528 = arith.addf %527, %526 : vector<16x96xf32>
    %529 = arith.divf %527, %528 : vector<16x96xf32>
    %530 = vector.extract_strided_slice %523 {offsets = [0, 96], sizes = [16, 32], strides = [1, 1]} : vector<16x128xf32> to vector<16x32xf32>
    %531 = math.tanh %530 : vector<16x32xf32>
    %532 = vector.extract_strided_slice %529 {offsets = [0, 32], sizes = [16, 32], strides = [1, 1]} : vector<16x96xf32> to vector<16x32xf32>
    %533 = arith.mulf %532, %507 : vector<16x32xf32>
    %534 = vector.extract_strided_slice %529 {offsets = [0, 0], sizes = [16, 32], strides = [1, 1]} : vector<16x96xf32> to vector<16x32xf32>
    %535 = arith.mulf %534, %531 : vector<16x32xf32>
    %536 = arith.addf %533, %535 : vector<16x32xf32>
    %537 = vector.extract_strided_slice %529 {offsets = [0, 64], sizes = [16, 32], strides = [1, 1]} : vector<16x96xf32> to vector<16x32xf32>
    %538 = math.tanh %536 : vector<16x32xf32>
    %539 = arith.mulf %537, %538 : vector<16x32xf32>
    %c5_246 = arith.constant 5 : index
    %c0_247 = arith.constant 0 : index
    %c0_248 = arith.constant 0 : index
    %540 = vector.load %arg34[%c5_246, %c0_247, %c0_248] : memref<8x8x256xf32, #tpu.memory_space<vmem>>, vector<1x8x128xf32>
    %541 = vector.shape_cast %540 : vector<1x8x128xf32> to vector<8x128xf32>
    %542 = vector.extract_strided_slice %539 {offsets = [0, 0], sizes = [8, 32], strides = [1, 1]} : vector<16x32xf32> to vector<8x32xf32>
    %543 = arith.truncf %542 : vector<8x32xf32> to vector<8x32xbf16>
    %cst_249 = arith.constant dense<0.000000e+00> : vector<8x128xf32>
    %544 = tpu.matmul %543, %391, %cst_249 {dimension_numbers = #tpu.dot_dimension_numbers<[1], [0], [0], [1], [0, 0, 1, 1], [], []>} : vector<8x32xbf16>, vector<32x128xbf16>, vector<8x128xf32> -> vector<8x128xf32>
    %545 = arith.addf %541, %544 : vector<8x128xf32>
    %c2_250 = arith.constant 2 : index
    %c0_251 = arith.constant 0 : index
    %c128_252 = arith.constant 128 : index
    %546 = vector.load %arg34[%c2_250, %c0_251, %c128_252] : memref<8x8x256xf32, #tpu.memory_space<vmem>>, vector<1x8x128xf32>
    %547 = vector.shape_cast %546 : vector<1x8x128xf32> to vector<8x128xf32>
    %548 = vector.extract_strided_slice %539 {offsets = [8, 0], sizes = [8, 32], strides = [1, 1]} : vector<16x32xf32> to vector<8x32xf32>
    %549 = arith.truncf %548 : vector<8x32xf32> to vector<8x32xbf16>
    %cst_253 = arith.constant dense<0.000000e+00> : vector<8x128xf32>
    %550 = tpu.matmul %549, %392, %cst_253 {dimension_numbers = #tpu.dot_dimension_numbers<[1], [0], [0], [1], [0, 0, 1, 1], [], []>} : vector<8x32xbf16>, vector<32x128xbf16>, vector<8x128xf32> -> vector<8x128xf32>
    %551 = arith.addf %547, %550 : vector<8x128xf32>
    %552 = tpu.concatenate %545, %551 in 0 : vector<8x128xf32>, vector<8x128xf32> -> vector<16x128xf32>
    %553 = vector.extract_strided_slice %552 {offsets = [0, 0], sizes = [16, 96], strides = [1, 1]} : vector<16x128xf32> to vector<16x96xf32>
    %554 = arith.negf %553 : vector<16x96xf32>
    %555 = math.exp %554 : vector<16x96xf32>
    %cst_254 = arith.constant 1.000000e+00 : f32
    %556 = vector.broadcast %cst_254 : f32 to vector<16x96xf32>
    %557 = arith.addf %556, %555 : vector<16x96xf32>
    %558 = arith.divf %556, %557 : vector<16x96xf32>
    %559 = vector.extract_strided_slice %552 {offsets = [0, 96], sizes = [16, 32], strides = [1, 1]} : vector<16x128xf32> to vector<16x32xf32>
    %560 = math.tanh %559 : vector<16x32xf32>
    %561 = vector.extract_strided_slice %558 {offsets = [0, 32], sizes = [16, 32], strides = [1, 1]} : vector<16x96xf32> to vector<16x32xf32>
    %562 = arith.mulf %561, %536 : vector<16x32xf32>
    %563 = vector.extract_strided_slice %558 {offsets = [0, 0], sizes = [16, 32], strides = [1, 1]} : vector<16x96xf32> to vector<16x32xf32>
    %564 = arith.mulf %563, %560 : vector<16x32xf32>
    %565 = arith.addf %562, %564 : vector<16x32xf32>
    %566 = vector.extract_strided_slice %558 {offsets = [0, 64], sizes = [16, 32], strides = [1, 1]} : vector<16x96xf32> to vector<16x32xf32>
    %567 = math.tanh %565 : vector<16x32xf32>
    %568 = arith.mulf %566, %567 : vector<16x32xf32>
    %c6_255 = arith.constant 6 : index
    %c0_256 = arith.constant 0 : index
    %c0_257 = arith.constant 0 : index
    %569 = vector.load %arg34[%c6_255, %c0_256, %c0_257] : memref<8x8x256xf32, #tpu.memory_space<vmem>>, vector<1x8x128xf32>
    %570 = vector.shape_cast %569 : vector<1x8x128xf32> to vector<8x128xf32>
    %571 = vector.extract_strided_slice %568 {offsets = [0, 0], sizes = [8, 32], strides = [1, 1]} : vector<16x32xf32> to vector<8x32xf32>
    %572 = arith.truncf %571 : vector<8x32xf32> to vector<8x32xbf16>
    %cst_258 = arith.constant dense<0.000000e+00> : vector<8x128xf32>
    %573 = tpu.matmul %572, %391, %cst_258 {dimension_numbers = #tpu.dot_dimension_numbers<[1], [0], [0], [1], [0, 0, 1, 1], [], []>} : vector<8x32xbf16>, vector<32x128xbf16>, vector<8x128xf32> -> vector<8x128xf32>
    %574 = arith.addf %570, %573 : vector<8x128xf32>
    %c1_259 = arith.constant 1 : index
    %c0_260 = arith.constant 0 : index
    %c128_261 = arith.constant 128 : index
    %575 = vector.load %arg34[%c1_259, %c0_260, %c128_261] : memref<8x8x256xf32, #tpu.memory_space<vmem>>, vector<1x8x128xf32>
    %576 = vector.shape_cast %575 : vector<1x8x128xf32> to vector<8x128xf32>
    %577 = vector.extract_strided_slice %568 {offsets = [8, 0], sizes = [8, 32], strides = [1, 1]} : vector<16x32xf32> to vector<8x32xf32>
    %578 = arith.truncf %577 : vector<8x32xf32> to vector<8x32xbf16>
    %cst_262 = arith.constant dense<0.000000e+00> : vector<8x128xf32>
    %579 = tpu.matmul %578, %392, %cst_262 {dimension_numbers = #tpu.dot_dimension_numbers<[1], [0], [0], [1], [0, 0, 1, 1], [], []>} : vector<8x32xbf16>, vector<32x128xbf16>, vector<8x128xf32> -> vector<8x128xf32>
    %580 = arith.addf %576, %579 : vector<8x128xf32>
    %581 = tpu.concatenate %574, %580 in 0 : vector<8x128xf32>, vector<8x128xf32> -> vector<16x128xf32>
    %582 = vector.extract_strided_slice %581 {offsets = [0, 0], sizes = [16, 96], strides = [1, 1]} : vector<16x128xf32> to vector<16x96xf32>
    %583 = arith.negf %582 : vector<16x96xf32>
    %584 = math.exp %583 : vector<16x96xf32>
    %cst_263 = arith.constant 1.000000e+00 : f32
    %585 = vector.broadcast %cst_263 : f32 to vector<16x96xf32>
    %586 = arith.addf %585, %584 : vector<16x96xf32>
    %587 = arith.divf %585, %586 : vector<16x96xf32>
    %588 = vector.extract_strided_slice %581 {offsets = [0, 96], sizes = [16, 32], strides = [1, 1]} : vector<16x128xf32> to vector<16x32xf32>
    %589 = math.tanh %588 : vector<16x32xf32>
    %590 = vector.extract_strided_slice %587 {offsets = [0, 32], sizes = [16, 32], strides = [1, 1]} : vector<16x96xf32> to vector<16x32xf32>
    %591 = arith.mulf %590, %565 : vector<16x32xf32>
    %592 = vector.extract_strided_slice %587 {offsets = [0, 0], sizes = [16, 32], strides = [1, 1]} : vector<16x96xf32> to vector<16x32xf32>
    %593 = arith.mulf %592, %589 : vector<16x32xf32>
    %594 = arith.addf %591, %593 : vector<16x32xf32>
    %595 = vector.extract_strided_slice %587 {offsets = [0, 64], sizes = [16, 32], strides = [1, 1]} : vector<16x96xf32> to vector<16x32xf32>
    %596 = math.tanh %594 : vector<16x32xf32>
    %597 = arith.mulf %595, %596 : vector<16x32xf32>
    %c7_264 = arith.constant 7 : index
    %c0_265 = arith.constant 0 : index
    %c0_266 = arith.constant 0 : index
    %598 = vector.load %arg34[%c7_264, %c0_265, %c0_266] : memref<8x8x256xf32, #tpu.memory_space<vmem>>, vector<1x8x128xf32>
    %599 = vector.shape_cast %598 : vector<1x8x128xf32> to vector<8x128xf32>
    %600 = vector.extract_strided_slice %597 {offsets = [0, 0], sizes = [8, 32], strides = [1, 1]} : vector<16x32xf32> to vector<8x32xf32>
    %601 = arith.truncf %600 : vector<8x32xf32> to vector<8x32xbf16>
    %cst_267 = arith.constant dense<0.000000e+00> : vector<8x128xf32>
    %602 = tpu.matmul %601, %391, %cst_267 {dimension_numbers = #tpu.dot_dimension_numbers<[1], [0], [0], [1], [0, 0, 1, 1], [], []>} : vector<8x32xbf16>, vector<32x128xbf16>, vector<8x128xf32> -> vector<8x128xf32>
    %603 = arith.addf %599, %602 : vector<8x128xf32>
    %c0_268 = arith.constant 0 : index
    %c0_269 = arith.constant 0 : index
    %c128_270 = arith.constant 128 : index
    %604 = vector.load %arg34[%c0_268, %c0_269, %c128_270] : memref<8x8x256xf32, #tpu.memory_space<vmem>>, vector<1x8x128xf32>
    %605 = vector.shape_cast %604 : vector<1x8x128xf32> to vector<8x128xf32>
    %606 = vector.extract_strided_slice %597 {offsets = [8, 0], sizes = [8, 32], strides = [1, 1]} : vector<16x32xf32> to vector<8x32xf32>
    %607 = arith.truncf %606 : vector<8x32xf32> to vector<8x32xbf16>
    %cst_271 = arith.constant dense<0.000000e+00> : vector<8x128xf32>
    %608 = tpu.matmul %607, %392, %cst_271 {dimension_numbers = #tpu.dot_dimension_numbers<[1], [0], [0], [1], [0, 0, 1, 1], [], []>} : vector<8x32xbf16>, vector<32x128xbf16>, vector<8x128xf32> -> vector<8x128xf32>
    %609 = arith.addf %605, %608 : vector<8x128xf32>
    %610 = tpu.concatenate %603, %609 in 0 : vector<8x128xf32>, vector<8x128xf32> -> vector<16x128xf32>
    %611 = vector.extract_strided_slice %610 {offsets = [0, 0], sizes = [16, 96], strides = [1, 1]} : vector<16x128xf32> to vector<16x96xf32>
    %612 = arith.negf %611 : vector<16x96xf32>
    %613 = math.exp %612 : vector<16x96xf32>
    %cst_272 = arith.constant 1.000000e+00 : f32
    %614 = vector.broadcast %cst_272 : f32 to vector<16x96xf32>
    %615 = arith.addf %614, %613 : vector<16x96xf32>
    %616 = arith.divf %614, %615 : vector<16x96xf32>
    %617 = vector.extract_strided_slice %610 {offsets = [0, 96], sizes = [16, 32], strides = [1, 1]} : vector<16x128xf32> to vector<16x32xf32>
    %618 = math.tanh %617 : vector<16x32xf32>
    %619 = vector.extract_strided_slice %616 {offsets = [0, 32], sizes = [16, 32], strides = [1, 1]} : vector<16x96xf32> to vector<16x32xf32>
    %620 = arith.mulf %619, %594 : vector<16x32xf32>
    %621 = vector.extract_strided_slice %616 {offsets = [0, 0], sizes = [16, 32], strides = [1, 1]} : vector<16x96xf32> to vector<16x32xf32>
    %622 = arith.mulf %621, %618 : vector<16x32xf32>
    %623 = arith.addf %620, %622 : vector<16x32xf32>
    %624 = vector.extract_strided_slice %623 {offsets = [0, 0], sizes = [8, 32], strides = [1, 1]} : vector<16x32xf32> to vector<8x32xf32>
    %625 = vector.extract_strided_slice %623 {offsets = [8, 0], sizes = [8, 32], strides = [1, 1]} : vector<16x32xf32> to vector<8x32xf32>
    %c0_273 = arith.constant 0 : index
    %c0_274 = arith.constant 0 : index
    %626 = vector.load %arg19[%c0_273, %c0_274] : memref<32x64xbf16, #tpu.memory_space<vmem>>, vector<32x64xbf16>
    %627 = arith.truncf %371 : vector<8x32xf32> to vector<8x32xbf16>
    %cst_275 = arith.constant dense<0.000000e+00> : vector<8x64xf32>
    %628 = tpu.matmul %627, %626, %cst_275 {dimension_numbers = #tpu.dot_dimension_numbers<[1], [0], [0], [1], [0, 0, 1, 1], [], []>} : vector<8x32xbf16>, vector<32x64xbf16>, vector<8x64xf32> -> vector<8x64xf32>
    %c0_276 = arith.constant 0 : index
    %c0_277 = arith.constant 0 : index
    %629 = vector.load %arg20[%c0_276, %c0_277] : memref<32x64xbf16, #tpu.memory_space<vmem>>, vector<32x64xbf16>
    %630 = arith.truncf %372 : vector<8x32xf32> to vector<8x32xbf16>
    %cst_278 = arith.constant dense<0.000000e+00> : vector<8x64xf32>
    %631 = tpu.matmul %630, %629, %cst_278 {dimension_numbers = #tpu.dot_dimension_numbers<[1], [0], [0], [1], [0, 0, 1, 1], [], []>} : vector<8x32xbf16>, vector<32x64xbf16>, vector<8x64xf32> -> vector<8x64xf32>
    %632 = arith.addf %628, %631 : vector<8x64xf32>
    %c0_279 = arith.constant 0 : index
    %c0_280 = arith.constant 0 : index
    %633 = vector.load %arg21[%c0_279, %c0_280] : memref<32x64xbf16, #tpu.memory_space<vmem>>, vector<32x64xbf16>
    %634 = arith.truncf %624 : vector<8x32xf32> to vector<8x32xbf16>
    %cst_281 = arith.constant dense<0.000000e+00> : vector<8x64xf32>
    %635 = tpu.matmul %634, %633, %cst_281 {dimension_numbers = #tpu.dot_dimension_numbers<[1], [0], [0], [1], [0, 0, 1, 1], [], []>} : vector<8x32xbf16>, vector<32x64xbf16>, vector<8x64xf32> -> vector<8x64xf32>
    %636 = arith.addf %632, %635 : vector<8x64xf32>
    %c0_282 = arith.constant 0 : index
    %c0_283 = arith.constant 0 : index
    %637 = vector.load %arg22[%c0_282, %c0_283] : memref<32x64xbf16, #tpu.memory_space<vmem>>, vector<32x64xbf16>
    %638 = arith.truncf %625 : vector<8x32xf32> to vector<8x32xbf16>
    %cst_284 = arith.constant dense<0.000000e+00> : vector<8x64xf32>
    %639 = tpu.matmul %638, %637, %cst_284 {dimension_numbers = #tpu.dot_dimension_numbers<[1], [0], [0], [1], [0, 0, 1, 1], [], []>} : vector<8x32xbf16>, vector<32x64xbf16>, vector<8x64xf32> -> vector<8x64xf32>
    %640 = arith.addf %636, %639 : vector<8x64xf32>
    %c0_285 = arith.constant 0 : index
    %c0_286 = arith.constant 0 : index
    %641 = vector.load %arg23[%c0_285, %c0_286] : memref<1x64xf32, #tpu.memory_space<vmem>>, vector<1x64xf32>
    %642 = vector.broadcast %641 : vector<1x64xf32> to vector<8x64xf32>
    %643 = arith.addf %640, %642 : vector<8x64xf32>
    %644 = vector.extract_strided_slice %643 {offsets = [0, 0], sizes = [8, 32], strides = [1, 1]} : vector<8x64xf32> to vector<8x32xf32>
    %645 = vector.extract_strided_slice %643 {offsets = [0, 32], sizes = [8, 32], strides = [1, 1]} : vector<8x64xf32> to vector<8x32xf32>
    %cst_287 = arith.constant 2.000000e+01 : f32
    %646 = vector.broadcast %cst_287 : f32 to vector<8x32xf32>
    %647 = arith.cmpf ogt, %645, %646 : vector<8x32xf32>
    %cst_288 = arith.constant 2.000000e+01 : f32
    %648 = vector.broadcast %cst_288 : f32 to vector<8x32xf32>
    %649 = arith.minimumf %645, %648 : vector<8x32xf32>
    %650 = math.exp %649 : vector<8x32xf32>
    %651 = math.log1p %650 : vector<8x32xf32>
    %652 = arith.select %647, %645, %651 : vector<8x32xi1>, vector<8x32xf32>
    %c0_289 = arith.constant 0 : index
    %c0_290 = arith.constant 0 : index
    %653 = vector.load %arg32[%c0_289, %c0_290] : memref<8x32xf32, #tpu.memory_space<vmem>>, vector<8x32xf32>
    tpu.vector_store %arg32[%c0_289, %c0_290], %644 {strides = array<i32>} : memref<8x32xf32, #tpu.memory_space<vmem>>, vector<8x32xf32>,
    %c0_291 = arith.constant 0 : index
    %c0_292 = arith.constant 0 : index
    %654 = vector.load %arg33[%c0_291, %c0_292] : memref<8x32xf32, #tpu.memory_space<vmem>>, vector<8x32xf32>
    tpu.vector_store %arg33[%c0_291, %c0_292], %652 {strides = array<i32>} : memref<8x32xf32, #tpu.memory_space<vmem>>, vector<8x32xf32>,
    %c0_293 = arith.constant 0 : index
    %c0_294 = arith.constant 0 : index
    %c0_295 = arith.constant 0 : index
    %655 = vector.load %arg1[%c0_293, %c0_294, %c0_295] : memref<8x8x1xf32, #tpu.memory_space<vmem>>, vector<8x8x1xf32>
    %656 = vector.shape_cast %655 : vector<8x8x1xf32> to vector<64x1xf32>
    %c0_296 = arith.constant 0 : index
    %c0_297 = arith.constant 0 : index
    %657 = vector.load %arg24[%c0_296, %c0_297] : memref<1x128xf32, #tpu.memory_space<vmem>>, vector<1x128xf32>
    %658 = vector.broadcast %656 : vector<64x1xf32> to vector<64x128xf32>
    %659 = vector.broadcast %657 : vector<1x128xf32> to vector<64x128xf32>
    %660 = arith.mulf %658, %659 : vector<64x128xf32>
    %c0_298 = arith.constant 0 : index
    %c0_299 = arith.constant 0 : index
    %661 = vector.load %arg25[%c0_298, %c0_299] : memref<8x128xbf16, #tpu.memory_space<vmem>>, vector<8x128xbf16>
    %662 = arith.truncf %25 : vector<64x8xf32> to vector<64x8xbf16>
    %cst_300 = arith.constant dense<0.000000e+00> : vector<64x128xf32>
    %663 = tpu.matmul %662, %661, %cst_300 {dimension_numbers = #tpu.dot_dimension_numbers<[1], [0], [0], [1], [0, 0, 1, 1], [], []>} : vector<64x8xbf16>, vector<8x128xbf16>, vector<64x128xf32> -> vector<64x128xf32>
    %664 = arith.addf %660, %663 : vector<64x128xf32>
    %c0_301 = arith.constant 0 : index
    %c0_302 = arith.constant 0 : index
    %665 = vector.load %arg27[%c0_301, %c0_302] : memref<1x128xf32, #tpu.memory_space<vmem>>, vector<1x128xf32>
    %666 = vector.broadcast %665 : vector<1x128xf32> to vector<64x128xf32>
    %667 = arith.addf %664, %666 : vector<64x128xf32>
    %c0_303 = arith.constant 0 : index
    %c0_304 = arith.constant 0 : index
    %668 = vector.load %arg26[%c0_303, %c0_304] : memref<8x128xbf16, #tpu.memory_space<vmem>>, vector<8x128xbf16>
    %669 = arith.truncf %50 : vector<8x8xf32> to vector<8x8xbf16>
    %cst_305 = arith.constant dense<0.000000e+00> : vector<8x128xf32>
    %670 = tpu.matmul %669, %668, %cst_305 {dimension_numbers = #tpu.dot_dimension_numbers<[1], [0], [0], [1], [0, 0, 1, 1], [], []>} : vector<8x8xbf16>, vector<8x128xbf16>, vector<8x128xf32> -> vector<8x128xf32>
    %671 = vector.shape_cast %667 : vector<64x128xf32> to vector<8x8x128xf32>
    %672 = vector.shape_cast %670 : vector<8x128xf32> to vector<1x8x128xf32>
    %673 = vector.broadcast %672 : vector<1x8x128xf32> to vector<8x8x128xf32>
    %674 = arith.addf %671, %673 : vector<8x8x128xf32>
    %c0_306 = arith.constant 0 : index
    %c0_307 = arith.constant 0 : index
    %c0_308 = arith.constant 0 : index
    %675 = vector.load %arg34[%c0_306, %c0_307, %c0_308] : memref<8x8x256xf32, #tpu.memory_space<vmem>>, vector<8x8x128xf32>
    tpu.vector_store %arg34[%c0_306, %c0_307, %c0_308], %674 {strides = array<i32>} : memref<8x8x256xf32, #tpu.memory_space<vmem>>, vector<8x8x128xf32>,
    %c0_309 = arith.constant 0 : index
    %c0_310 = arith.constant 0 : index
    %676 = vector.load %arg28[%c0_309, %c0_310] : memref<32x128xbf16, #tpu.memory_space<vmem>>, vector<32x128xbf16>
    %cst_311 = arith.constant 0.000000e+00 : f32
    %677 = vector.broadcast %cst_311 : f32 to vector<8x32xf32>
    %c0_312 = arith.constant 0 : index
    %c0_313 = arith.constant 0 : index
    %c0_314 = arith.constant 0 : index
    %678 = vector.load %arg34[%c0_312, %c0_313, %c0_314] : memref<8x8x256xf32, #tpu.memory_space<vmem>>, vector<1x8x128xf32>
    %679 = vector.shape_cast %678 : vector<1x8x128xf32> to vector<8x128xf32>
    %680 = arith.truncf %677 : vector<8x32xf32> to vector<8x32xbf16>
    %cst_315 = arith.constant dense<0.000000e+00> : vector<8x128xf32>
    %681 = tpu.matmul %680, %676, %cst_315 {dimension_numbers = #tpu.dot_dimension_numbers<[1], [0], [0], [1], [0, 0, 1, 1], [], []>} : vector<8x32xbf16>, vector<32x128xbf16>, vector<8x128xf32> -> vector<8x128xf32>
    %682 = arith.addf %679, %681 : vector<8x128xf32>
    %683 = vector.extract_strided_slice %682 {offsets = [0, 0], sizes = [8, 96], strides = [1, 1]} : vector<8x128xf32> to vector<8x96xf32>
    %684 = arith.negf %683 : vector<8x96xf32>
    %685 = math.exp %684 : vector<8x96xf32>
    %cst_316 = arith.constant 1.000000e+00 : f32
    %686 = vector.broadcast %cst_316 : f32 to vector<8x96xf32>
    %687 = arith.addf %686, %685 : vector<8x96xf32>
    %688 = arith.divf %686, %687 : vector<8x96xf32>
    %689 = vector.extract_strided_slice %682 {offsets = [0, 96], sizes = [8, 32], strides = [1, 1]} : vector<8x128xf32> to vector<8x32xf32>
    %690 = math.tanh %689 : vector<8x32xf32>
    %691 = vector.extract_strided_slice %688 {offsets = [0, 32], sizes = [8, 32], strides = [1, 1]} : vector<8x96xf32> to vector<8x32xf32>
    %692 = arith.mulf %691, %644 : vector<8x32xf32>
    %693 = vector.extract_strided_slice %688 {offsets = [0, 0], sizes = [8, 32], strides = [1, 1]} : vector<8x96xf32> to vector<8x32xf32>
    %694 = arith.mulf %693, %690 : vector<8x32xf32>
    %695 = arith.addf %692, %694 : vector<8x32xf32>
    %696 = vector.extract_strided_slice %688 {offsets = [0, 64], sizes = [8, 32], strides = [1, 1]} : vector<8x96xf32> to vector<8x32xf32>
    %697 = math.tanh %695 : vector<8x32xf32>
    %698 = arith.mulf %696, %697 : vector<8x32xf32>
    %c0_317 = arith.constant 0 : index
    %c0_318 = arith.constant 0 : index
    %c0_319 = arith.constant 0 : index
    %699 = vector.load %arg36[%c0_317, %c0_318, %c0_319] : memref<8x8x32xf32, #tpu.memory_space<vmem>>, vector<1x8x32xf32>
    %700 = vector.shape_cast %699 : vector<1x8x32xf32> to vector<8x32xf32>
    %701 = vector.shape_cast %698 : vector<8x32xf32> to vector<1x8x32xf32>
    tpu.vector_store %arg36[%c0_317, %c0_318, %c0_319], %701 {strides = array<i32>} : memref<8x8x32xf32, #tpu.memory_space<vmem>>, vector<1x8x32xf32>,
    %c1_320 = arith.constant 1 : index
    %c0_321 = arith.constant 0 : index
    %c0_322 = arith.constant 0 : index
    %702 = vector.load %arg34[%c1_320, %c0_321, %c0_322] : memref<8x8x256xf32, #tpu.memory_space<vmem>>, vector<1x8x128xf32>
    %703 = vector.shape_cast %702 : vector<1x8x128xf32> to vector<8x128xf32>
    %704 = arith.truncf %698 : vector<8x32xf32> to vector<8x32xbf16>
    %cst_323 = arith.constant dense<0.000000e+00> : vector<8x128xf32>
    %705 = tpu.matmul %704, %676, %cst_323 {dimension_numbers = #tpu.dot_dimension_numbers<[1], [0], [0], [1], [0, 0, 1, 1], [], []>} : vector<8x32xbf16>, vector<32x128xbf16>, vector<8x128xf32> -> vector<8x128xf32>
    %706 = arith.addf %703, %705 : vector<8x128xf32>
    %707 = vector.extract_strided_slice %706 {offsets = [0, 0], sizes = [8, 96], strides = [1, 1]} : vector<8x128xf32> to vector<8x96xf32>
    %708 = arith.negf %707 : vector<8x96xf32>
    %709 = math.exp %708 : vector<8x96xf32>
    %cst_324 = arith.constant 1.000000e+00 : f32
    %710 = vector.broadcast %cst_324 : f32 to vector<8x96xf32>
    %711 = arith.addf %710, %709 : vector<8x96xf32>
    %712 = arith.divf %710, %711 : vector<8x96xf32>
    %713 = vector.extract_strided_slice %706 {offsets = [0, 96], sizes = [8, 32], strides = [1, 1]} : vector<8x128xf32> to vector<8x32xf32>
    %714 = math.tanh %713 : vector<8x32xf32>
    %715 = vector.extract_strided_slice %712 {offsets = [0, 32], sizes = [8, 32], strides = [1, 1]} : vector<8x96xf32> to vector<8x32xf32>
    %716 = arith.mulf %715, %695 : vector<8x32xf32>
    %717 = vector.extract_strided_slice %712 {offsets = [0, 0], sizes = [8, 32], strides = [1, 1]} : vector<8x96xf32> to vector<8x32xf32>
    %718 = arith.mulf %717, %714 : vector<8x32xf32>
    %719 = arith.addf %716, %718 : vector<8x32xf32>
    %720 = vector.extract_strided_slice %712 {offsets = [0, 64], sizes = [8, 32], strides = [1, 1]} : vector<8x96xf32> to vector<8x32xf32>
    %721 = math.tanh %719 : vector<8x32xf32>
    %722 = arith.mulf %720, %721 : vector<8x32xf32>
    %c1_325 = arith.constant 1 : index
    %c0_326 = arith.constant 0 : index
    %c0_327 = arith.constant 0 : index
    %723 = vector.load %arg36[%c1_325, %c0_326, %c0_327] : memref<8x8x32xf32, #tpu.memory_space<vmem>>, vector<1x8x32xf32>
    %724 = vector.shape_cast %723 : vector<1x8x32xf32> to vector<8x32xf32>
    %725 = vector.shape_cast %722 : vector<8x32xf32> to vector<1x8x32xf32>
    tpu.vector_store %arg36[%c1_325, %c0_326, %c0_327], %725 {strides = array<i32>} : memref<8x8x32xf32, #tpu.memory_space<vmem>>, vector<1x8x32xf32>,
    %c2_328 = arith.constant 2 : index
    %c0_329 = arith.constant 0 : index
    %c0_330 = arith.constant 0 : index
    %726 = vector.load %arg34[%c2_328, %c0_329, %c0_330] : memref<8x8x256xf32, #tpu.memory_space<vmem>>, vector<1x8x128xf32>
    %727 = vector.shape_cast %726 : vector<1x8x128xf32> to vector<8x128xf32>
    %728 = arith.truncf %722 : vector<8x32xf32> to vector<8x32xbf16>
    %cst_331 = arith.constant dense<0.000000e+00> : vector<8x128xf32>
    %729 = tpu.matmul %728, %676, %cst_331 {dimension_numbers = #tpu.dot_dimension_numbers<[1], [0], [0], [1], [0, 0, 1, 1], [], []>} : vector<8x32xbf16>, vector<32x128xbf16>, vector<8x128xf32> -> vector<8x128xf32>
    %730 = arith.addf %727, %729 : vector<8x128xf32>
    %731 = vector.extract_strided_slice %730 {offsets = [0, 0], sizes = [8, 96], strides = [1, 1]} : vector<8x128xf32> to vector<8x96xf32>
    %732 = arith.negf %731 : vector<8x96xf32>
    %733 = math.exp %732 : vector<8x96xf32>
    %cst_332 = arith.constant 1.000000e+00 : f32
    %734 = vector.broadcast %cst_332 : f32 to vector<8x96xf32>
    %735 = arith.addf %734, %733 : vector<8x96xf32>
    %736 = arith.divf %734, %735 : vector<8x96xf32>
    %737 = vector.extract_strided_slice %730 {offsets = [0, 96], sizes = [8, 32], strides = [1, 1]} : vector<8x128xf32> to vector<8x32xf32>
    %738 = math.tanh %737 : vector<8x32xf32>
    %739 = vector.extract_strided_slice %736 {offsets = [0, 32], sizes = [8, 32], strides = [1, 1]} : vector<8x96xf32> to vector<8x32xf32>
    %740 = arith.mulf %739, %719 : vector<8x32xf32>
    %741 = vector.extract_strided_slice %736 {offsets = [0, 0], sizes = [8, 32], strides = [1, 1]} : vector<8x96xf32> to vector<8x32xf32>
    %742 = arith.mulf %741, %738 : vector<8x32xf32>
    %743 = arith.addf %740, %742 : vector<8x32xf32>
    %744 = vector.extract_strided_slice %736 {offsets = [0, 64], sizes = [8, 32], strides = [1, 1]} : vector<8x96xf32> to vector<8x32xf32>
    %745 = math.tanh %743 : vector<8x32xf32>
    %746 = arith.mulf %744, %745 : vector<8x32xf32>
    %c2_333 = arith.constant 2 : index
    %c0_334 = arith.constant 0 : index
    %c0_335 = arith.constant 0 : index
    %747 = vector.load %arg36[%c2_333, %c0_334, %c0_335] : memref<8x8x32xf32, #tpu.memory_space<vmem>>, vector<1x8x32xf32>
    %748 = vector.shape_cast %747 : vector<1x8x32xf32> to vector<8x32xf32>
    %749 = vector.shape_cast %746 : vector<8x32xf32> to vector<1x8x32xf32>
    tpu.vector_store %arg36[%c2_333, %c0_334, %c0_335], %749 {strides = array<i32>} : memref<8x8x32xf32, #tpu.memory_space<vmem>>, vector<1x8x32xf32>,
    %c3_336 = arith.constant 3 : index
    %c0_337 = arith.constant 0 : index
    %c0_338 = arith.constant 0 : index
    %750 = vector.load %arg34[%c3_336, %c0_337, %c0_338] : memref<8x8x256xf32, #tpu.memory_space<vmem>>, vector<1x8x128xf32>
    %751 = vector.shape_cast %750 : vector<1x8x128xf32> to vector<8x128xf32>
    %752 = arith.truncf %746 : vector<8x32xf32> to vector<8x32xbf16>
    %cst_339 = arith.constant dense<0.000000e+00> : vector<8x128xf32>
    %753 = tpu.matmul %752, %676, %cst_339 {dimension_numbers = #tpu.dot_dimension_numbers<[1], [0], [0], [1], [0, 0, 1, 1], [], []>} : vector<8x32xbf16>, vector<32x128xbf16>, vector<8x128xf32> -> vector<8x128xf32>
    %754 = arith.addf %751, %753 : vector<8x128xf32>
    %755 = vector.extract_strided_slice %754 {offsets = [0, 0], sizes = [8, 96], strides = [1, 1]} : vector<8x128xf32> to vector<8x96xf32>
    %756 = arith.negf %755 : vector<8x96xf32>
    %757 = math.exp %756 : vector<8x96xf32>
    %cst_340 = arith.constant 1.000000e+00 : f32
    %758 = vector.broadcast %cst_340 : f32 to vector<8x96xf32>
    %759 = arith.addf %758, %757 : vector<8x96xf32>
    %760 = arith.divf %758, %759 : vector<8x96xf32>
    %761 = vector.extract_strided_slice %754 {offsets = [0, 96], sizes = [8, 32], strides = [1, 1]} : vector<8x128xf32> to vector<8x32xf32>
    %762 = math.tanh %761 : vector<8x32xf32>
    %763 = vector.extract_strided_slice %760 {offsets = [0, 32], sizes = [8, 32], strides = [1, 1]} : vector<8x96xf32> to vector<8x32xf32>
    %764 = arith.mulf %763, %743 : vector<8x32xf32>
    %765 = vector.extract_strided_slice %760 {offsets = [0, 0], sizes = [8, 32], strides = [1, 1]} : vector<8x96xf32> to vector<8x32xf32>
    %766 = arith.mulf %765, %762 : vector<8x32xf32>
    %767 = arith.addf %764, %766 : vector<8x32xf32>
    %768 = vector.extract_strided_slice %760 {offsets = [0, 64], sizes = [8, 32], strides = [1, 1]} : vector<8x96xf32> to vector<8x32xf32>
    %769 = math.tanh %767 : vector<8x32xf32>
    %770 = arith.mulf %768, %769 : vector<8x32xf32>
    %c3_341 = arith.constant 3 : index
    %c0_342 = arith.constant 0 : index
    %c0_343 = arith.constant 0 : index
    %771 = vector.load %arg36[%c3_341, %c0_342, %c0_343] : memref<8x8x32xf32, #tpu.memory_space<vmem>>, vector<1x8x32xf32>
    %772 = vector.shape_cast %771 : vector<1x8x32xf32> to vector<8x32xf32>
    %773 = vector.shape_cast %770 : vector<8x32xf32> to vector<1x8x32xf32>
    tpu.vector_store %arg36[%c3_341, %c0_342, %c0_343], %773 {strides = array<i32>} : memref<8x8x32xf32, #tpu.memory_space<vmem>>, vector<1x8x32xf32>,
    %c4_344 = arith.constant 4 : index
    %c0_345 = arith.constant 0 : index
    %c0_346 = arith.constant 0 : index
    %774 = vector.load %arg34[%c4_344, %c0_345, %c0_346] : memref<8x8x256xf32, #tpu.memory_space<vmem>>, vector<1x8x128xf32>
    %775 = vector.shape_cast %774 : vector<1x8x128xf32> to vector<8x128xf32>
    %776 = arith.truncf %770 : vector<8x32xf32> to vector<8x32xbf16>
    %cst_347 = arith.constant dense<0.000000e+00> : vector<8x128xf32>
    %777 = tpu.matmul %776, %676, %cst_347 {dimension_numbers = #tpu.dot_dimension_numbers<[1], [0], [0], [1], [0, 0, 1, 1], [], []>} : vector<8x32xbf16>, vector<32x128xbf16>, vector<8x128xf32> -> vector<8x128xf32>
    %778 = arith.addf %775, %777 : vector<8x128xf32>
    %779 = vector.extract_strided_slice %778 {offsets = [0, 0], sizes = [8, 96], strides = [1, 1]} : vector<8x128xf32> to vector<8x96xf32>
    %780 = arith.negf %779 : vector<8x96xf32>
    %781 = math.exp %780 : vector<8x96xf32>
    %cst_348 = arith.constant 1.000000e+00 : f32
    %782 = vector.broadcast %cst_348 : f32 to vector<8x96xf32>
    %783 = arith.addf %782, %781 : vector<8x96xf32>
    %784 = arith.divf %782, %783 : vector<8x96xf32>
    %785 = vector.extract_strided_slice %778 {offsets = [0, 96], sizes = [8, 32], strides = [1, 1]} : vector<8x128xf32> to vector<8x32xf32>
    %786 = math.tanh %785 : vector<8x32xf32>
    %787 = vector.extract_strided_slice %784 {offsets = [0, 32], sizes = [8, 32], strides = [1, 1]} : vector<8x96xf32> to vector<8x32xf32>
    %788 = arith.mulf %787, %767 : vector<8x32xf32>
    %789 = vector.extract_strided_slice %784 {offsets = [0, 0], sizes = [8, 32], strides = [1, 1]} : vector<8x96xf32> to vector<8x32xf32>
    %790 = arith.mulf %789, %786 : vector<8x32xf32>
    %791 = arith.addf %788, %790 : vector<8x32xf32>
    %792 = vector.extract_strided_slice %784 {offsets = [0, 64], sizes = [8, 32], strides = [1, 1]} : vector<8x96xf32> to vector<8x32xf32>
    %793 = math.tanh %791 : vector<8x32xf32>
    %794 = arith.mulf %792, %793 : vector<8x32xf32>
    %c4_349 = arith.constant 4 : index
    %c0_350 = arith.constant 0 : index
    %c0_351 = arith.constant 0 : index
    %795 = vector.load %arg36[%c4_349, %c0_350, %c0_351] : memref<8x8x32xf32, #tpu.memory_space<vmem>>, vector<1x8x32xf32>
    %796 = vector.shape_cast %795 : vector<1x8x32xf32> to vector<8x32xf32>
    %797 = vector.shape_cast %794 : vector<8x32xf32> to vector<1x8x32xf32>
    tpu.vector_store %arg36[%c4_349, %c0_350, %c0_351], %797 {strides = array<i32>} : memref<8x8x32xf32, #tpu.memory_space<vmem>>, vector<1x8x32xf32>,
    %c5_352 = arith.constant 5 : index
    %c0_353 = arith.constant 0 : index
    %c0_354 = arith.constant 0 : index
    %798 = vector.load %arg34[%c5_352, %c0_353, %c0_354] : memref<8x8x256xf32, #tpu.memory_space<vmem>>, vector<1x8x128xf32>
    %799 = vector.shape_cast %798 : vector<1x8x128xf32> to vector<8x128xf32>
    %800 = arith.truncf %794 : vector<8x32xf32> to vector<8x32xbf16>
    %cst_355 = arith.constant dense<0.000000e+00> : vector<8x128xf32>
    %801 = tpu.matmul %800, %676, %cst_355 {dimension_numbers = #tpu.dot_dimension_numbers<[1], [0], [0], [1], [0, 0, 1, 1], [], []>} : vector<8x32xbf16>, vector<32x128xbf16>, vector<8x128xf32> -> vector<8x128xf32>
    %802 = arith.addf %799, %801 : vector<8x128xf32>
    %803 = vector.extract_strided_slice %802 {offsets = [0, 0], sizes = [8, 96], strides = [1, 1]} : vector<8x128xf32> to vector<8x96xf32>
    %804 = arith.negf %803 : vector<8x96xf32>
    %805 = math.exp %804 : vector<8x96xf32>
    %cst_356 = arith.constant 1.000000e+00 : f32
    %806 = vector.broadcast %cst_356 : f32 to vector<8x96xf32>
    %807 = arith.addf %806, %805 : vector<8x96xf32>
    %808 = arith.divf %806, %807 : vector<8x96xf32>
    %809 = vector.extract_strided_slice %802 {offsets = [0, 96], sizes = [8, 32], strides = [1, 1]} : vector<8x128xf32> to vector<8x32xf32>
    %810 = math.tanh %809 : vector<8x32xf32>
    %811 = vector.extract_strided_slice %808 {offsets = [0, 32], sizes = [8, 32], strides = [1, 1]} : vector<8x96xf32> to vector<8x32xf32>
    %812 = arith.mulf %811, %791 : vector<8x32xf32>
    %813 = vector.extract_strided_slice %808 {offsets = [0, 0], sizes = [8, 32], strides = [1, 1]} : vector<8x96xf32> to vector<8x32xf32>
    %814 = arith.mulf %813, %810 : vector<8x32xf32>
    %815 = arith.addf %812, %814 : vector<8x32xf32>
    %816 = vector.extract_strided_slice %808 {offsets = [0, 64], sizes = [8, 32], strides = [1, 1]} : vector<8x96xf32> to vector<8x32xf32>
    %817 = math.tanh %815 : vector<8x32xf32>
    %818 = arith.mulf %816, %817 : vector<8x32xf32>
    %c5_357 = arith.constant 5 : index
    %c0_358 = arith.constant 0 : index
    %c0_359 = arith.constant 0 : index
    %819 = vector.load %arg36[%c5_357, %c0_358, %c0_359] : memref<8x8x32xf32, #tpu.memory_space<vmem>>, vector<1x8x32xf32>
    %820 = vector.shape_cast %819 : vector<1x8x32xf32> to vector<8x32xf32>
    %821 = vector.shape_cast %818 : vector<8x32xf32> to vector<1x8x32xf32>
    tpu.vector_store %arg36[%c5_357, %c0_358, %c0_359], %821 {strides = array<i32>} : memref<8x8x32xf32, #tpu.memory_space<vmem>>, vector<1x8x32xf32>,
    %c6_360 = arith.constant 6 : index
    %c0_361 = arith.constant 0 : index
    %c0_362 = arith.constant 0 : index
    %822 = vector.load %arg34[%c6_360, %c0_361, %c0_362] : memref<8x8x256xf32, #tpu.memory_space<vmem>>, vector<1x8x128xf32>
    %823 = vector.shape_cast %822 : vector<1x8x128xf32> to vector<8x128xf32>
    %824 = arith.truncf %818 : vector<8x32xf32> to vector<8x32xbf16>
    %cst_363 = arith.constant dense<0.000000e+00> : vector<8x128xf32>
    %825 = tpu.matmul %824, %676, %cst_363 {dimension_numbers = #tpu.dot_dimension_numbers<[1], [0], [0], [1], [0, 0, 1, 1], [], []>} : vector<8x32xbf16>, vector<32x128xbf16>, vector<8x128xf32> -> vector<8x128xf32>
    %826 = arith.addf %823, %825 : vector<8x128xf32>
    %827 = vector.extract_strided_slice %826 {offsets = [0, 0], sizes = [8, 96], strides = [1, 1]} : vector<8x128xf32> to vector<8x96xf32>
    %828 = arith.negf %827 : vector<8x96xf32>
    %829 = math.exp %828 : vector<8x96xf32>
    %cst_364 = arith.constant 1.000000e+00 : f32
    %830 = vector.broadcast %cst_364 : f32 to vector<8x96xf32>
    %831 = arith.addf %830, %829 : vector<8x96xf32>
    %832 = arith.divf %830, %831 : vector<8x96xf32>
    %833 = vector.extract_strided_slice %826 {offsets = [0, 96], sizes = [8, 32], strides = [1, 1]} : vector<8x128xf32> to vector<8x32xf32>
    %834 = math.tanh %833 : vector<8x32xf32>
    %835 = vector.extract_strided_slice %832 {offsets = [0, 32], sizes = [8, 32], strides = [1, 1]} : vector<8x96xf32> to vector<8x32xf32>
    %836 = arith.mulf %835, %815 : vector<8x32xf32>
    %837 = vector.extract_strided_slice %832 {offsets = [0, 0], sizes = [8, 32], strides = [1, 1]} : vector<8x96xf32> to vector<8x32xf32>
    %838 = arith.mulf %837, %834 : vector<8x32xf32>
    %839 = arith.addf %836, %838 : vector<8x32xf32>
    %840 = vector.extract_strided_slice %832 {offsets = [0, 64], sizes = [8, 32], strides = [1, 1]} : vector<8x96xf32> to vector<8x32xf32>
    %841 = math.tanh %839 : vector<8x32xf32>
    %842 = arith.mulf %840, %841 : vector<8x32xf32>
    %c6_365 = arith.constant 6 : index
    %c0_366 = arith.constant 0 : index
    %c0_367 = arith.constant 0 : index
    %843 = vector.load %arg36[%c6_365, %c0_366, %c0_367] : memref<8x8x32xf32, #tpu.memory_space<vmem>>, vector<1x8x32xf32>
    %844 = vector.shape_cast %843 : vector<1x8x32xf32> to vector<8x32xf32>
    %845 = vector.shape_cast %842 : vector<8x32xf32> to vector<1x8x32xf32>
    tpu.vector_store %arg36[%c6_365, %c0_366, %c0_367], %845 {strides = array<i32>} : memref<8x8x32xf32, #tpu.memory_space<vmem>>, vector<1x8x32xf32>,
    %c7_368 = arith.constant 7 : index
    %c0_369 = arith.constant 0 : index
    %c0_370 = arith.constant 0 : index
    %846 = vector.load %arg34[%c7_368, %c0_369, %c0_370] : memref<8x8x256xf32, #tpu.memory_space<vmem>>, vector<1x8x128xf32>
    %847 = vector.shape_cast %846 : vector<1x8x128xf32> to vector<8x128xf32>
    %848 = arith.truncf %842 : vector<8x32xf32> to vector<8x32xbf16>
    %cst_371 = arith.constant dense<0.000000e+00> : vector<8x128xf32>
    %849 = tpu.matmul %848, %676, %cst_371 {dimension_numbers = #tpu.dot_dimension_numbers<[1], [0], [0], [1], [0, 0, 1, 1], [], []>} : vector<8x32xbf16>, vector<32x128xbf16>, vector<8x128xf32> -> vector<8x128xf32>
    %850 = arith.addf %847, %849 : vector<8x128xf32>
    %851 = vector.extract_strided_slice %850 {offsets = [0, 0], sizes = [8, 96], strides = [1, 1]} : vector<8x128xf32> to vector<8x96xf32>
    %852 = arith.negf %851 : vector<8x96xf32>
    %853 = math.exp %852 : vector<8x96xf32>
    %cst_372 = arith.constant 1.000000e+00 : f32
    %854 = vector.broadcast %cst_372 : f32 to vector<8x96xf32>
    %855 = arith.addf %854, %853 : vector<8x96xf32>
    %856 = arith.divf %854, %855 : vector<8x96xf32>
    %857 = vector.extract_strided_slice %850 {offsets = [0, 96], sizes = [8, 32], strides = [1, 1]} : vector<8x128xf32> to vector<8x32xf32>
    %858 = math.tanh %857 : vector<8x32xf32>
    %859 = vector.extract_strided_slice %856 {offsets = [0, 32], sizes = [8, 32], strides = [1, 1]} : vector<8x96xf32> to vector<8x32xf32>
    %860 = arith.mulf %859, %839 : vector<8x32xf32>
    %861 = vector.extract_strided_slice %856 {offsets = [0, 0], sizes = [8, 32], strides = [1, 1]} : vector<8x96xf32> to vector<8x32xf32>
    %862 = arith.mulf %861, %858 : vector<8x32xf32>
    %863 = arith.addf %860, %862 : vector<8x32xf32>
    %864 = vector.extract_strided_slice %856 {offsets = [0, 64], sizes = [8, 32], strides = [1, 1]} : vector<8x96xf32> to vector<8x32xf32>
    %865 = math.tanh %863 : vector<8x32xf32>
    %866 = arith.mulf %864, %865 : vector<8x32xf32>
    %c7_373 = arith.constant 7 : index
    %c0_374 = arith.constant 0 : index
    %c0_375 = arith.constant 0 : index
    %867 = vector.load %arg36[%c7_373, %c0_374, %c0_375] : memref<8x8x32xf32, #tpu.memory_space<vmem>>, vector<1x8x32xf32>
    %868 = vector.shape_cast %867 : vector<1x8x32xf32> to vector<8x32xf32>
    %869 = vector.shape_cast %866 : vector<8x32xf32> to vector<1x8x32xf32>
    tpu.vector_store %arg36[%c7_373, %c0_374, %c0_375], %869 {strides = array<i32>} : memref<8x8x32xf32, #tpu.memory_space<vmem>>, vector<1x8x32xf32>,
    %c0_376 = arith.constant 0 : index
    %c0_377 = arith.constant 0 : index
    %870 = vector.load %arg29[%c0_376, %c0_377] : memref<1x32xf32, #tpu.memory_space<vmem>>, vector<1x32xf32>
    %871 = vector.shape_cast %870 : vector<1x32xf32> to vector<1x1x32xf32>
    %c0_378 = arith.constant 0 : index
    %c0_379 = arith.constant 0 : index
    %c0_380 = arith.constant 0 : index
    %872 = vector.load %arg36[%c0_378, %c0_379, %c0_380] : memref<8x8x32xf32, #tpu.memory_space<vmem>>, vector<8x8x32xf32>
    %873 = vector.broadcast %871 : vector<1x1x32xf32> to vector<8x8x32xf32>
    %874 = arith.mulf %872, %873 : vector<8x8x32xf32>
    %cst_381 = arith.constant dense<0.000000e+00> : vector<8x8xf32>
    %875 = vector.multi_reduction <add>, %874, %cst_381 [2] : vector<8x8x32xf32> to vector<8x8xf32>
    %c0_382 = arith.constant 0 : index
    %c0_383 = arith.constant 0 : index
    %876 = vector.load %arg30[%c0_382, %c0_383] : memref<1x1xf32, #tpu.memory_space<vmem>>, vector<1x1xf32>
    %877 = vector.broadcast %876 : vector<1x1xf32> to vector<8x8xf32>
    %878 = arith.addf %875, %877 : vector<8x8xf32>
    %c0_384 = arith.constant 0 : index
    %c0_385 = arith.constant 0 : index
    %879 = vector.load %arg31[%c0_384, %c0_385] : memref<8x8xf32, #tpu.memory_space<vmem>>, vector<8x8xf32>
    tpu.vector_store %arg31[%c0_384, %c0_385], %878 {strides = array<i32>} : memref<8x8xf32, #tpu.memory_space<vmem>>, vector<8x8xf32>,
    return
  }
}

</mosaic_0001>

<bundles_post_ra>
// kernel: forward.1
= control target key start
LH: loop header
LB: loop body
LE: loop exit
PB: predicated region body
PF: predicated region fallthrough
CT: control target
= control target key end

     0   :  { %s5890_s3 = smov 2   ;;  %v5891_v0 = vmov 0.0   ;;  %vm162_vm0 = vcmask 31744   ;;  %s5892_s7 = smov 3   ;;  %vm339_vm10 = vcmask 23552   ;;  %vm243_vm11 = vcmask 1041408   ;;  %s7229_s0 = inlined_call_operand.smem [shape: u32[34], index: -1, kind: input, shape index: {}] }
   0x1   :  { %s4770_s6 = sld [smem:[%s7229_s0 + %s5890_s3]]   ;;  %5113 = vmatprep.subr.bf16.mxu1 %v5891_v0  ;;  %s5893_s11 = smov 4   ;;  %vm359_vm12 = vcmask 1040384   ;;  %v5895_v30 = vmov 65535   ;;  %vm5896_vm13 = vmmov 0  }
   0x2   :  { %s4771_s10 = sld [smem:[%s7229_s0 + %s5892_s7]]   ;;  %s5894_s15 = smov 6   ;;  %v360_v31 = vsel %vm359_vm12, 4294967295, %v5895_v30  ;;  %5115 = vmatprep.mubr.msk.bf16.mxu1 %vm5896_vm13, %v5891_v0  ;;  %vm4741_vm12 = vcmask 1041409  }
   0x3   :  { %s4772_s14 = sld [smem:[%s7229_s0 + %s5893_s11]]   ;;  %v361_v33 = vsel %vm243_vm11, %v360_v31, 0  ;;  %s5897_s19 = smov 8  }
   0x4   :  { %s4774_s18 = sld [smem:[%s7229_s0 + %s5894_s15]]   ;;  %s5898_s23 = smov 9  }
   0x5   :  { %s4776_s22 = sld [smem:[%s7229_s0 + %s5897_s19]]   ;;  %s5900_s30 = smov 10  }
   0x6   :  { %s4777_s26 = sld [smem:[%s7229_s0 + %s5898_s23]]   ;;  %s5901_s4 = smov 12  }
   0x7   :  { %v5938_v1 = vld [vmem:[%s4770_s6 + $0x10] sm:$0xff]  ;;  %v5940_v2 = vld [vmem:[%s4770_s6] sm:$0xff]  ;;  %v5942_v3 = vld [vmem:[%s4770_s6 + $0x18] sm:$0xff]  ;;  %s6071_s29 = sld [smem:[%s7229_s0]]   ;;  %s5902_s8 = smov 13  }
   0x8   :  { %vm148_vm1 = vcmp.ne.f32.partialorder %v5938_v1, %v5938_v1  ;;  %vm146_vm2 = vcmp.ne.f32.partialorder %v5940_v2, %v5940_v2  ;;  %vm149_vm3 = vcmp.ne.f32.partialorder %v5942_v3, %v5942_v3  ;;  %v5953_v4 = vld [vmem:[%s4770_s6 + $0x8] sm:$0xff]  ;;  %v5955_v5 = vld [vmem:[%s4770_s6 + $0x20] sm:$0xff]  ;;  %v5971_v13 = vld [vmem:[%s4770_s6 + $0x30] sm:$0xff]  ;;  %s4778_s3 = sld [smem:[%s7229_s0 + %s5900_s30]]   ;;  %s5903_s12 = smov 5  }
   0x9   :  { %v5957_v6 = vld [vmem:[%s4770_s6 + $0x28] sm:$0xff]  ;;  %v156_v7 = vsel %vm148_vm1, 1.0, %v5891_v0  ;;  %v154_v8 = vsel %vm146_vm2, 1.0, %v5891_v0  ;;  %v157_v9 = vsel %vm149_vm3, 1.0, %v5891_v0  ;;  %vm147_vm4 = vcmp.ne.f32.partialorder %v5953_v4, %v5953_v4  ;;  %v5973_v14 = vld [vmem:[%s4770_s6 + $0x38] sm:$0xff]  ;;  %v5983_v19 = vld [vmem:[%s4771_s10] sm:$0xff]  ;;  %s6101_s7 = sld [smem:[%s7229_s0 + %s5901_s4]]  }
   0xa   :  { %v169_v10 = vsel %vm162_vm0, %v156_v7, -inf  ;;  %v163_v11 = vsel %vm162_vm0, %v154_v8, -inf  ;;  %v155_v12 = vsel %vm147_vm4, 1.0, %v5891_v0  ;;  %vm150_vm5 = vcmp.ne.f32.partialorder %v5955_v5, %v5955_v5  ;;  %v219_v28 = vld [vmem:[%s4772_s14] sm:$0x3]  ;;  %s6112_s11 = sld [smem:[%s7229_s0 + %s5902_s8]]   ;;  %s5904_s16 = smov 7  }
   0xb   :  { %170 = vmax.xlane.f32.xlu1 %v169_v10  ;;  %164 = vmax.xlane.f32.xlu0 %v163_v11  ;;  %vm151_vm6 = vcmp.ne.f32.partialorder %v5957_v6, %v5957_v6  ;;  %v172_v15 = vsel %vm162_vm0, %v157_v9, -inf  ;;  %v166_v16 = vsel %vm162_vm0, %v155_v12, -inf  ;;  %v158_v17 = vsel %vm150_vm5, 1.0, %v5891_v0  ;;  %v347_v32 = vld [vmem:[%s4774_s18] sm:$0x3]  ;;  %s4773_s15 = sld [smem:[%s7229_s0 + %s5903_s12]]   ;;  %s5905_s20 = smov 11  }
   0xc   :  { %v159_v18 = vsel %vm151_vm6, 1.0, %v5891_v0  ;;  %vm152_vm7 = vcmp.ne.f32.partialorder %v5971_v13, %v5971_v13  ;;  %vm153_vm8 = vcmp.ne.f32.partialorder %v5973_v14, %v5973_v14  ;;  %v175_v20 = vsel %vm162_vm0, %v158_v17, -inf  ;;  %5487 = vmatprep.subr.msk.bf16.mxu0 %vm243_vm11, %v219_v28  ;;  %v4825_v58 = vld.sshfl [vmem:[%s4776_s22] sm:$0x33 pattern:$0x76325410]  ;;  %s4775_s19 = sld [smem:[%s7229_s0 + %s5904_s16]]  }
   0xd   :  { %v178_v21 = vsel %vm162_vm0, %v159_v18, -inf  ;;  %v160_v22 = vsel %vm152_vm7, 1.0, %v5891_v0  ;;  %v161_v23 = vsel %vm153_vm8, 1.0, %v5891_v0  ;;  %vm337_vm9 = vcmp.ne.f32.partialorder %v5983_v19, %v5983_v19  ;;  %v421_v62 = vld [vmem:[%s4777_s26] sm:$0xff]  ;;  %v410_v7 = vld [vmem:[%s6071_s29 + $0x10] sm:$0xff]  ;;  %v411_v8 = vld [vmem:[%s6071_s29 + $0x18] sm:$0xff]  ;;  %s4779_s23 = sld [smem:[%s7229_s0 + %s5905_s20]]  }
   0xe   :  { %v181_v24 = vsel %vm162_vm0, %v160_v22, -inf  ;;  %v184_v25 = vsel %vm162_vm0, %v161_v23, -inf  ;;  %v338_v26 = vsel %vm337_vm9, 1.0, %v5891_v0  ;;  %v245_v29 = vsel %vm243_vm11, %v219_v28, 0  ;;  %v412_v10 = vld [vmem:[%s6071_s29 + $0x20] sm:$0xff]  ;;  %v413_v11 = vld [vmem:[%s6071_s29 + $0x28] sm:$0xff] }
   0xf   :  { %173 = vmax.xlane.f32.xlu1 %v172_v15  ;;  %167 = vmax.xlane.f32.xlu0 %v166_v16  ;;  %v340_v27 = vsel %vm339_vm10, %v338_v26, -inf  ;;  %v363_v34 = vand.u32 %v361_v33, %v347_v32  ;;  %v532_v59 = vcombine.high %v4825_v58, %v4825_v58  ;;  %v546_v60 = vand.u32 %v4825_v58, %v361_v33  ;;  %v414_v15 = vld [vmem:[%s6071_s29 + $0x30] sm:$0xff]  ;;  %v415_v16 = vld [vmem:[%s6071_s29 + $0x38] sm:$0xff]  ;;  %v6107_v18 = vld [vmem:[%s6101_s7 + $0x8] sm:$0xff]   ;;  %s5906_s24 = smov 32   ;;  %s5907_s25 = smov 64  }
  0x10   :  { %5104 = vmatpush3.bf16.msra.mxu0 %v245_v29  ;;  %v4819_v63 = vcombine.high %v421_v62, %v421_v62  ;;  %v418_v9 = vpack.c.bf16 %v411_v8, %v410_v7  ;;  %v419_v12 = vpack.c.bf16 %v413_v11, %v412_v10  ;;  %v420_v17 = vpack.c.bf16 %v415_v16, %v414_v15  ;;  %v6184_v15 = vld [vmem:[%s6112_s11 + $0x8] sm:$0xff]   ;;  %s5908_s26 = smov 14   ;;  %s5909_s30 = smov 15  }
  0x11   :  { %5114 = vmatpush3.bf16.msra.mxu1 %v363_v34  ;;  %v549_v61 = vand.u32 %v532_v59, %v361_v33  ;;  %vm431_vm8 = vcmask 64512   ;;  %vm762_vm9 = vcmask 261120   ;;  %s5910_s4 = smov 17   ;;  %s5911_s8 = smov 18  }
  0x12   :  { %v4815_v10 = vld [vmem:[%s4775_s19] ss:$0 sm:$0xff]  ;;  %s5912_s12 = smov 16   ;;  %s5913_s16 = smov 20  }
  0x13   :  { %176 = vmax.xlane.f32.xlu0 %v175_v20  ;;  %179 = vmax.xlane.f32.xlu1 %v178_v21  ;;  %v4802_v21 = vld [vmem:[%s4773_s15] ss:$0 sm:$0xff]  ;;  %s4784_s15 = sld [smem:[%s7229_s0 + %s5912_s12]]   ;;  %s5914_s20 = smov 19  }
  0x14   :  { %565 = vmatprep.subr.bf16.mxu0 %v549_v61  ;;  %s4788_s19 = sld [smem:[%s7229_s0 + %s5913_s16]]   ;;  %s5918_s5 = smov 28  }
  0x15   :  { %s5919_s9 = smov 25   ;;  %s5920_s13 = smov 1  }
  0x16   :  { %s4793_s12 = sld [smem:[%s7229_s0 + %s5919_s9]]   ;;  %s5921_s17 = smov 26  }
  0x17   :  { %182 = vmax.xlane.f32.xlu0 %v181_v24  ;;  %185 = vmax.xlane.f32.xlu1 %v184_v25  ;;  %s6965_s16 = sld [smem:[%s7229_s0 + %s5920_s13]]   ;;  %s5922_s21 = smov 23  }
  0x18   :  { %s5923_s27 = smov 24   ;;  %s5925_s9 = smov 29  }
  0x19   :  { %s5926_s13 = smov 30   ;;  %s5928_s18 = smov 31  }
  0x1b   :  { %341 = vmax.xlane.f32.xlu0 %v340_v27 }
  0x94   :  { %v6003_v35 = vpop.xlane.xlu1 %170  ;;  %v6005_v36 = vpop.xlane.xlu0 %164 }
  0x95   :  { %vm189_vm14 = vcmp.gt.f32.partialorder %v6003_v35, 0.0  ;;  %vm187_vm15 = vcmp.gt.f32.partialorder %v6005_v36, 0.0 }
  0x96   :  { %v213_v39 = vsel %vm189_vm14, 0.0, %v5938_v1  ;;  %v211_v41 = vsel %vm187_vm15, 0.0, %v5940_v2  ;;  %v4818_v1 = vcombine.low %v421_v62, %v421_v62  ;;  %v408_v2 = vld [vmem:[%s6071_s29] sm:$0xff]  ;;  %v4809_v22 = vsel %vm189_vm14, 1.0, %v5891_v0 }
  0x97   :  { %v4807_v25 = vsel %vm187_vm15, 1.0, %v5891_v0  ;;  %v322_v29 = vsub.f32 1.0, %v4809_v22  ;;  %vm4745_vm14 = vcmask 1043459   ;;  %vm4747_vm15 = vcmask 1044484  }
  0x98   :  { %v6009_v37 = vpop.xlane.xlu1 %173  ;;  %v6011_v38 = vpop.xlane.xlu0 %167  ;;  %v320_v33 = vsub.f32 1.0, %v4807_v25 }
  0x99   :  { %vm190_vm1 = vcmp.gt.f32.partialorder %v6009_v37, 0.0  ;;  %vm188_vm2 = vcmp.gt.f32.partialorder %v6011_v38, 0.0 }
  0x9a   :  { %v214_v40 = vsel %vm190_vm1, 0.0, %v5942_v3  ;;  %v212_v42 = vsel %vm188_vm2, 0.0, %v5953_v4  ;;  %v409_v3 = vld [vmem:[%s6071_s29 + $0x8] sm:$0xff]  ;;  %v4810_v23 = vsel %vm190_vm1, 1.0, %v5891_v0  ;;  %v4808_v26 = vsel %vm188_vm2, 1.0, %v5891_v0  ;;  %s4782_s29 = sld [smem:[%s7229_s0 + %s5908_s26]]   ;;  %s5915_s26 = smov 21  }
  0x9b   :  { %v221_v43 = vpack.c.bf16 %v214_v40, %v213_v39  ;;  %v220_v44 = vpack.c.bf16 %v212_v42, %v211_v41  ;;  %v323_v30 = vsub.f32 1.0, %v4810_v23  ;;  %v321_v34 = vsub.f32 1.0, %v4808_v26 }
  0x9c   :  { %v6027_v45 = vpop.xlane.xlu0 %176  ;;  %v6029_v46 = vpop.xlane.xlu1 %179  ;;  %vm4749_vm1 = vcmask 1045509   ;;  %vm4751_vm2 = vcmask 1046534  }
  0x9d   :  { %vm191_vm3 = vcmp.gt.f32.partialorder %v6027_v45, 0.0  ;;  %vm192_vm4 = vcmp.gt.f32.partialorder %v6029_v46, 0.0  ;;  %5105 = vmatprep.mubr.msk.bf16.mxu0 %vm162_vm0, %v220_v44 }
  0x9e   :  { %v215_v47 = vsel %vm191_vm3, 0.0, %v5955_v5  ;;  %v216_v48 = vsel %vm192_vm4, 0.0, %v5957_v6  ;;  %5106 = vmatmul.mubr.msk.bf16.vlgmr.msra.gmra.mxu0 %vm162_vm0, %v221_v43  ;;  %v417_v5 = vpack.c.bf16 %v409_v3, %v408_v2  ;;  %v5899_v6 = vmov 0  }
  0x9f   :  { %v222_v49 = vpack.c.bf16 %v216_v48, %v215_v47  ;;  %566 = vmatpush1.bf16.msra.mxu0 %v546_v60  ;;  %5528 = vset.pattern.permute.xlu1 %v5899_v6 }
  0xa0   :  { %v6041_v50 = vpop.xlane.xlu0 %182  ;;  %v6043_v51 = vpop.xlane.xlu1 %185  ;;  %5119 = vmatprep.subr.bf16.mxu0 %v5891_v0  ;;  %5529 = vset.pattern.permute.xlu0 %v5899_v6 }
  0xa1   :  { %vm193_vm5 = vcmp.gt.f32.partialorder %v6041_v50, 0.0  ;;  %vm194_vm6 = vcmp.gt.f32.partialorder %v6043_v51, 0.0  ;;  %5109 = vmatprep.mubr.msk.bf16.mxu0 %vm162_vm0, %v222_v49  ;;  %v4811_v49 = vsel %vm191_vm3, 1.0, %v5891_v0  ;;  %v4812_v50 = vsel %vm192_vm4, 1.0, %v5891_v0 }
  0xa2   :  { %v217_v52 = vsel %vm193_vm5, 0.0, %v5971_v13  ;;  %v218_v53 = vsel %vm194_vm6, 0.0, %v5973_v14  ;;  %v652_v13 = vld [vmem:[%s4778_s3] sm:$0xff]  ;;  %v4813_v38 = vsel %vm193_vm5, 1.0, %v5891_v0  ;;  %v4814_v47 = vsel %vm194_vm6, 1.0, %v5891_v0  ;;  %s4783_s3 = sld [smem:[%s7229_s0 + %s5909_s30]]   ;;  %s5916_s30 = smov 22  }
  0xa3   :  { %v223_v54 = vpack.c.bf16 %v218_v53, %v217_v52  ;;  %v4831_v14 = vcombine.high %v652_v13, %v652_v13  ;;  %v4830_v41 = vcombine.low %v652_v13, %v652_v13  ;;  %v326_v58 = vsub.f32 1.0, %v4813_v38  ;;  %v624_v38 = vld [vmem:[%s4779_s23] sm:$0x3]  ;;  %s4787_s23 = sld [smem:[%s7229_s0 + %s5914_s20]]  }
  0xa4   :  { %v6054_v55 = vpop.xlane.xlu0 %341  ;;  %v327_v51 = vsub.f32 1.0, %v4814_v47  ;;  %v324_v61 = vsub.f32 1.0, %v4811_v49  ;;  %s4794_s20 = sld [smem:[%s7229_s0 + %s5921_s17]]   ;;  %vm4753_vm3 = vcmask 1047559  }
  0xa5   :  { %vm343_vm7 = vcmp.gt.f32.partialorder %v6054_v55, 0.0 }
  0xa6   :  { %v346_v56 = vsel %vm343_vm7, 0.0, %v5983_v19  ;;  %5110 = vmatmul.mubr.msk.bf16.gmra.mxu0 %vm162_vm0, %v223_v54  ;;  %vm444_vm0 = vcmask 1043456   ;;  %v6116_v19 = vld [vmem:[%s6101_s7] sm:$0xff]   ;;  %v4817_v11 = vsel %vm343_vm7, 1.0, %v5891_v0 }
  0xa7   :  { %v348_v57 = vpack.c.bf16 %v346_v56, %v346_v56  ;;  %4820 = vmatprep.subr.msk.bf16.mxu1 %vm444_vm0, %v4819_v63  ;;  %v446_v4 = vsel %vm444_vm0, %v4818_v1, 0  ;;  %583 = vmatprep.mubr.bf16.mxu0 %v5899_v6  ;;  %v663_v56 = vsel %vm444_vm0, %v4830_v41, 0  ;;  %v325_v63 = vsub.f32 1.0, %v4812_v50 }
  0xa8   :  { %v406_v13 = vsub.f32 1.0, %v4817_v11  ;;  %v626_v41 = vlaneseq }
  0xa9   :  { %5116 = vmatmul.mubr.msk.bf16.vlgmr.msra.gmra.mxu1 %vm339_vm10, %v348_v57 }
  0xaa   :  { %466 = vmatpush1.bf16.msra.mxu1 %v446_v4  ;;  %483 = vmatprep.mubr.bf16.mxu1 %v5899_v6 }
  0xab   :  { %4832 = vmatprep.subr.msk.bf16.mxu1 %vm444_vm0, %v4831_v14 }
  0xae   :  { %4826 = vmatmul.mubr.msk.bf16.vlgmr.msra.gmra.mxu0 %vm339_vm10, %v417_v5 }
  0xaf   :  { %593 = vmatprep.mubr.bf16.mxu0 %v5899_v6  ;;  %5120 = vmatpush3.bf16.msra.mxu0 %v6107_v18 }
  0xb0   :  { %5121 = vmatprep.subr.bf16.mxu0 %v5891_v0 }
  0xb3   :  { %5122 = vmatpush3.bf16.msra.mxu0 %v6116_v19 }
  0xb4   :  { %5135 = vmatprep.subr.bf16.mxu0 %v5891_v0 }
  0xb6   :  { %4827 = vmatmul.mubr.msk.bf16.gmra.mxu0 %vm339_vm10, %v418_v9 }
  0xb7   :  { %603 = vmatprep.mubr.bf16.mxu0 %v5899_v6 }
  0xbe   :  { %4828 = vmatmul.mubr.msk.bf16.gmra.mxu0 %vm339_vm10, %v419_v12 }
  0xbf   :  { %613 = vmatprep.mubr.bf16.mxu0 %v5899_v6 }
  0xc6   :  { %4829 = vmatmul.mubr.msk.bf16.gmra.mxu0 %vm339_vm10, %v420_v17  ;;  %v6192_v17 = vld [vmem:[%s6112_s11] sm:$0xff]   ;;  %s6566_s11 = sld [smem:[%s7229_s0 + %s5911_s8]]  }
  0xc7   :  { %5123 = vmatprep.mubr.msk.bf16.mxu0 %vm5896_vm13, %v5891_v0  ;;  %s6941_s8 = sld [smem:[%s7229_s0 + %s5918_s5]]   ;;  %s5924_s5 = smov 27  }
  0xce   :  { %5124 = vmatmul.mubr.bf16.vlgmr.msra.gmra.mxu0 %v5899_v6 }
  0xcf   :  { %5136 = vmatpush3.bf16.msra.mxu0 %v6107_v18  ;;  %5139 = vmatprep.mubr.msk.bf16.mxu0 %vm5896_vm13, %v5891_v0 }
  0xd0   :  { %5137 = vmatprep.subr.bf16.mxu0 %v5891_v0 }
  0xd3   :  { %5138 = vmatpush3.bf16.msra.mxu0 %v6116_v19 }
  0xd4   :  { %5151 = vmatprep.subr.bf16.mxu0 %v5891_v0 }
 0x15e   :  { %v5107_v20 = vpop.f32.mrf.mxu0 }
 0x15f   :  { %v290_v27 = vadd.f32 %v5107_v20, %v4802_v21 }
 0x160   :  { %v281_v24 = vpop.f32.mrf.mxu0 }
 0x161   :  { %v282_v31 = vadd.f32 %v4802_v21, %v281_v24  ;;  %v330_v37 = vmul.f32 %v322_v29, %v290_v27 }
 0x162   :  { %v5108_v28 = vpop.f32.mrf.mxu0 }
 0x163   :  { %v293_v32 = vadd.f32 %v5108_v28, %v4802_v21  ;;  %v328_v36 = vmul.f32 %v320_v33, %v282_v31 }
 0x164   :  { %v284_v35 = vpop.f32.mrf.mxu0 }
 0x165   :  { %v331_v39 = vmul.f32 %v323_v30, %v293_v32  ;;  %v285_v40 = vadd.f32 %v4802_v21, %v284_v35 }
 0x166   :  { %v5111_v42 = vpop.f32.mrf.mxu0 }
 0x167   :  { %v6143_v43 = vpack.c.bf16 %v331_v39, %v330_v37  ;;  %v329_v44 = vmul.f32 %v321_v34, %v285_v40  ;;  %v306_v53 = vadd.f32 %v5111_v42, %v4802_v21  ;;  %v6212_v42 = vshrl.u32 %v626_v41, 7 }
 0x168   :  { %v297_v48 = vpop.f32.mrf.mxu0 }
 0x169   :  { %v6154_v52 = vpack.c.bf16 %v329_v44, %v328_v36  ;;  %v399_v54 = vpop.f32.mrf.mxu1  ;;  %v298_v59 = vadd.f32 %v4802_v21, %v297_v48  ;;  %v334_v1 = vmul.f32 %v326_v58, %v306_v53  ;;  %v632_v36 = vsub.s32 1, %v6212_v42 }
 0x16a   :  { %v5112_v57 = vpop.f32.mrf.mxu0  ;;  %v400_v12 = vadd.f32 %v4815_v10, %v399_v54  ;;  %v628_v47 = vsub.s32 0, %v6212_v42 }
 0x16b   :  { %v309_v60 = vadd.f32 %v5112_v57, %v4802_v21  ;;  %4821 = vmatmul.mubr.msk.bf16.vlgmr.msra.gmra.mxu1 %vm431_vm8, %v6154_v52  ;;  %v5117_v45 = vpop.f32.mrf.mxu1  ;;  %v332_v4 = vmul.f32 %v324_v61, %v298_v59  ;;  %v633_v48 = vrot.slane %v624_v38, %v632_v36 }
 0x16c   :  { %683 = vmatpush1.bf16.msra.mxu1 %v663_v56  ;;  %v300_v62 = vpop.f32.mrf.mxu0  ;;  %493 = vmatprep.mubr.bf16.mxu1 %v5899_v6  ;;  %v407_v14 = vmul.f32 %v406_v13, %v400_v12  ;;  %v629_v56 = vrot.slane %v624_v38, %v628_v47 }
 0x16d   :  { %v335_v2 = vmul.f32 %v327_v51, %v309_v60  ;;  %v301_v3 = vadd.f32 %v4802_v21, %v300_v62  ;;  %v402_v46 = vpop.f32.mrf.mxu1  ;;  %5127 = vmatprep.subr.bf16.mxu1 %v5891_v0 }
 0x16e   :  { %v6186_v16 = vpack.c.bf16 %v407_v14, %v407_v14  ;;  %v585_v55 = vpop.f32.mrf.mxu0 }
 0x16f   :  { %v6164_v5 = vpack.c.bf16 %v335_v2, %v334_v1  ;;  %v333_v7 = vmul.f32 %v325_v63, %v301_v3  ;;  %v5118_v8 = vpop.f32.mrf.mxu1 }
 0x170   :  { %v587_v20 = vpop.f32.mrf.mxu0 }
 0x171   :  { %v6166_v9 = vpack.c.bf16 %v333_v7, %v332_v4 }
 0x172   :  { %v589_v21 = vpop.f32.mrf.mxu0 }
 0x173   :  { %4822 = vmatmul.mubr.msk.bf16.gmra.mxu1 %vm431_vm8, %v6143_v43 }
 0x174   :  { %503 = vmatprep.mubr.bf16.mxu1 %v5899_v6  ;;  %v591_v22 = vpop.f32.mrf.mxu0 }
 0x176   :  { %v595_v23 = vpop.f32.mrf.mxu0 }
 0x178   :  { %v597_v24 = vpop.f32.mrf.mxu0 }
 0x17a   :  { %v599_v25 = vpop.f32.mrf.mxu0 }
 0x17b   :  { %4823 = vmatmul.mubr.msk.bf16.gmra.mxu1 %vm431_vm8, %v6166_v9 }
 0x17c   :  { %513 = vmatprep.mubr.bf16.mxu1 %v5899_v6  ;;  %v601_v26 = vpop.f32.mrf.mxu0 }
 0x17e   :  { %v605_v27 = vpop.f32.mrf.mxu0 }
 0x180   :  { %v607_v28 = vpop.f32.mrf.mxu0 }
 0x182   :  { %v609_v29 = vpop.f32.mrf.mxu0 }
 0x183   :  { %4824 = vmatmul.mubr.msk.bf16.gmra.mxu1 %vm431_vm8, %v6164_v5 }
 0x184   :  { %700 = vmatprep.mubr.bf16.mxu1 %v5899_v6  ;;  %v611_v30 = vpop.f32.mrf.mxu0 }
 0x186   :  { %v615_v31 = vpop.f32.mrf.mxu0 }
 0x188   :  { %v617_v32 = vpop.f32.mrf.mxu0 }
 0x18a   :  { %v619_v33 = vpop.f32.mrf.mxu0 }
 0x18b   :  { %4833 = vmatmul.mubr.msk.bf16.vlgmr.msra.gmra.mxu1 %vm431_vm8, %v6186_v16 }
 0x18c   :  { %5128 = vmatpush3.bf16.msra.mxu1 %v6184_v15  ;;  %5131 = vmatprep.mubr.msk.bf16.mxu1 %vm5896_vm13, %v5891_v0  ;;  %v621_v34 = vpop.f32.mrf.mxu0 }
 0x18d   :  { %5129 = vmatprep.subr.bf16.mxu1 %v5891_v0 }
 0x18e   :  { %v6206_v35 = vpop.f32.mrf.mxu0 }
 0x190   :  { %5130 = vmatpush3.bf16.msra.mxu1 %v6192_v17  ;;  %v5125_v37 = vpop.f32.mrf.mxu0 }
 0x191   :  { %5143 = vmatprep.subr.bf16.mxu1 %v5891_v0 }
 0x192   :  { %v803_v39 = vpop.f32.mrf.mxu0 }
 0x193   :  { %5132 = vmatmul.mubr.bf16.vlgmr.msra.gmra.mxu1 %v5899_v6 }
 0x194   :  { %5144 = vmatpush3.bf16.msra.mxu1 %v6184_v15  ;;  %5147 = vmatprep.mubr.msk.bf16.mxu1 %vm5896_vm13, %v5891_v0  ;;  %v5126_v40 = vpop.f32.mrf.mxu0 }
 0x195   :  { %5145 = vmatprep.subr.bf16.mxu1 %v5891_v0 }
 0x198   :  { %5146 = vmatpush3.bf16.msra.mxu1 %v6192_v17 }
 0x199   :  { %5159 = vmatprep.subr.bf16.mxu1 %v5891_v0 }
 0x22b   :  { %v485_v44 = vpop.f32.mrf.mxu1 }
 0x22c   :  { %v586_v40 = vadd.f32 %v585_v55, %v485_v44 }
 0x22d   :  { %v487_v49 = vpop.f32.mrf.mxu1 }
 0x22e   :  { %v588_v53 = vadd.f32 %v587_v20, %v487_v49 }
 0x22f   :  { %v489_v54 = vpop.f32.mrf.mxu1 }
 0x230   :  { %v637_v50 = vadd.f32 %v633_v48, %v588_v53  ;;  %v590_v57 = vadd.f32 %v589_v21, %v489_v54 }
 0x231   :  { %v491_v58 = vpop.f32.mrf.mxu1 }
 0x232   :  { %v638_v51 = vadd.f32 %v629_v56, %v590_v57  ;;  %v592_v49 = vadd.f32 %v591_v22, %v491_v58 }
 0x233   :  { %v495_v59 = vpop.f32.mrf.mxu1 }
 0x234   :  { %v596_v60 = vadd.f32 %v595_v23, %v495_v59 }
 0x235   :  { %v497_v45 = vpop.f32.mrf.mxu1 }
 0x236   :  { %v640_v61 = vadd.f32 %v629_v56, %v596_v60  ;;  %v598_v62 = vadd.f32 %v597_v24, %v497_v45  ;;  %v636_v60 = vadd.f32 %v629_v56, %v586_v40 }
 0x237   :  { %v499_v63 = vpop.f32.mrf.mxu1 }
 0x238   :  { %v641_v1 = vadd.f32 %v633_v48, %v598_v62  ;;  %v600_v2 = vadd.f32 %v599_v25, %v499_v63  ;;  %v639_v62 = vadd.f32 %v633_v48, %v592_v49 }
 0x239   :  { %v501_v3 = vpop.f32.mrf.mxu1 }
 0x23a   :  { %v642_v46 = vadd.f32 %v629_v56, %v600_v2  ;;  %v602_v25 = vadd.f32 %v601_v26, %v501_v3 }
 0x23b   :  { %v505_v4 = vpop.f32.mrf.mxu1 }
 0x23c   :  { %v606_v7 = vadd.f32 %v605_v27, %v505_v4 }
 0x23d   :  { %v507_v8 = vpop.f32.mrf.mxu1 }
 0x23e   :  { %v644_v10 = vadd.f32 %v629_v56, %v606_v7  ;;  %v608_v11 = vadd.f32 %v607_v28, %v507_v8 }
 0x23f   :  { %v509_v12 = vpop.f32.mrf.mxu1 }
 0x240   :  { %v645_v13 = vadd.f32 %v633_v48, %v608_v11  ;;  %v610_v14 = vadd.f32 %v609_v29, %v509_v12  ;;  %v643_v29 = vadd.f32 %v633_v48, %v602_v25 }
 0x241   :  { %v511_v20 = vpop.f32.mrf.mxu1 }
 0x242   :  { %v646_v21 = vadd.f32 %v629_v56, %v610_v14  ;;  %v612_v54 = vadd.f32 %v611_v30, %v511_v20 }
 0x243   :  { %v515_v37 = vpop.f32.mrf.mxu1 }
 0x244   :  { %v616_v23 = vadd.f32 %v615_v31, %v515_v37  ;;  %v647_v2 = vadd.f32 %v633_v48, %v612_v54 }
 0x245   :  { %v517_v39 = vpop.f32.mrf.mxu1 }
 0x246   :  { %v648_v24 = vadd.f32 %v629_v56, %v616_v23  ;;  %v618_v38 = vadd.f32 %v617_v32, %v517_v39 }
 0x247   :  { %v519_v53 = vpop.f32.mrf.mxu1 }
 0x248   :  { %v649_v57 = vadd.f32 %v633_v48, %v618_v38  ;;  %v620_v27 = vadd.f32 %v619_v33, %v519_v53 }
 0x249   :  { %v521_v59 = vpop.f32.mrf.mxu1 }
 0x24a   :  { %v650_v28 = vadd.f32 %v629_v56, %v620_v27  ;;  %v622_v45 = vadd.f32 %v621_v34, %v521_v59 }
 0x24b   :  { %v702_v63 = vpop.f32.mrf.mxu1 }
 0x24c   :  { %v709_v4 = vadd.f32 %v702_v63, %v636_v60  ;;  %v6220_v31 = vadd.f32 %v702_v63, %v638_v51  ;;  %v6222_v55 = vadd.f32 %v702_v63, %v640_v61  ;;  %v6224_v22 = vadd.f32 %v702_v63, %v642_v46 }
 0x24d   :  { %v704_v32 = vpop.f32.mrf.mxu1  ;;  %v6226_v26 = vadd.f32 %v702_v63, %v644_v10  ;;  %v6228_v30 = vadd.f32 %v702_v63, %v646_v21  ;;  %v6230_v33 = vadd.f32 %v702_v63, %v648_v24  ;;  %v651_v44 = vadd.f32 %v633_v48, %v622_v45 }
 0x24e   :  { %v806_v34 = vadd.f32 %v6206_v35, %v709_v4  ;;  %v6233_v56 = vadd.f32 %v704_v32, %v649_v57  ;;  %v6235_v58 = vadd.f32 %v704_v32, %v647_v2  ;;  %v6237_v3 = vadd.f32 %v704_v32, %v645_v13 }
 0x24f   :  { %v706_v51 = vpop.f32.mrf.mxu1  ;;  %v6239_v61 = vadd.f32 %v704_v32, %v643_v29  ;;  %v6241_v46 = vadd.f32 %v704_v32, %v641_v1  ;;  %v6243_v7 = vadd.f32 %v704_v32, %v639_v62  ;;  %v6245_v8 = vadd.f32 %v704_v32, %v637_v50 }
 0x250   :  { %5564 = vtanh.f32 %v806_v34  ;;  %v6247_v10 = vadd.f32 %v702_v63, %v650_v28  ;;  %v724_v35 = vadd.f32 %v704_v32, %v651_v44  ;;  %v4838_v50 = vmul.f32 -1.442695, %v806_v34 }
 0x251   :  { %v707_v48 = vpop.f32.mrf.mxu1 }
 0x253   :  { %v855_v11 = vpop.f32.mrf.mxu1 }
 0x254   :  { %v861_v12 = vadd.f32 %v855_v11, %v724_v35 }
 0x255   :  { %v5133_v14 = vpop.f32.mrf.mxu1 }
 0x256   :  { %5566 = vtanh.f32 %v861_v12  ;;  %v4839_v37 = vmul.f32 -1.442695, %v861_v12 }
 0x257   :  { %v858_v20 = vpop.f32.mrf.mxu1 }
 0x258   :  { %5568 = vpow2.f32 %v4839_v37 }
 0x259   :  { %v5134_v13 = vpop.f32.mrf.mxu1  ;;  %5570 = vpow2.f32 %v4838_v50 }
 0x25d   :  { %v5565_v21 = vpop.eup %5564 }
 0x25e   :  { %880 = vrot.lane.b32.xlu0 %v5565_v21, %s5906_s24 }
 0x263   :  { %v5567_v1 = vpop.eup %5566 }
 0x264   :  { %882 = vrot.lane.b32.xlu1 %v5567_v1, %s5906_s24 }
 0x265   :  { %v5569_v23 = vpop.eup %5568 }
 0x266   :  { %v869_v39 = vadd.f32 1.0, %v5569_v23  ;;  %v5571_v40 = vpop.eup %5570 }
 0x267   :  { %v868_v24 = vadd.f32 1.0, %v5571_v40 }
 0x268   :  { %5572 = vrcp.f32 %v869_v39 }
 0x269   :  { %5574 = vrcp.f32 %v868_v24 }
 0x275   :  { %v5573_v38 = vpop.eup %5572 }
 0x276   :  { %v5575_v54 = vpop.eup %5574  ;;  %v877_v27 = vmul.f32 0.0, %v5573_v38 }
 0x277   :  { %v876_v28 = vmul.f32 0.0, %v5575_v54 }
 0x2d0   :  { %v881_v53 = vpop.permute.xlu0 %880 }
 0x2d1   :  { %v886_v57 = vmul.f32 %v5575_v54, %v881_v53 }
 0x2d6   :  { %v883_v49 = vpop.permute.xlu1 %882 }
 0x2d7   :  { %v887_v25 = vmul.f32 %v5573_v38, %v883_v49 }
 0x2d9   :  { %892 = vrot.lane.b32.xlu1 %v887_v25, %s5906_s24 }
 0x2dd   :  { %890 = vrot.lane.b32.xlu1 %v886_v57, %s5906_s24 }
 0x34b   :  { %v893_v59 = vpop.permute.xlu1 %892 }
 0x34c   :  { %v6253_v60 = vadd.f32 %v893_v59, %v877_v27 }
 0x34e   :  { %5576 = vtanh.f32 %v6253_v60 }
 0x34f   :  { %v891_v45 = vpop.permute.xlu1 %890 }
 0x350   :  { %v6256_v62 = vadd.f32 %v891_v45, %v876_v28 }
 0x352   :  { %5578 = vtanh.f32 %v6256_v62 }
 0x35b   :  { %v5577_v29 = vpop.eup %5576 }
 0x35c   :  { %904 = vrot.lane.b32.xlu1 %v5577_v29, %s5906_s24 }
 0x35f   :  { %v5579_v63 = vpop.eup %5578 }
 0x360   :  { %902 = vrot.lane.b32.xlu0 %v5579_v63, %s5906_s24 }
 0x3ce   :  { %v905_v2 = vpop.permute.xlu1 %904 }
 0x3cf   :  { %v6261_v4 = vmul.f32 %v5573_v38, %v905_v2 }
 0x3d1   :  { %v973_v32 = vpack.c.bf16 %v6261_v4, %v6261_v4 }
 0x3d2   :  { %v903_v44 = vpop.permute.xlu0 %902 }
 0x3d3   :  { %v6265_v34 = vmul.f32 %v5575_v54, %v903_v44  ;;  %975 = vrot.lane.b32.xlu1 %v973_v32, %s5907_s25 }
 0x3d5   :  { %v923_v51 = vpack.c.bf16 %v6265_v34, %v6265_v34 }
 0x3d7   :  { %925 = vrot.lane.b32.xlu0 %v923_v51, %s5907_s25 }
 0x445   :  { %v976_v48 = vpop.permute.xlu1 %975 }
 0x446   :  { %5148 = vmatmul.mubr.msk.bf16.vlgmr.msra.gmra.mxu1 %vm762_vm9, %v976_v48 }
 0x447   :  { %5160 = vmatpush3.bf16.msra.mxu1 %v6184_v15  ;;  %5163 = vmatprep.mubr.msk.bf16.mxu1 %vm5896_vm13, %v5891_v0 }
 0x448   :  { %5161 = vmatprep.subr.bf16.mxu1 %v5891_v0 }
 0x449   :  { %v926_v35 = vpop.permute.xlu0 %925 }
 0x44a   :  { %5140 = vmatmul.mubr.msk.bf16.vlgmr.msra.gmra.mxu0 %vm762_vm9, %v926_v35 }
 0x44b   :  { %5162 = vmatpush3.bf16.msra.mxu1 %v6192_v17  ;;  %5152 = vmatpush3.bf16.msra.mxu0 %v6107_v18 }
 0x44c   :  { %5153 = vmatprep.subr.bf16.mxu0 %v5891_v0  ;;  %5155 = vmatprep.mubr.msk.bf16.mxu0 %vm5896_vm13, %v5891_v0 }
 0x44d   :  { %5175 = vmatprep.subr.bf16.mxu1 %v5891_v0 }
 0x44f   :  { %5154 = vmatpush3.bf16.msra.mxu0 %v6116_v19 }
 0x450   :  { %5167 = vmatprep.subr.bf16.mxu0 %v5891_v0 }
 0x506   :  { %v1014_v11 = vpop.f32.mrf.mxu1 }
 0x507   :  { %v1020_v12 = vadd.f32 %v1014_v11, %v6233_v56 }
 0x508   :  { %v5149_v14 = vpop.f32.mrf.mxu1 }
 0x509   :  { %5580 = vtanh.f32 %v1020_v12  ;;  %v4843_v24 = vmul.f32 -1.442695, %v1020_v12 }
 0x50a   :  { %v964_v20 = vpop.f32.mrf.mxu0  ;;  %v1017_v13 = vpop.f32.mrf.mxu1 }
 0x50b   :  { %v970_v21 = vadd.f32 %v964_v20, %v6220_v31 }
 0x50c   :  { %v5141_v1 = vpop.f32.mrf.mxu0  ;;  %v5150_v37 = vpop.f32.mrf.mxu1 }
 0x50d   :  { %5582 = vtanh.f32 %v970_v21  ;;  %v4842_v56 = vmul.f32 -1.442695, %v970_v21 }
 0x50e   :  { %v967_v50 = vpop.f32.mrf.mxu0  ;;  %5584 = vpow2.f32 %v4843_v24 }
 0x50f   :  { %5586 = vpow2.f32 %v4842_v56 }
 0x510   :  { %v5142_v23 = vpop.f32.mrf.mxu0 }
 0x516   :  { %v5581_v39 = vpop.eup %5580 }
 0x517   :  { %1041 = vrot.lane.b32.xlu1 %v5581_v39, %s5906_s24 }
 0x51a   :  { %v5583_v40 = vpop.eup %5582 }
 0x51b   :  { %1039 = vrot.lane.b32.xlu0 %v5583_v40, %s5906_s24  ;;  %v5585_v38 = vpop.eup %5584 }
 0x51c   :  { %v1028_v49 = vadd.f32 1.0, %v5585_v38  ;;  %v5587_v25 = vpop.eup %5586 }
 0x51d   :  { %v1027_v31 = vadd.f32 1.0, %v5587_v25 }
 0x51e   :  { %5588 = vrcp.f32 %v1028_v49 }
 0x51f   :  { %5590 = vrcp.f32 %v1027_v31 }
 0x52b   :  { %v5589_v53 = vpop.eup %5588 }
 0x52c   :  { %v5591_v27 = vpop.eup %5590  ;;  %v1036_v45 = vmul.f32 %v5589_v53, %v6253_v60 }
 0x52d   :  { %v1035_v2 = vmul.f32 %v5591_v27, %v6256_v62 }
 0x589   :  { %v1042_v54 = vpop.permute.xlu1 %1041 }
 0x58a   :  { %v1046_v57 = vmul.f32 %v5589_v53, %v1042_v54 }
 0x58c   :  { %1051 = vrot.lane.b32.xlu1 %v1046_v57, %s5906_s24 }
 0x58d   :  { %v1040_v59 = vpop.permute.xlu0 %1039 }
 0x58e   :  { %v1045_v28 = vmul.f32 %v5591_v27, %v1040_v59 }
 0x590   :  { %1049 = vrot.lane.b32.xlu0 %v1045_v28, %s5906_s24 }
 0x5fe   :  { %v1052_v29 = vpop.permute.xlu1 %1051 }
 0x5ff   :  { %v6292_v63 = vadd.f32 %v1052_v29, %v1036_v45 }
 0x601   :  { %5592 = vtanh.f32 %v6292_v63 }
 0x602   :  { %v1050_v32 = vpop.permute.xlu0 %1049 }
 0x603   :  { %v6296_v44 = vadd.f32 %v1050_v32, %v1035_v2 }
 0x605   :  { %5594 = vtanh.f32 %v6296_v44 }
 0x60e   :  { %v5593_v51 = vpop.eup %5592 }
 0x60f   :  { %1063 = vrot.lane.b32.xlu1 %v5593_v51, %s5906_s24 }
 0x612   :  { %v5595_v48 = vpop.eup %5594 }
 0x613   :  { %1061 = vrot.lane.b32.xlu0 %v5595_v48, %s5906_s24 }
 0x681   :  { %v1064_v35 = vpop.permute.xlu1 %1063 }
 0x682   :  { %v6301_v60 = vmul.f32 %v5589_v53, %v1064_v35 }
 0x684   :  { %v1133_v11 = vpack.c.bf16 %v6301_v60, %v6301_v60 }
 0x685   :  { %v1062_v12 = vpop.permute.xlu0 %1061 }
 0x686   :  { %v6305_v14 = vmul.f32 %v5591_v27, %v1062_v12  ;;  %1135 = vrot.lane.b32.xlu1 %v1133_v11, %s5907_s25 }
 0x688   :  { %v1083_v62 = vpack.c.bf16 %v6305_v14, %v6305_v14 }
 0x68a   :  { %1085 = vrot.lane.b32.xlu0 %v1083_v62, %s5907_s25 }
 0x6f8   :  { %v1136_v20 = vpop.permute.xlu1 %1135 }
 0x6f9   :  { %5164 = vmatmul.mubr.msk.bf16.vlgmr.msra.gmra.mxu1 %vm762_vm9, %v1136_v20 }
 0x6fa   :  { %5176 = vmatpush3.bf16.msra.mxu1 %v6184_v15  ;;  %5179 = vmatprep.mubr.msk.bf16.mxu1 %vm5896_vm13, %v5891_v0 }
 0x6fb   :  { %5177 = vmatprep.subr.bf16.mxu1 %v5891_v0 }
 0x6fc   :  { %v1086_v13 = vpop.permute.xlu0 %1085 }
 0x6fd   :  { %5156 = vmatmul.mubr.msk.bf16.vlgmr.msra.gmra.mxu0 %vm762_vm9, %v1086_v13 }
 0x6fe   :  { %5178 = vmatpush3.bf16.msra.mxu1 %v6192_v17  ;;  %5168 = vmatpush3.bf16.msra.mxu0 %v6107_v18 }
 0x6ff   :  { %5169 = vmatprep.subr.bf16.mxu0 %v5891_v0  ;;  %5171 = vmatprep.mubr.msk.bf16.mxu0 %vm5896_vm13, %v5891_v0 }
 0x700   :  { %5191 = vmatprep.subr.bf16.mxu1 %v5891_v0 }
 0x702   :  { %5170 = vmatpush3.bf16.msra.mxu0 %v6116_v19 }
 0x703   :  { %5183 = vmatprep.subr.bf16.mxu0 %v5891_v0 }
 0x7b9   :  { %v1174_v21 = vpop.f32.mrf.mxu1 }
 0x7ba   :  { %v1180_v1 = vadd.f32 %v1174_v21, %v6235_v58 }
 0x7bb   :  { %v5165_v37 = vpop.f32.mrf.mxu1 }
 0x7bc   :  { %5596 = vtanh.f32 %v1180_v1  ;;  %v4847_v31 = vmul.f32 -1.442695, %v1180_v1 }
 0x7bd   :  { %v1124_v50 = vpop.f32.mrf.mxu0  ;;  %v1177_v23 = vpop.f32.mrf.mxu1 }
 0x7be   :  { %v1130_v39 = vadd.f32 %v1124_v50, %v6222_v55 }
 0x7bf   :  { %v5157_v40 = vpop.f32.mrf.mxu0  ;;  %v5166_v24 = vpop.f32.mrf.mxu1 }
 0x7c0   :  { %5598 = vtanh.f32 %v1130_v39  ;;  %v4846_v58 = vmul.f32 -1.442695, %v1130_v39 }
 0x7c1   :  { %v1127_v56 = vpop.f32.mrf.mxu0  ;;  %5600 = vpow2.f32 %v4847_v31 }
 0x7c2   :  { %5602 = vpow2.f32 %v4846_v58 }
 0x7c3   :  { %v5158_v38 = vpop.f32.mrf.mxu0 }
 0x7c9   :  { %v5597_v49 = vpop.eup %5596 }
 0x7ca   :  { %1201 = vrot.lane.b32.xlu1 %v5597_v49, %s5906_s24 }
 0x7cd   :  { %v5599_v25 = vpop.eup %5598 }
 0x7ce   :  { %1199 = vrot.lane.b32.xlu0 %v5599_v25, %s5906_s24  ;;  %v5601_v53 = vpop.eup %5600 }
 0x7cf   :  { %v1188_v54 = vadd.f32 1.0, %v5601_v53  ;;  %v5603_v57 = vpop.eup %5602 }
 0x7d0   :  { %v1187_v55 = vadd.f32 1.0, %v5603_v57 }
 0x7d1   :  { %5604 = vrcp.f32 %v1188_v54 }
 0x7d2   :  { %5606 = vrcp.f32 %v1187_v55 }
 0x7de   :  { %v5605_v27 = vpop.eup %5604 }
 0x7df   :  { %v5607_v45 = vpop.eup %5606  ;;  %v1196_v32 = vmul.f32 %v5605_v27, %v6292_v63 }
 0x7e0   :  { %v1195_v35 = vmul.f32 %v5607_v45, %v6296_v44 }
 0x83c   :  { %v1202_v59 = vpop.permute.xlu1 %1201 }
 0x83d   :  { %v1206_v28 = vmul.f32 %v5605_v27, %v1202_v59 }
 0x83f   :  { %1211 = vrot.lane.b32.xlu1 %v1206_v28, %s5906_s24 }
 0x840   :  { %v1200_v29 = vpop.permute.xlu0 %1199 }
 0x841   :  { %v1205_v2 = vmul.f32 %v5607_v45, %v1200_v29 }
 0x843   :  { %1209 = vrot.lane.b32.xlu0 %v1205_v2, %s5906_s24 }
 0x8b1   :  { %v1212_v51 = vpop.permute.xlu1 %1211 }
 0x8b2   :  { %v6332_v48 = vadd.f32 %v1212_v51, %v1196_v32 }
 0x8b4   :  { %5608 = vtanh.f32 %v6332_v48 }
 0x8b5   :  { %v1210_v11 = vpop.permute.xlu0 %1209 }
 0x8b6   :  { %v6336_v12 = vadd.f32 %v1210_v11, %v1195_v35 }
 0x8b8   :  { %5610 = vtanh.f32 %v6336_v12 }
 0x8c1   :  { %v5609_v62 = vpop.eup %5608 }
 0x8c2   :  { %1223 = vrot.lane.b32.xlu1 %v5609_v62, %s5906_s24 }
 0x8c5   :  { %v5611_v20 = vpop.eup %5610 }
 0x8c6   :  { %1221 = vrot.lane.b32.xlu0 %v5611_v20, %s5906_s24 }
 0x934   :  { %v1224_v13 = vpop.permute.xlu1 %1223 }
 0x935   :  { %v6341_v63 = vmul.f32 %v5605_v27, %v1224_v13 }
 0x937   :  { %v1293_v21 = vpack.c.bf16 %v6341_v63, %v6341_v63 }
 0x938   :  { %v1222_v1 = vpop.permute.xlu0 %1221 }
 0x939   :  { %v6345_v37 = vmul.f32 %v5607_v45, %v1222_v1  ;;  %1295 = vrot.lane.b32.xlu1 %v1293_v21, %s5907_s25 }
 0x93b   :  { %v1243_v44 = vpack.c.bf16 %v6345_v37, %v6345_v37 }
 0x93d   :  { %1245 = vrot.lane.b32.xlu0 %v1243_v44, %s5907_s25 }
 0x9ab   :  { %v1296_v50 = vpop.permute.xlu1 %1295 }
 0x9ac   :  { %5180 = vmatmul.mubr.msk.bf16.vlgmr.msra.gmra.mxu1 %vm762_vm9, %v1296_v50 }
 0x9ad   :  { %5192 = vmatpush3.bf16.msra.mxu1 %v6184_v15  ;;  %5195 = vmatprep.mubr.msk.bf16.mxu1 %vm5896_vm13, %v5891_v0 }
 0x9ae   :  { %5193 = vmatprep.subr.bf16.mxu1 %v5891_v0 }
 0x9af   :  { %v1246_v23 = vpop.permute.xlu0 %1245 }
 0x9b0   :  { %5172 = vmatmul.mubr.msk.bf16.vlgmr.msra.gmra.mxu0 %vm762_vm9, %v1246_v23 }
 0x9b1   :  { %5194 = vmatpush3.bf16.msra.mxu1 %v6192_v17  ;;  %5184 = vmatpush3.bf16.msra.mxu0 %v6107_v18 }
 0x9b2   :  { %5185 = vmatprep.subr.bf16.mxu0 %v5891_v0  ;;  %5187 = vmatprep.mubr.msk.bf16.mxu0 %vm5896_vm13, %v5891_v0 }
 0x9b3   :  { %5207 = vmatprep.subr.bf16.mxu1 %v5891_v0 }
 0x9b5   :  { %5186 = vmatpush3.bf16.msra.mxu0 %v6116_v19 }
 0x9b6   :  { %5199 = vmatprep.subr.bf16.mxu0 %v5891_v0 }
 0xa6c   :  { %v1334_v39 = vpop.f32.mrf.mxu1 }
 0xa6d   :  { %v1340_v40 = vadd.f32 %v1334_v39, %v6237_v3 }
 0xa6e   :  { %v5181_v24 = vpop.f32.mrf.mxu1 }
 0xa6f   :  { %5612 = vtanh.f32 %v1340_v40  ;;  %v4851_v55 = vmul.f32 -1.442695, %v1340_v40 }
 0xa70   :  { %v1284_v56 = vpop.f32.mrf.mxu0  ;;  %v1337_v38 = vpop.f32.mrf.mxu1 }
 0xa71   :  { %v1290_v49 = vadd.f32 %v1284_v56, %v6224_v22 }
 0xa72   :  { %v5173_v25 = vpop.f32.mrf.mxu0  ;;  %v5182_v31 = vpop.f32.mrf.mxu1 }
 0xa73   :  { %5614 = vtanh.f32 %v1290_v49  ;;  %v4850_v3 = vmul.f32 -1.442695, %v1290_v49 }
 0xa74   :  { %v1287_v58 = vpop.f32.mrf.mxu0  ;;  %5616 = vpow2.f32 %v4851_v55 }
 0xa75   :  { %5618 = vpow2.f32 %v4850_v3 }
 0xa76   :  { %v5174_v53 = vpop.f32.mrf.mxu0 }
 0xa7c   :  { %v5613_v54 = vpop.eup %5612 }
 0xa7d   :  { %1361 = vrot.lane.b32.xlu1 %v5613_v54, %s5906_s24 }
 0xa80   :  { %v5615_v57 = vpop.eup %5614 }
 0xa81   :  { %1359 = vrot.lane.b32.xlu0 %v5615_v57, %s5906_s24  ;;  %v5617_v27 = vpop.eup %5616 }
 0xa82   :  { %v1348_v59 = vadd.f32 1.0, %v5617_v27  ;;  %v5619_v28 = vpop.eup %5618 }
 0xa83   :  { %v1347_v22 = vadd.f32 1.0, %v5619_v28 }
 0xa84   :  { %5620 = vrcp.f32 %v1348_v59 }
 0xa85   :  { %5622 = vrcp.f32 %v1347_v22 }
 0xa91   :  { %v5621_v45 = vpop.eup %5620 }
 0xa92   :  { %v5623_v32 = vpop.eup %5622  ;;  %v1356_v11 = vmul.f32 %v5621_v45, %v6332_v48 }
 0xa93   :  { %v1355_v13 = vmul.f32 %v5623_v32, %v6336_v12 }
 0xaef   :  { %v1362_v29 = vpop.permute.xlu1 %1361 }
 0xaf0   :  { %v1366_v2 = vmul.f32 %v5621_v45, %v1362_v29 }
 0xaf2   :  { %1371 = vrot.lane.b32.xlu1 %v1366_v2, %s5906_s24 }
 0xaf3   :  { %v1360_v51 = vpop.permute.xlu0 %1359 }
 0xaf4   :  { %v1365_v35 = vmul.f32 %v5623_v32, %v1360_v51 }
 0xaf6   :  { %1369 = vrot.lane.b32.xlu0 %v1365_v35, %s5906_s24 }
 0xb64   :  { %v1372_v62 = vpop.permute.xlu1 %1371 }
 0xb65   :  { %v6372_v20 = vadd.f32 %v1372_v62, %v1356_v11 }
 0xb67   :  { %5624 = vtanh.f32 %v6372_v20 }
 0xb68   :  { %v1370_v21 = vpop.permute.xlu0 %1369 }
 0xb69   :  { %v6376_v1 = vadd.f32 %v1370_v21, %v1355_v13 }
 0xb6b   :  { %5626 = vtanh.f32 %v6376_v1 }
 0xb74   :  { %v5625_v44 = vpop.eup %5624 }
 0xb75   :  { %1383 = vrot.lane.b32.xlu1 %v5625_v44, %s5906_s24 }
 0xb78   :  { %v5627_v50 = vpop.eup %5626 }
 0xb79   :  { %1381 = vrot.lane.b32.xlu0 %v5627_v50, %s5906_s24 }
 0xbe7   :  { %v1384_v23 = vpop.permute.xlu1 %1383 }
 0xbe8   :  { %v6381_v48 = vmul.f32 %v5621_v45, %v1384_v23 }
 0xbea   :  { %v1451_v39 = vpack.c.bf16 %v6381_v48, %v6381_v48 }
 0xbeb   :  { %v1382_v40 = vpop.permute.xlu0 %1381 }
 0xbec   :  { %v6385_v24 = vmul.f32 %v5623_v32, %v1382_v40  ;;  %1453 = vrot.lane.b32.xlu1 %v1451_v39, %s5907_s25 }
 0xbee   :  { %v1402_v12 = vpack.c.bf16 %v6385_v24, %v6385_v24 }
 0xbf0   :  { %1404 = vrot.lane.b32.xlu0 %v1402_v12, %s5907_s25 }
 0xc5e   :  { %v1454_v56 = vpop.permute.xlu1 %1453 }
 0xc5f   :  { %5196 = vmatmul.mubr.msk.bf16.vlgmr.msra.gmra.mxu1 %vm762_vm9, %v1454_v56 }
 0xc60   :  { %5208 = vmatpush3.bf16.msra.mxu1 %v6184_v15  ;;  %5211 = vmatprep.mubr.msk.bf16.mxu1 %vm5896_vm13, %v5891_v0 }
 0xc61   :  { %5209 = vmatprep.subr.bf16.mxu1 %v5891_v0 }
 0xc62   :  { %v1405_v38 = vpop.permute.xlu0 %1404 }
 0xc63   :  { %5188 = vmatmul.mubr.msk.bf16.vlgmr.msra.gmra.mxu0 %vm762_vm9, %v1405_v38 }
 0xc64   :  { %5210 = vmatpush3.bf16.msra.mxu1 %v6192_v17  ;;  %5200 = vmatpush3.bf16.msra.mxu0 %v6107_v18 }
 0xc65   :  { %5201 = vmatprep.subr.bf16.mxu0 %v5891_v0  ;;  %5203 = vmatprep.mubr.msk.bf16.mxu0 %vm5896_vm13, %v5891_v0 }
 0xc66   :  { %5223 = vmatprep.subr.bf16.mxu1 %v5891_v0 }
 0xc68   :  { %5202 = vmatpush3.bf16.msra.mxu0 %v6116_v19 }
 0xc69   :  { %5215 = vmatprep.subr.bf16.mxu0 %v5891_v0 }
 0xd1f   :  { %v1492_v49 = vpop.f32.mrf.mxu1 }
 0xd20   :  { %v1498_v25 = vadd.f32 %v1492_v49, %v6239_v61 }
 0xd21   :  { %v5197_v31 = vpop.f32.mrf.mxu1 }
 0xd22   :  { %5628 = vtanh.f32 %v1498_v25  ;;  %v4855_v59 = vmul.f32 -1.442695, %v1498_v25 }
 0xd23   :  { %v1443_v58 = vpop.f32.mrf.mxu0  ;;  %v1495_v53 = vpop.f32.mrf.mxu1 }
 0xd24   :  { %v1449_v18 = vadd.f32 %v1443_v58, %v6226_v26  ;;  %v6439_v58 = vld [vmem:[%s6101_s7 + $0x8] sm:$0xff]   ;;  %v6447_v53 = vld [vmem:[%s6101_s7] sm:$0xff]   ;;  %s6561_s7 = sld [smem:[%s7229_s0 + %s5910_s4]]   ;;  %s5917_s4 = smov 96  }
 0xd25   :  { %v5189_v54 = vpop.f32.mrf.mxu0  ;;  %v5198_v57 = vpop.f32.mrf.mxu1 }
 0xd26   :  { %5630 = vtanh.f32 %v1449_v18  ;;  %v4854_v61 = vmul.f32 -1.442695, %v1449_v18 }
 0xd27   :  { %v1446_v55 = vpop.f32.mrf.mxu0  ;;  %5632 = vpow2.f32 %v4855_v59 }
 0xd28   :  { %5634 = vpow2.f32 %v4854_v61 }
 0xd29   :  { %v5190_v3 = vpop.f32.mrf.mxu0 }
 0xd2f   :  { %v5629_v27 = vpop.eup %5628 }
 0xd30   :  { %1519 = vrot.lane.b32.xlu1 %v5629_v27, %s5906_s24 }
 0xd33   :  { %v5631_v19 = vpop.eup %5630 }
 0xd34   :  { %1517 = vrot.lane.b32.xlu0 %v5631_v19, %s5906_s24  ;;  %v5633_v28 = vpop.eup %5632 }
 0xd35   :  { %v1506_v22 = vadd.f32 1.0, %v5633_v28  ;;  %v5635_v45 = vpop.eup %5634 }
 0xd36   :  { %v1505_v26 = vadd.f32 1.0, %v5635_v45 }
 0xd37   :  { %5636 = vrcp.f32 %v1506_v22 }
 0xd38   :  { %5638 = vrcp.f32 %v1505_v26 }
 0xd44   :  { %v5637_v29 = vpop.eup %5636 }
 0xd45   :  { %v5639_v51 = vpop.eup %5638  ;;  %v1514_v62 = vmul.f32 %v5637_v29, %v6372_v20 }
 0xd46   :  { %v1513_v44 = vmul.f32 %v5639_v51, %v6376_v1 }
 0xda2   :  { %v1520_v2 = vpop.permute.xlu1 %1519 }
 0xda3   :  { %v1524_v32 = vmul.f32 %v5637_v29, %v1520_v2 }
 0xda5   :  { %1529 = vrot.lane.b32.xlu1 %v1524_v32, %s5906_s24 }
 0xda6   :  { %v1518_v35 = vpop.permute.xlu0 %1517 }
 0xda7   :  { %v1523_v11 = vmul.f32 %v5639_v51, %v1518_v35 }
 0xda9   :  { %1527 = vrot.lane.b32.xlu0 %v1523_v11, %s5906_s24 }
 0xe17   :  { %v1530_v13 = vpop.permute.xlu1 %1529 }
 0xe18   :  { %v6412_v21 = vadd.f32 %v1530_v13, %v1514_v62 }
 0xe1a   :  { %5640 = vtanh.f32 %v6412_v21 }
 0xe1b   :  { %v1528_v50 = vpop.permute.xlu0 %1527 }
 0xe1c   :  { %v6416_v23 = vadd.f32 %v1528_v50, %v1513_v44 }
 0xe1e   :  { %5642 = vtanh.f32 %v6416_v23 }
 0xe27   :  { %v5641_v39 = vpop.eup %5640 }
 0xe28   :  { %1541 = vrot.lane.b32.xlu1 %v5641_v39, %s5906_s24 }
 0xe2b   :  { %v5643_v40 = vpop.eup %5642 }
 0xe2c   :  { %1539 = vrot.lane.b32.xlu0 %v5643_v40, %s5906_s24 }
 0xe9a   :  { %v1542_v12 = vpop.permute.xlu1 %1541 }
 0xe9b   :  { %v6421_v20 = vmul.f32 %v5637_v29, %v1542_v12 }
 0xe9d   :  { %v1609_v56 = vpack.c.bf16 %v6421_v20, %v6421_v20 }
 0xe9e   :  { %v1540_v38 = vpop.permute.xlu0 %1539 }
 0xe9f   :  { %v6425_v1 = vmul.f32 %v5639_v51, %v1540_v38  ;;  %1611 = vrot.lane.b32.xlu1 %v1609_v56, %s5907_s25 }
 0xea1   :  { %v1560_v49 = vpack.c.bf16 %v6425_v1, %v6425_v1 }
 0xea3   :  { %1562 = vrot.lane.b32.xlu0 %v1560_v49, %s5907_s25 }
 0xf11   :  { %v1612_v25 = vpop.permute.xlu1 %1611 }
 0xf12   :  { %5212 = vmatmul.mubr.msk.bf16.vlgmr.msra.gmra.mxu1 %vm762_vm9, %v1612_v25 }
 0xf13   :  { %5224 = vmatpush3.bf16.msra.mxu1 %v6184_v15  ;;  %5227 = vmatprep.mubr.msk.bf16.mxu1 %vm5896_vm13, %v5891_v0 }
 0xf14   :  { %5225 = vmatprep.subr.bf16.mxu1 %v5891_v0 }
 0xf15   :  { %v1563_v31 = vpop.permute.xlu0 %1562 }
 0xf16   :  { %5204 = vmatmul.mubr.msk.bf16.vlgmr.msra.gmra.mxu0 %vm762_vm9, %v1563_v31 }
 0xf17   :  { %5226 = vmatpush3.bf16.msra.mxu1 %v6192_v17  ;;  %5216 = vmatpush3.bf16.msra.mxu0 %v6439_v58 }
 0xf18   :  { %5217 = vmatprep.subr.bf16.mxu0 %v5891_v0  ;;  %5219 = vmatprep.mubr.msk.bf16.mxu0 %vm5896_vm13, %v5891_v0 }
 0xf19   :  { %5239 = vmatprep.subr.bf16.mxu1 %v5891_v0 }
 0xf1b   :  { %5218 = vmatpush3.bf16.msra.mxu0 %v6447_v53 }
 0xf1c   :  { %5231 = vmatprep.subr.bf16.mxu0 %v5891_v0 }
 0xfd2   :  { %v1650_v18 = vpop.f32.mrf.mxu1 }
 0xfd3   :  { %v1656_v54 = vadd.f32 %v1650_v18, %v6241_v46 }
 0xfd4   :  { %v5213_v57 = vpop.f32.mrf.mxu1 }
 0xfd5   :  { %5644 = vtanh.f32 %v1656_v54  ;;  %v4859_v26 = vmul.f32 -1.442695, %v1656_v54 }
 0xfd6   :  { %v1601_v55 = vpop.f32.mrf.mxu0  ;;  %v1653_v3 = vpop.f32.mrf.mxu1 }
 0xfd7   :  { %v1607_v27 = vadd.f32 %v1601_v55, %v6228_v30 }
 0xfd8   :  { %v5205_v19 = vpop.f32.mrf.mxu0  ;;  %v5214_v59 = vpop.f32.mrf.mxu1 }
 0xfd9   :  { %5646 = vtanh.f32 %v1607_v27  ;;  %v4858_v46 = vmul.f32 -1.442695, %v1607_v27 }
 0xfda   :  { %v1604_v61 = vpop.f32.mrf.mxu0  ;;  %5648 = vpow2.f32 %v4859_v26 }
 0xfdb   :  { %5650 = vpow2.f32 %v4858_v46 }
 0xfdc   :  { %v5206_v28 = vpop.f32.mrf.mxu0 }
 0xfe2   :  { %v5645_v22 = vpop.eup %5644 }
 0xfe3   :  { %1677 = vrot.lane.b32.xlu1 %v5645_v22, %s5906_s24 }
 0xfe6   :  { %v5647_v45 = vpop.eup %5646 }
 0xfe7   :  { %1675 = vrot.lane.b32.xlu0 %v5647_v45, %s5906_s24  ;;  %v5649_v29 = vpop.eup %5648 }
 0xfe8   :  { %v1664_v2 = vadd.f32 1.0, %v5649_v29  ;;  %v5651_v32 = vpop.eup %5650 }
 0xfe9   :  { %v1663_v30 = vadd.f32 1.0, %v5651_v32 }
 0xfea   :  { %5652 = vrcp.f32 %v1664_v2 }
 0xfeb   :  { %5654 = vrcp.f32 %v1663_v30 }
 0xff7   :  { %v5653_v51 = vpop.eup %5652 }
 0xff8   :  { %v5655_v62 = vpop.eup %5654  ;;  %v1672_v50 = vmul.f32 %v5653_v51, %v6412_v21 }
 0xff9   :  { %v1671_v12 = vmul.f32 %v5655_v62, %v6416_v23 }
0x1055   :  { %v1678_v35 = vpop.permute.xlu1 %1677 }
0x1056   :  { %v1682_v11 = vmul.f32 %v5653_v51, %v1678_v35 }
0x1058   :  { %1687 = vrot.lane.b32.xlu1 %v1682_v11, %s5906_s24 }
0x1059   :  { %v1676_v13 = vpop.permute.xlu0 %1675 }
0x105a   :  { %v1681_v44 = vmul.f32 %v5655_v62, %v1676_v13 }
0x105c   :  { %1685 = vrot.lane.b32.xlu0 %v1681_v44, %s5906_s24 }
0x10ca   :  { %v1688_v39 = vpop.permute.xlu1 %1687 }
0x10cb   :  { %v6458_v40 = vadd.f32 %v1688_v39, %v1672_v50 }
0x10cd   :  { %5656 = vtanh.f32 %v6458_v40 }
0x10ce   :  { %v1686_v56 = vpop.permute.xlu0 %1685 }
0x10cf   :  { %v6462_v38 = vadd.f32 %v1686_v56, %v1671_v12 }
0x10d1   :  { %5658 = vtanh.f32 %v6462_v38 }
0x10da   :  { %v5657_v49 = vpop.eup %5656 }
0x10db   :  { %1699 = vrot.lane.b32.xlu1 %v5657_v49, %s5906_s24 }
0x10de   :  { %v5659_v25 = vpop.eup %5658 }
0x10df   :  { %1697 = vrot.lane.b32.xlu0 %v5659_v25, %s5906_s24 }
0x114d   :  { %v1700_v31 = vpop.permute.xlu1 %1699 }
0x114e   :  { %v6467_v21 = vmul.f32 %v5653_v51, %v1700_v31 }
0x1150   :  { %v1767_v18 = vpack.c.bf16 %v6467_v21, %v6467_v21 }
0x1151   :  { %v1698_v54 = vpop.permute.xlu0 %1697 }
0x1152   :  { %v6471_v57 = vmul.f32 %v5655_v62, %v1698_v54  ;;  %1769 = vrot.lane.b32.xlu1 %v1767_v18, %s5907_s25 }
0x1154   :  { %v1718_v23 = vpack.c.bf16 %v6471_v57, %v6471_v57 }
0x1156   :  { %1720 = vrot.lane.b32.xlu0 %v1718_v23, %s5907_s25 }
0x11c4   :  { %v1770_v55 = vpop.permute.xlu1 %1769 }
0x11c5   :  { %5228 = vmatmul.mubr.msk.bf16.vlgmr.msra.gmra.mxu1 %vm762_vm9, %v1770_v55 }
0x11c6   :  { %5240 = vmatpush3.bf16.msra.mxu1 %v6184_v15  ;;  %5243 = vmatprep.mubr.msk.bf16.mxu1 %vm5896_vm13, %v5891_v0 }
0x11c7   :  { %5241 = vmatprep.subr.bf16.mxu1 %v5891_v0 }
0x11c8   :  { %v1721_v3 = vpop.permute.xlu0 %1720 }
0x11c9   :  { %5220 = vmatmul.mubr.msk.bf16.vlgmr.msra.gmra.mxu0 %vm762_vm9, %v1721_v3 }
0x11ca   :  { %5242 = vmatpush3.bf16.msra.mxu1 %v6192_v17  ;;  %5232 = vmatpush3.bf16.msra.mxu0 %v6439_v58 }
0x11cb   :  { %5233 = vmatprep.subr.bf16.mxu0 %v5891_v0  ;;  %5235 = vmatprep.mubr.msk.bf16.mxu0 %vm5896_vm13, %v5891_v0 }
0x11ce   :  { %5234 = vmatpush3.bf16.msra.mxu0 %v6447_v53 }
0x1285   :  { %v1808_v15 = vpop.f32.mrf.mxu1 }
0x1286   :  { %v1814_v27 = vadd.f32 %v1808_v15, %v6243_v7 }
0x1287   :  { %v5229_v19 = vpop.f32.mrf.mxu1 }
0x1288   :  { %5660 = vtanh.f32 %v1814_v27  ;;  %v4863_v53 = vmul.f32 -1.442695, %v1814_v27 }
0x1289   :  { %v1759_v59 = vpop.f32.mrf.mxu0  ;;  %v1811_v61 = vpop.f32.mrf.mxu1 }
0x128a   :  { %v1765_v28 = vadd.f32 %v1759_v59, %v6230_v33 }
0x128b   :  { %v5221_v22 = vpop.f32.mrf.mxu0  ;;  %v5230_v17 = vpop.f32.mrf.mxu1 }
0x128c   :  { %5662 = vtanh.f32 %v1765_v28  ;;  %v4862_v7 = vmul.f32 -1.442695, %v1765_v28 }
0x128d   :  { %v1762_v58 = vpop.f32.mrf.mxu0  ;;  %5664 = vpow2.f32 %v4863_v53 }
0x128e   :  { %5666 = vpow2.f32 %v4862_v7 }
0x128f   :  { %v5222_v45 = vpop.f32.mrf.mxu0 }
0x1295   :  { %v5661_v26 = vpop.eup %5660 }
0x1296   :  { %1835 = vrot.lane.b32.xlu1 %v5661_v26, %s5906_s24 }
0x1299   :  { %v5663_v46 = vpop.eup %5662 }
0x129a   :  { %1833 = vrot.lane.b32.xlu0 %v5663_v46, %s5906_s24  ;;  %v5665_v29 = vpop.eup %5664 }
0x129b   :  { %v1822_v2 = vadd.f32 1.0, %v5665_v29  ;;  %v5667_v32 = vpop.eup %5666 }
0x129c   :  { %v1821_v33 = vadd.f32 1.0, %v5667_v32 }
0x129d   :  { %5668 = vrcp.f32 %v1822_v2 }
0x129e   :  { %5670 = vrcp.f32 %v1821_v33 }
0x12aa   :  { %v5669_v30 = vpop.eup %5668 }
0x12ab   :  { %v5671_v11 = vpop.eup %5670  ;;  %v1830_v44 = vmul.f32 %v5669_v30, %v6458_v40 }
0x12ac   :  { %v1829_v12 = vmul.f32 %v5671_v11, %v6462_v38 }
0x1308   :  { %v1836_v51 = vpop.permute.xlu1 %1835 }
0x1309   :  { %v1840_v35 = vmul.f32 %v5669_v30, %v1836_v51 }
0x130b   :  { %1845 = vrot.lane.b32.xlu1 %v1840_v35, %s5906_s24 }
0x130c   :  { %v1834_v62 = vpop.permute.xlu0 %1833 }
0x130d   :  { %v1839_v13 = vmul.f32 %v5671_v11, %v1834_v62 }
0x130f   :  { %1843 = vrot.lane.b32.xlu0 %v1839_v13, %s5906_s24 }
0x137d   :  { %v1846_v50 = vpop.permute.xlu1 %1845 }
0x137e   :  { %v1850_v39 = vadd.f32 %v1846_v50, %v1830_v44 }
0x1380   :  { %5672 = vtanh.f32 %v1850_v39 }
0x1381   :  { %v1844_v56 = vpop.permute.xlu0 %1843 }
0x1382   :  { %v1849_v49 = vadd.f32 %v1844_v56, %v1829_v12 }
0x1384   :  { %5674 = vtanh.f32 %v1849_v49 }
0x138d   :  { %v5673_v25 = vpop.eup %5672 }
0x138e   :  { %1857 = vrot.lane.b32.xlu1 %v5673_v25, %s5906_s24 }
0x1391   :  { %v5675_v31 = vpop.eup %5674 }
0x1392   :  { %1855 = vrot.lane.b32.xlu0 %v5675_v31, %s5906_s24 }
0x1400   :  { %v1858_v18 = vpop.permute.xlu1 %1857 }
0x1401   :  { %v6499_v54 = vmul.f32 %v5669_v30, %v1858_v18  ;;  %v5538_v18 = vld [vmem:[%s4782_s29 + $0x10] ss:$8 sps:$4 sm:$0xff]  }
0x1403   :  { %v1925_v40 = vpack.c.bf16 %v6499_v54, %v6499_v54 }
0x1404   :  { %v1856_v23 = vpop.permute.xlu0 %1855 }
0x1405   :  { %v6503_v55 = vmul.f32 %v5671_v11, %v1856_v23  ;;  %1927 = vrot.lane.b32.xlu1 %v1925_v40, %s5907_s25  ;;  %v5543_v40 = vld [vmem:[%s4782_s29 + $0x4] ss:$8 sps:$4 sm:$0xff]  }
0x1407   :  { %v1876_v38 = vpack.c.bf16 %v6503_v55, %v6503_v55 }
0x1409   :  { %1878 = vrot.lane.b32.xlu0 %v1876_v38, %s5907_s25 }
0x1477   :  { %v1928_v3 = vpop.permute.xlu1 %1927 }
0x1478   :  { %5244 = vmatmul.mubr.msk.bf16.vlgmr.msra.gmra.mxu1 %vm762_vm9, %v1928_v3 }
0x1479   :  { %2234 = vmatprep.mubr.bf16.mxu1 %v5899_v6 }
0x147b   :  { %v1879_v15 = vpop.permute.xlu0 %1878 }
0x147c   :  { %5236 = vmatmul.mubr.msk.bf16.vlgmr.msra.gmra.mxu0 %vm762_vm9, %v1879_v15 }
0x147d   :  { %2129 = vmatprep.mubr.bf16.mxu0 %v5899_v6 }
0x1538   :  { %v1966_v27 = vpop.f32.mrf.mxu1 }
0x1539   :  { %v1972_v19 = vadd.f32 %v1966_v27, %v6245_v8 }
0x153a   :  { %v5245_v59 = vpop.f32.mrf.mxu1 }
0x153b   :  { %5676 = vtanh.f32 %v1972_v19  ;;  %v4867_v7 = vmul.f32 -1.442695, %v1972_v19 }
0x153c   :  { %v1917_v61 = vpop.f32.mrf.mxu0  ;;  %v1969_v28 = vpop.f32.mrf.mxu1 }
0x153d   :  { %v1923_v22 = vadd.f32 %v1917_v61, %v6247_v10  ;;  %v6588_v61 = vld [vmem:[%s6566_s11] sm:$0xff]  }
0x153e   :  { %v5237_v17 = vpop.f32.mrf.mxu0  ;;  %v5246_v58 = vpop.f32.mrf.mxu1 }
0x153f   :  { %5678 = vtanh.f32 %v1923_v22  ;;  %v4866_v8 = vmul.f32 -1.442695, %v1923_v22 }
0x1540   :  { %v1920_v45 = vpop.f32.mrf.mxu0  ;;  %5680 = vpow2.f32 %v4867_v7 }
0x1541   :  { %5682 = vpow2.f32 %v4866_v8 }
0x1542   :  { %v5238_v26 = vpop.f32.mrf.mxu0 }
0x1548   :  { %v5677_v46 = vpop.eup %5676 }
0x1549   :  { %1993 = vrot.lane.b32.xlu1 %v5677_v46, %s5906_s24  ;;  %v6604_v46 = vld [vmem:[%s6561_s7 + $0x8] sm:$0xff]  }
0x154c   :  { %v5679_v53 = vpop.eup %5678 }
0x154d   :  { %1991 = vrot.lane.b32.xlu0 %v5679_v53, %s5906_s24  ;;  %v5681_v29 = vpop.eup %5680 }
0x154e   :  { %v1980_v2 = vadd.f32 1.0, %v5681_v29  ;;  %v5683_v32 = vpop.eup %5682 }
0x154f   :  { %v1979_v10 = vadd.f32 1.0, %v5683_v32 }
0x1550   :  { %5684 = vrcp.f32 %v1980_v2  ;;  %v6611_v2 = vld [vmem:[%s6561_s7] sm:$0xff]  }
0x1551   :  { %5686 = vrcp.f32 %v1979_v10 }
0x155d   :  { %v5685_v33 = vpop.eup %5684 }
0x155e   :  { %v6518_v35 = vpop.eup %5686  ;;  %v1988_v13 = vmul.f32 %v5685_v33, %v1850_v39  ;;  %v5540_v39 = vld [vmem:[%s4782_s29 + $0x14] ss:$8 sps:$4 sm:$0xff]  }
0x155f   :  { %v1987_v12 = vmul.f32 %v6518_v35, %v1849_v49  ;;  %2214 = vmatprep.subr.bf16.mxu1 %v5540_v39  ;;  %v5541_v49 = vld [vmem:[%s4782_s29] ss:$8 sps:$4 sm:$0xff]   ;;  %s6921_s29 = sld [smem:[%s7229_s0 + %s5915_s26]]  }
0x1560   :  { %2215 = vmatpush1.bf16.msra.mxu1 %v5538_v18  ;;  %s4791_s26 = sld [smem:[%s7229_s0 + %s5922_s21]]  }
0x1561   :  { %2216 = vmatprep.subr.bf16.mxu1 %v5543_v40  ;;  %s4799_s21 = sld [smem:[%s7229_s0 + %s5928_s18]]  }
0x1564   :  { %2217 = vmatpush1.bf16.msra.mxu1 %v5541_v49 }
0x1565   :  { %5255 = vmatprep.subr.bf16.mxu1 %v5891_v0 }
0x15bb   :  { %v1994_v30 = vpop.permute.xlu1 %1993 }
0x15bc   :  { %v1998_v51 = vmul.f32 %v5685_v33, %v1994_v30 }
0x15be   :  { %2003 = vrot.lane.b32.xlu1 %v1998_v51, %s5906_s24 }
0x15bf   :  { %v1992_v11 = vpop.permute.xlu0 %1991 }
0x15c0   :  { %v1997_v62 = vmul.f32 %v6518_v35, %v1992_v11 }
0x15c2   :  { %2001 = vrot.lane.b32.xlu0 %v1997_v62, %s5906_s24 }
0x1630   :  { %v2004_v44 = vpop.permute.xlu1 %2003 }
0x1631   :  { %v6522_v50 = vadd.f32 %v2004_v44, %v1988_v13 }
0x1633   :  { %5688 = vtanh.f32 %v6522_v50 }
0x1634   :  { %v2002_v56 = vpop.permute.xlu0 %2001 }
0x1635   :  { %v6526_v25 = vadd.f32 %v2002_v56, %v1987_v12 }
0x1637   :  { %5690 = vtanh.f32 %v6526_v25 }
0x1640   :  { %v5689_v31 = vpop.eup %5688 }
0x1641   :  { %2015 = vrot.lane.b32.xlu1 %v5689_v31, %s5906_s24 }
0x1644   :  { %v5691_v23 = vpop.eup %5690 }
0x1645   :  { %911 = vrot.lane.b32.xlu1 %v6265_v34, %s5907_s25  ;;  %2013 = vrot.lane.b32.xlu0 %v5691_v23, %s5906_s24  ;;  %v5544_v34 = vld [vmem:[%s4783_s3 + $0x10] ss:$8 sps:$4 sm:$0xff]  }
0x1649   :  { %1870 = vrot.lane.b32.xlu1 %v6499_v54, %s5907_s25  ;;  %1070 = vrot.lane.b32.xlu0 %v6305_v14, %s5907_s25  ;;  %v5546_v14 = vld [vmem:[%s4783_s3 + $0x14] ss:$8 sps:$4 sm:$0xff]  }
0x164a   :  { %2109 = vmatprep.subr.bf16.mxu0 %v5546_v14 }
0x164b   :  { %2110 = vmatpush1.bf16.msra.mxu0 %v5544_v34 }
0x164d   :  { %1230 = vrot.lane.b32.xlu1 %v6345_v37, %s5907_s25  ;;  %v5549_v37 = vld [vmem:[%s4783_s3 + $0x4] ss:$8 sps:$4 sm:$0xff]  }
0x164e   :  { %2111 = vmatprep.subr.bf16.mxu0 %v5549_v37 }
0x1651   :  { %1554 = vrot.lane.b32.xlu1 %v6421_v20, %s5907_s25 }
0x1655   :  { %1236 = vrot.lane.b32.xlu1 %v6341_v63, %s5907_s25  ;;  %v5547_v63 = vld [vmem:[%s4783_s3] ss:$8 sps:$4 sm:$0xff]   ;;  %s6927_s3 = sld [smem:[%s7229_s0 + %s5916_s30]]  }
0x1656   :  { %2112 = vmatpush1.bf16.msra.mxu0 %v5547_v63  ;;  %s4792_s30 = sld [smem:[%s7229_s0 + %s5923_s27]]  }
0x1657   :  { %5247 = vmatprep.subr.bf16.mxu0 %v5891_v0 }
0x1659   :  { %1548 = vrot.lane.b32.xlu1 %v6425_v1, %s5907_s25 }
0x165d   :  { %916 = vrot.lane.b32.xlu1 %v6261_v4, %s5907_s25 }
0x1661   :  { %1864 = vrot.lane.b32.xlu1 %v6503_v55, %s5907_s25 }
0x16b3   :  { %v2016_v20 = vpop.permute.xlu1 %2015 }
0x16b4   :  { %v2020_v1 = vmul.f32 %v5685_v33, %v2016_v20 }
0x16b6   :  { %2028 = vrot.lane.b32.xlu0 %v2020_v1, %s5907_s25  ;;  %v2275_v1 = vld [vmem:[%s4784_s15] sm:$0x3] }
0x16b7   :  { %v912_v4 = vpop.permute.xlu1 %911  ;;  %v2014_v54 = vpop.permute.xlu0 %2013 }
0x16b8   :  { %914 = vst.msk [vmem:[#allocation3] sm:$0xff] %vm762_vm9, %v912_v4  ;;  %v6653_v4 = vrot.slane %v2275_v1, %v632_v36 }
0x16ba   :  { %1390 = vrot.lane.b32.xlu0 %v6385_v24, %s5907_s25  ;;  %v6579_v24 = vld [vmem:[%s6566_s11 + $0x8] sm:$0xff]  }
0x16bb   :  { %v1871_v55 = vpop.permute.xlu1 %1870  ;;  %v1071_v38 = vpop.permute.xlu0 %1070 }
0x16bc   :  { %1874 = vst.msk [vmem:[#allocation3 + $0x48] sm:$0xff] %vm762_vm9, %v1871_v55  ;;  %1074 = vst.msk [vmem:[#allocation3 + $0x8] sm:$0xff] %vm762_vm9, %v1071_v38 }
0x16be   :  { %1712 = vrot.lane.b32.xlu0 %v6467_v21, %s5907_s25 }
0x16bf   :  { %v1231_v3 = vpop.permute.xlu1 %1230  ;;  %v2033_v27 = vld [vmem:[#allocation3] sm:$0xff] }
0x16c0   :  { %1234 = vst.msk [vmem:[#allocation3 + $0x10] sm:$0xff] %vm762_vm9, %v1231_v3 }
0x16c2   :  { %1396 = vrot.lane.b32.xlu0 %v6381_v48, %s5907_s25 }
0x16c3   :  { %v1555_v15 = vpop.permute.xlu1 %1554  ;;  %v2034_v19 = vld [vmem:[#allocation3 + $0x8] sm:$0xff] }
0x16c4   :  { %1558 = vst.msk [vmem:[#allocation3 + $0x58] sm:$0xff] %vm762_vm9, %v1555_v15  ;;  %v2045_v59 = vpack.c.bf16 %v2034_v19, %v2033_v27  ;;  %v2050_v26 = vld [vmem:[#allocation3 + $0x48] sm:$0xff]  ;;  %v2280_v19 = vrot.slane %v2275_v1, %v628_v47 }
0x16c6   :  { %1706 = vrot.lane.b32.xlu0 %v6471_v57, %s5907_s25  ;;  %4880 = vmatmul.mubr.msk.bf16.vlgmr.msra.gmra.mxu1 %vm762_vm9, %v2045_v59  ;;  %v2019_v57 = vmul.f32 %v6518_v35, %v2014_v54 }
0x16c7   :  { %v1237_v21 = vpop.permute.xlu1 %1236  ;;  %5256 = vmatpush3.bf16.msra.mxu1 %v6579_v24  ;;  %2244 = vmatprep.mubr.bf16.mxu1 %v5899_v6  ;;  %v2035_v8 = vld [vmem:[#allocation3 + $0x10] sm:$0xff] }
0x16c8   :  { %1240 = vst.msk [vmem:[#allocation3 + $0x68] sm:$0xff] %vm762_vm9, %v1237_v21  ;;  %5257 = vmatprep.subr.bf16.mxu1 %v5891_v0 }
0x16ca   :  { %1076 = vrot.lane.b32.xlu0 %v6301_v60, %s5907_s25 }
0x16cb   :  { %v1549_v48 = vpop.permute.xlu1 %1548  ;;  %5258 = vmatpush3.bf16.msra.mxu1 %v6588_v61  ;;  %v2052_v30 = vld [vmem:[#allocation3 + $0x58] sm:$0xff] }
0x16cc   :  { %1552 = vst.msk [vmem:[#allocation3 + $0x20] sm:$0xff] %vm762_vm9, %v1549_v48  ;;  %5271 = vmatprep.subr.bf16.mxu1 %v5891_v0 }
0x16ce   :  { %2022 = vrot.lane.b32.xlu0 %v2019_v57, %s5907_s25 }
0x16cf   :  { %v917_v28 = vpop.permute.xlu1 %916  ;;  %v2054_v13 = vld [vmem:[#allocation3 + $0x68] sm:$0xff] }
0x16d0   :  { %920 = vst.msk [vmem:[#allocation3 + $0x78] sm:$0xff] %vm762_vm9, %v917_v28 }
0x16d3   :  { %v1865_v22 = vpop.permute.xlu1 %1864  ;;  %v2037_v44 = vld [vmem:[#allocation3 + $0x20] sm:$0xff] }
0x16d4   :  { %1868 = vst.msk [vmem:[#allocation3 + $0x30] sm:$0xff] %vm762_vm9, %v1865_v22 }
0x16d7   :  { %v2056_v39 = vld [vmem:[#allocation3 + $0x78] sm:$0xff] }
0x16db   :  { %v2039_v40 = vld [vmem:[#allocation3 + $0x30] sm:$0xff] }
0x1728   :  { %v2029_v17 = vpop.permute.xlu0 %2028 }
0x1729   :  { %2032 = vst.msk [vmem:[#allocation3 + $0x40] sm:$0xff] %vm762_vm9, %v2029_v17 }
0x172c   :  { %v1391_v60 = vpop.permute.xlu0 %1390 }
0x172d   :  { %1394 = vst.msk [vmem:[#allocation3 + $0x18] sm:$0xff] %vm762_vm9, %v1391_v60 }
0x1730   :  { %v1713_v58 = vpop.permute.xlu0 %1712  ;;  %v2049_v45 = vld [vmem:[#allocation3 + $0x40] sm:$0xff] }
0x1731   :  { %1716 = vst.msk [vmem:[#allocation3 + $0x50] sm:$0xff] %vm762_vm9, %v1713_v58  ;;  %v2061_v53 = vpack.c.bf16 %v2050_v26, %v2049_v45 }
0x1733   :  { %4872 = vmatmul.mubr.msk.bf16.vlgmr.msra.gmra.mxu0 %vm762_vm9, %v2061_v53 }
0x1734   :  { %v1397_v7 = vpop.permute.xlu0 %1396  ;;  %5248 = vmatpush3.bf16.msra.mxu0 %v6604_v46  ;;  %v2036_v29 = vld [vmem:[#allocation3 + $0x18] sm:$0xff]  ;;  %2139 = vmatprep.mubr.bf16.mxu0 %v5899_v6 }
0x1735   :  { %1400 = vst.msk [vmem:[#allocation3 + $0x60] sm:$0xff] %vm762_vm9, %v1397_v7  ;;  %v2046_v32 = vpack.c.bf16 %v2036_v29, %v2035_v8  ;;  %5249 = vmatprep.subr.bf16.mxu0 %v5891_v0 }
0x1737   :  { %4881 = vmatmul.mubr.msk.bf16.gmra.mxu1 %vm762_vm9, %v2046_v32 }
0x1738   :  { %v1707_v10 = vpop.permute.xlu0 %1706  ;;  %v2051_v33 = vld [vmem:[#allocation3 + $0x50] sm:$0xff]  ;;  %2254 = vmatprep.mubr.bf16.mxu1 %v5899_v6  ;;  %5250 = vmatpush3.bf16.msra.mxu0 %v6611_v2 }
0x1739   :  { %1710 = vst.msk [vmem:[#allocation3 + $0x28] sm:$0xff] %vm762_vm9, %v1707_v10  ;;  %v2062_v51 = vpack.c.bf16 %v2052_v30, %v2051_v33  ;;  %5263 = vmatprep.subr.bf16.mxu0 %v5891_v0 }
0x173b   :  { %4873 = vmatmul.mubr.msk.bf16.gmra.mxu0 %vm762_vm9, %v2062_v51 }
0x173c   :  { %v1077_v35 = vpop.permute.xlu0 %1076  ;;  %2149 = vmatprep.mubr.bf16.mxu0 %v5899_v6  ;;  %v2053_v11 = vld [vmem:[#allocation3 + $0x60] sm:$0xff] }
0x173d   :  { %1080 = vst.msk [vmem:[#allocation3 + $0x70] sm:$0xff] %vm762_vm9, %v1077_v35  ;;  %v2063_v56 = vpack.c.bf16 %v2054_v13, %v2053_v11 }
0x1740   :  { %v2023_v62 = vpop.permute.xlu0 %2022  ;;  %v2038_v12 = vld [vmem:[#allocation3 + $0x28] sm:$0xff] }
0x1741   :  { %2026 = vst.msk [vmem:[#allocation3 + $0x38] sm:$0xff] %vm762_vm9, %v2023_v62  ;;  %v2047_v31 = vpack.c.bf16 %v2038_v12, %v2037_v44 }
0x1743   :  { %4874 = vmatmul.mubr.msk.bf16.gmra.mxu0 %vm762_vm9, %v2063_v56  ;;  %4882 = vmatmul.mubr.msk.bf16.gmra.mxu1 %vm762_vm9, %v2047_v31 }
0x1744   :  { %2159 = vmatprep.mubr.bf16.mxu0 %v5899_v6  ;;  %2264 = vmatprep.mubr.bf16.mxu1 %v5899_v6  ;;  %v2055_v18 = vld [vmem:[#allocation3 + $0x70] sm:$0xff] }
0x1745   :  { %v2064_v49 = vpack.c.bf16 %v2056_v39, %v2055_v18 }
0x1748   :  { %v2040_v23 = vld [vmem:[#allocation3 + $0x38] sm:$0xff] }
0x1749   :  { %v2048_v34 = vpack.c.bf16 %v2040_v23, %v2039_v40 }
0x174b   :  { %4875 = vmatmul.mubr.msk.bf16.gmra.mxu0 %vm762_vm9, %v2064_v49  ;;  %4883 = vmatmul.mubr.msk.bf16.gmra.mxu1 %vm762_vm9, %v2048_v34 }
0x174c   :  { %5251 = vmatprep.mubr.msk.bf16.mxu0 %vm5896_vm13, %v5891_v0  ;;  %5259 = vmatprep.mubr.msk.bf16.mxu1 %vm5896_vm13, %v5891_v0 }
0x1753   :  { %5252 = vmatmul.mubr.bf16.vlgmr.msra.gmra.mxu0 %v5899_v6  ;;  %5260 = vmatmul.mubr.bf16.vlgmr.msra.gmra.mxu1 %v5899_v6 }
0x1754   :  { %5264 = vmatpush3.bf16.msra.mxu0 %v6604_v46  ;;  %5272 = vmatpush3.bf16.msra.mxu1 %v6579_v24 }
0x1755   :  { %5265 = vmatprep.subr.bf16.mxu0 %v5891_v0  ;;  %5273 = vmatprep.subr.bf16.mxu1 %v5891_v0 }
0x1756   :  { %5267 = vmatprep.mubr.msk.bf16.mxu0 %vm5896_vm13, %v5891_v0  ;;  %5275 = vmatprep.mubr.msk.bf16.mxu1 %vm5896_vm13, %v5891_v0 }
0x1758   :  { %5266 = vmatpush3.bf16.msra.mxu0 %v6611_v2  ;;  %5274 = vmatpush3.bf16.msra.mxu1 %v6588_v61 }
0x1759   :  { %5279 = vmatprep.subr.bf16.mxu0 %v5891_v0  ;;  %5287 = vmatprep.subr.bf16.mxu1 %v5891_v0 }
0x1786   :  { %v2236_v14 = vpop.f32.mrf.mxu1 }
0x1788   :  { %v2238_v37 = vpop.f32.mrf.mxu1 }
0x178a   :  { %v2240_v63 = vpop.f32.mrf.mxu1 }
0x178c   :  { %v2242_v54 = vpop.f32.mrf.mxu1 }
0x17f3   :  { %v2131_v20 = vpop.f32.mrf.mxu0 }
0x17f5   :  { %v2133_v55 = vpop.f32.mrf.mxu0 }
0x17f6   :  { %v2239_v38 = vadd.f32 %v2238_v37, %v2133_v55 }
0x17f7   :  { %v2135_v3 = vpop.f32.mrf.mxu0  ;;  %v2246_v15 = vpop.f32.mrf.mxu1 }
0x17f8   :  { %v2241_v27 = vadd.f32 %v2240_v63, %v2135_v3  ;;  %v6658_v59 = vadd.f32 %v6653_v4, %v2239_v38  ;;  %v2237_v38 = vadd.f32 %v2236_v14, %v2131_v20 }
0x17f9   :  { %v2137_v21 = vpop.f32.mrf.mxu0  ;;  %v2248_v48 = vpop.f32.mrf.mxu1 }
0x17fa   :  { %v2243_v57 = vadd.f32 %v2242_v54, %v2137_v21  ;;  %v6660_v28 = vadd.f32 %v2280_v19, %v2241_v27 }
0x17fb   :  { %v2141_v22 = vpop.f32.mrf.mxu0  ;;  %v2250_v60 = vpop.f32.mrf.mxu1 }
0x17fc   :  { %v2247_v36 = vadd.f32 %v2246_v15, %v2141_v22  ;;  %v6663_v17 = vadd.f32 %v6653_v4, %v2243_v57 }
0x17fd   :  { %v2143_v58 = vpop.f32.mrf.mxu0  ;;  %v2252_v8 = vpop.f32.mrf.mxu1 }
0x17fe   :  { %v2249_v45 = vadd.f32 %v2248_v48, %v2143_v58  ;;  %v6665_v26 = vadd.f32 %v2280_v19, %v2247_v36  ;;  %v2287_v58 = vadd.f32 %v2280_v19, %v2237_v38 }
0x17ff   :  { %v2145_v53 = vpop.f32.mrf.mxu0 }
0x1800   :  { %v2251_v47 = vadd.f32 %v2250_v60, %v2145_v53  ;;  %v6668_v7 = vadd.f32 %v6653_v4, %v2249_v45 }
0x1801   :  { %v2147_v29 = vpop.f32.mrf.mxu0 }
0x1802   :  { %v2253_v32 = vadd.f32 %v2252_v8, %v2147_v29  ;;  %v6670_v10 = vadd.f32 %v2280_v19, %v2251_v47 }
0x1803   :  { %v2151_v33 = vpop.f32.mrf.mxu0  ;;  %v2256_v30 = vpop.f32.mrf.mxu1 }
0x1804   :  { %v2257_v51 = vadd.f32 %v2256_v30, %v2151_v33  ;;  %v6673_v35 = vadd.f32 %v6653_v4, %v2253_v32 }
0x1805   :  { %v2153_v11 = vpop.f32.mrf.mxu0  ;;  %v2258_v62 = vpop.f32.mrf.mxu1 }
0x1806   :  { %v2259_v13 = vadd.f32 %v2258_v62, %v2153_v11  ;;  %v6675_v44 = vadd.f32 %v2280_v19, %v2257_v51 }
0x1807   :  { %v2155_v12 = vpop.f32.mrf.mxu0  ;;  %v2260_v56 = vpop.f32.mrf.mxu1 }
0x1808   :  { %v2261_v31 = vadd.f32 %v2260_v56, %v2155_v12  ;;  %v6678_v18 = vadd.f32 %v6653_v4, %v2259_v13 }
0x1809   :  { %v2157_v39 = vpop.f32.mrf.mxu0  ;;  %v2262_v40 = vpop.f32.mrf.mxu1 }
0x180a   :  { %v2263_v23 = vadd.f32 %v2262_v40, %v2157_v39  ;;  %v6680_v49 = vadd.f32 %v2280_v19, %v2261_v31 }
0x180b   :  { %v2161_v34 = vpop.f32.mrf.mxu0  ;;  %v2266_v37 = vpop.f32.mrf.mxu1 }
0x180c   :  { %v2267_v63 = vadd.f32 %v2266_v37, %v2161_v34  ;;  %v6683_v1 = vadd.f32 %v6653_v4, %v2263_v23 }
0x180d   :  { %v2163_v54 = vpop.f32.mrf.mxu0  ;;  %v2268_v55 = vpop.f32.mrf.mxu1 }
0x180e   :  { %v2269_v3 = vadd.f32 %v2268_v55, %v2163_v54  ;;  %v6685_v15 = vadd.f32 %v2280_v19, %v2267_v63 }
0x180f   :  { %v2165_v27 = vpop.f32.mrf.mxu0  ;;  %v2270_v21 = vpop.f32.mrf.mxu1 }
0x1810   :  { %v2271_v48 = vadd.f32 %v2270_v21, %v2165_v27  ;;  %v6688_v57 = vadd.f32 %v6653_v4, %v2269_v3 }
0x1811   :  { %v2167_v22 = vpop.f32.mrf.mxu0  ;;  %v2272_v36 = vpop.f32.mrf.mxu1 }
0x1812   :  { %v2273_v60 = vadd.f32 %v2272_v36, %v2167_v22  ;;  %v6690_v45 = vadd.f32 %v2280_v19, %v2271_v48 }
0x1813   :  { %v2374_v53 = vpop.f32.mrf.mxu0  ;;  %v2428_v47 = vpop.f32.mrf.mxu1 }
0x1814   :  { %v2380_v8 = vadd.f32 %v2374_v53, %v2287_v58  ;;  %v2302_v14 = vadd.f32 %v6653_v4, %v2273_v60 }
0x1815   :  { %v5253_v20 = vpop.f32.mrf.mxu0  ;;  %v5261_v29 = vpop.f32.mrf.mxu1 }
0x1816   :  { %5692 = vtanh.f32 %v2380_v8  ;;  %v2434_v32 = vadd.f32 %v2428_v47, %v2302_v14  ;;  %v4888_v19 = vmul.f32 -1.442695, %v2380_v8 }
0x1817   :  { %v2377_v33 = vpop.f32.mrf.mxu0  ;;  %v2431_v30 = vpop.f32.mrf.mxu1 }
0x1818   :  { %5694 = vtanh.f32 %v2434_v32  ;;  %v4889_v12 = vmul.f32 -1.442695, %v2434_v32 }
0x1819   :  { %v5254_v51 = vpop.f32.mrf.mxu0  ;;  %v5262_v11 = vpop.f32.mrf.mxu1  ;;  %5696 = vpow2.f32 %v4888_v19 }
0x181a   :  { %5698 = vpow2.f32 %v4889_v12 }
0x1823   :  { %v5693_v62 = vpop.eup %5692 }
0x1824   :  { %2453 = vrot.lane.b32.xlu1 %v5693_v62, %s5906_s24 }
0x1825   :  { %v5695_v13 = vpop.eup %5694 }
0x1826   :  { %2455 = vrot.lane.b32.xlu0 %v5695_v13, %s5906_s24  ;;  %v5697_v4 = vpop.eup %5696 }
0x1827   :  { %v5699_v56 = vpop.eup %5698  ;;  %v2441_v31 = vadd.f32 1.0, %v5697_v4 }
0x1828   :  { %v2442_v39 = vadd.f32 1.0, %v5699_v56 }
0x1829   :  { %5700 = vrcp.f32 %v2441_v31 }
0x182a   :  { %5702 = vrcp.f32 %v2442_v39 }
0x1836   :  { %v5701_v40 = vpop.eup %5700 }
0x1837   :  { %v5703_v37 = vpop.eup %5702  ;;  %v2449_v55 = vmul.f32 0.0, %v5701_v40 }
0x1838   :  { %v2450_v27 = vmul.f32 0.0, %v5703_v37 }
0x1896   :  { %v2454_v23 = vpop.permute.xlu1 %2453 }
0x1897   :  { %v2459_v34 = vmul.f32 %v5701_v40, %v2454_v23 }
0x1898   :  { %v2456_v63 = vpop.permute.xlu0 %2455 }
0x1899   :  { %2463 = vrot.lane.b32.xlu1 %v2459_v34, %s5906_s24  ;;  %v2460_v54 = vmul.f32 %v5703_v37, %v2456_v63 }
0x189b   :  { %2465 = vrot.lane.b32.xlu0 %v2460_v54, %s5906_s24 }
0x190b   :  { %v2464_v38 = vpop.permute.xlu1 %2463 }
0x190c   :  { %v6697_v3 = vadd.f32 %v2464_v38, %v2449_v55 }
0x190d   :  { %v2466_v21 = vpop.permute.xlu0 %2465 }
0x190e   :  { %5704 = vtanh.f32 %v6697_v3  ;;  %v6700_v48 = vadd.f32 %v2466_v21, %v2450_v27 }
0x1910   :  { %5706 = vtanh.f32 %v6700_v48 }
0x191b   :  { %v5705_v22 = vpop.eup %5704 }
0x191c   :  { %2475 = vrot.lane.b32.xlu1 %v5705_v22, %s5906_s24 }
0x191d   :  { %v5707_v36 = vpop.eup %5706 }
0x191e   :  { %2477 = vrot.lane.b32.xlu0 %v5707_v36, %s5906_s24 }
0x198e   :  { %v2476_v60 = vpop.permute.xlu1 %2475 }
0x198f   :  { %v2481_v58 = vmul.f32 %v5701_v40, %v2476_v60 }
0x1990   :  { %v2478_v47 = vpop.permute.xlu0 %2477 }
0x1991   :  { %v2484_v53 = vpack.c.bf16 %v2481_v58, %v2481_v58  ;;  %v2482_v8 = vmul.f32 %v5703_v37, %v2478_v47 }
0x1993   :  { %2486 = vrot.lane.b32.xlu1 %v2484_v53, %s5907_s25  ;;  %v2533_v14 = vpack.c.bf16 %v2482_v8, %v2482_v8 }
0x1995   :  { %2535 = vrot.lane.b32.xlu0 %v2533_v14, %s5907_s25 }
0x1a05   :  { %v2487_v20 = vpop.permute.xlu1 %2486 }
0x1a06   :  { %5268 = vmatmul.mubr.msk.bf16.vlgmr.msra.gmra.mxu0 %vm762_vm9, %v2487_v20 }
0x1a07   :  { %5280 = vmatpush3.bf16.msra.mxu0 %v6604_v46  ;;  %5283 = vmatprep.mubr.msk.bf16.mxu0 %vm5896_vm13, %v5891_v0  ;;  %v2536_v29 = vpop.permute.xlu0 %2535 }
0x1a08   :  { %5281 = vmatprep.subr.bf16.mxu0 %v5891_v0  ;;  %5276 = vmatmul.mubr.msk.bf16.vlgmr.msra.gmra.mxu1 %vm762_vm9, %v2536_v29 }
0x1a09   :  { %5288 = vmatpush3.bf16.msra.mxu1 %v6579_v24  ;;  %5291 = vmatprep.mubr.msk.bf16.mxu1 %vm5896_vm13, %v5891_v0 }
0x1a0a   :  { %5289 = vmatprep.subr.bf16.mxu1 %v5891_v0 }
0x1a0b   :  { %5282 = vmatpush3.bf16.msra.mxu0 %v6611_v2 }
0x1a0c   :  { %5295 = vmatprep.subr.bf16.mxu0 %v5891_v0 }
0x1a0d   :  { %5290 = vmatpush3.bf16.msra.mxu1 %v6588_v61 }
0x1a0e   :  { %5303 = vmatprep.subr.bf16.mxu1 %v5891_v0 }
0x1ac6   :  { %v2525_v32 = vpop.f32.mrf.mxu0 }
0x1ac7   :  { %v2531_v33 = vadd.f32 %v2525_v32, %v6660_v28 }
0x1ac8   :  { %v5269_v30 = vpop.f32.mrf.mxu0  ;;  %v2574_v51 = vpop.f32.mrf.mxu1 }
0x1ac9   :  { %5708 = vtanh.f32 %v2531_v33  ;;  %v2580_v11 = vadd.f32 %v2574_v51, %v6688_v57  ;;  %v4892_v39 = vmul.f32 -1.442695, %v2531_v33 }
0x1aca   :  { %v2528_v62 = vpop.f32.mrf.mxu0  ;;  %v5277_v13 = vpop.f32.mrf.mxu1 }
0x1acb   :  { %5710 = vtanh.f32 %v2580_v11  ;;  %v4893_v40 = vmul.f32 -1.442695, %v2580_v11 }
0x1acc   :  { %v5270_v19 = vpop.f32.mrf.mxu0  ;;  %v2577_v12 = vpop.f32.mrf.mxu1  ;;  %5712 = vpow2.f32 %v4892_v39 }
0x1acd   :  { %5714 = vpow2.f32 %v4893_v40 }
0x1ace   :  { %v5278_v4 = vpop.f32.mrf.mxu1 }
0x1ad6   :  { %v5709_v56 = vpop.eup %5708 }
0x1ad7   :  { %2599 = vrot.lane.b32.xlu1 %v5709_v56, %s5906_s24 }
0x1ad8   :  { %v5711_v31 = vpop.eup %5710 }
0x1ad9   :  { %2601 = vrot.lane.b32.xlu0 %v5711_v31, %s5906_s24  ;;  %v5713_v28 = vpop.eup %5712 }
0x1ada   :  { %v5715_v23 = vpop.eup %5714  ;;  %v2587_v34 = vadd.f32 1.0, %v5713_v28 }
0x1adb   :  { %v2588_v57 = vadd.f32 1.0, %v5715_v23 }
0x1adc   :  { %5716 = vrcp.f32 %v2587_v34 }
0x1add   :  { %5718 = vrcp.f32 %v2588_v57 }
0x1ae9   :  { %v5717_v37 = vpop.eup %5716 }
0x1aea   :  { %v5719_v55 = vpop.eup %5718  ;;  %v2595_v21 = vmul.f32 %v5717_v37, %v6697_v3 }
0x1aeb   :  { %v2596_v60 = vmul.f32 %v5719_v55, %v6700_v48 }
0x1b49   :  { %v2600_v63 = vpop.permute.xlu1 %2599 }
0x1b4a   :  { %v2605_v54 = vmul.f32 %v5717_v37, %v2600_v63 }
0x1b4b   :  { %v2602_v38 = vpop.permute.xlu0 %2601 }
0x1b4c   :  { %2609 = vrot.lane.b32.xlu1 %v2605_v54, %s5906_s24  ;;  %v2606_v27 = vmul.f32 %v5719_v55, %v2602_v38 }
0x1b4e   :  { %2611 = vrot.lane.b32.xlu0 %v2606_v27, %s5906_s24 }
0x1bbe   :  { %v2610_v22 = vpop.permute.xlu1 %2609 }
0x1bbf   :  { %v6728_v36 = vadd.f32 %v2610_v22, %v2595_v21 }
0x1bc0   :  { %v2612_v58 = vpop.permute.xlu0 %2611 }
0x1bc1   :  { %5720 = vtanh.f32 %v6728_v36  ;;  %v6732_v53 = vadd.f32 %v2612_v58, %v2596_v60 }
0x1bc3   :  { %5722 = vtanh.f32 %v6732_v53 }
0x1bce   :  { %v5721_v47 = vpop.eup %5720 }
0x1bcf   :  { %2621 = vrot.lane.b32.xlu1 %v5721_v47, %s5906_s24 }
0x1bd0   :  { %v5723_v8 = vpop.eup %5722 }
0x1bd1   :  { %2623 = vrot.lane.b32.xlu0 %v5723_v8, %s5906_s24 }
0x1c41   :  { %v2622_v14 = vpop.permute.xlu1 %2621 }
0x1c42   :  { %v2627_v3 = vmul.f32 %v5717_v37, %v2622_v14 }
0x1c43   :  { %v2624_v29 = vpop.permute.xlu0 %2623 }
0x1c44   :  { %v2630_v20 = vpack.c.bf16 %v2627_v3, %v2627_v3  ;;  %v2628_v32 = vmul.f32 %v5719_v55, %v2624_v29 }
0x1c46   :  { %2632 = vrot.lane.b32.xlu1 %v2630_v20, %s5907_s25  ;;  %v2679_v48 = vpack.c.bf16 %v2628_v32, %v2628_v32 }
0x1c48   :  { %2681 = vrot.lane.b32.xlu0 %v2679_v48, %s5907_s25 }
0x1cb8   :  { %v2633_v33 = vpop.permute.xlu1 %2632 }
0x1cb9   :  { %5284 = vmatmul.mubr.msk.bf16.vlgmr.msra.gmra.mxu0 %vm762_vm9, %v2633_v33 }
0x1cba   :  { %5296 = vmatpush3.bf16.msra.mxu0 %v6604_v46  ;;  %5299 = vmatprep.mubr.msk.bf16.mxu0 %vm5896_vm13, %v5891_v0  ;;  %v2682_v30 = vpop.permute.xlu0 %2681 }
0x1cbb   :  { %5297 = vmatprep.subr.bf16.mxu0 %v5891_v0  ;;  %5292 = vmatmul.mubr.msk.bf16.vlgmr.msra.gmra.mxu1 %vm762_vm9, %v2682_v30 }
0x1cbc   :  { %5304 = vmatpush3.bf16.msra.mxu1 %v6579_v24  ;;  %5307 = vmatprep.mubr.msk.bf16.mxu1 %vm5896_vm13, %v5891_v0 }
0x1cbd   :  { %5305 = vmatprep.subr.bf16.mxu1 %v5891_v0 }
0x1cbe   :  { %5298 = vmatpush3.bf16.msra.mxu0 %v6611_v2 }
0x1cbf   :  { %5311 = vmatprep.subr.bf16.mxu0 %v5891_v0 }
0x1cc0   :  { %5306 = vmatpush3.bf16.msra.mxu1 %v6588_v61 }
0x1cc1   :  { %5319 = vmatprep.subr.bf16.mxu1 %v5891_v0 }
0x1d79   :  { %v2671_v51 = vpop.f32.mrf.mxu0 }
0x1d7a   :  { %v2677_v11 = vadd.f32 %v2671_v51, %v6665_v26 }
0x1d7b   :  { %v5285_v62 = vpop.f32.mrf.mxu0  ;;  %v2720_v13 = vpop.f32.mrf.mxu1 }
0x1d7c   :  { %5724 = vtanh.f32 %v2677_v11  ;;  %v2726_v19 = vadd.f32 %v2720_v13, %v6683_v1  ;;  %v4896_v23 = vmul.f32 -1.442695, %v2677_v11 }
0x1d7d   :  { %v2674_v12 = vpop.f32.mrf.mxu0  ;;  %v5293_v4 = vpop.f32.mrf.mxu1 }
0x1d7e   :  { %5726 = vtanh.f32 %v2726_v19  ;;  %v4897_v34 = vmul.f32 -1.442695, %v2726_v19 }
0x1d7f   :  { %v5286_v56 = vpop.f32.mrf.mxu0  ;;  %v2723_v31 = vpop.f32.mrf.mxu1  ;;  %5728 = vpow2.f32 %v4896_v23 }
0x1d80   :  { %5730 = vpow2.f32 %v4897_v34 }
0x1d81   :  { %v5294_v39 = vpop.f32.mrf.mxu1 }
0x1d89   :  { %v5725_v40 = vpop.eup %5724 }
0x1d8a   :  { %2745 = vrot.lane.b32.xlu1 %v5725_v40, %s5906_s24 }
0x1d8b   :  { %v5727_v28 = vpop.eup %5726 }
0x1d8c   :  { %2747 = vrot.lane.b32.xlu0 %v5727_v28, %s5906_s24  ;;  %v5729_v26 = vpop.eup %5728 }
0x1d8d   :  { %v5731_v57 = vpop.eup %5730  ;;  %v2733_v37 = vadd.f32 1.0, %v5729_v26 }
0x1d8e   :  { %v2734_v1 = vadd.f32 1.0, %v5731_v57 }
0x1d8f   :  { %5732 = vrcp.f32 %v2733_v37 }
0x1d90   :  { %5734 = vrcp.f32 %v2734_v1 }
0x1d9c   :  { %v5733_v63 = vpop.eup %5732 }
0x1d9d   :  { %v5735_v38 = vpop.eup %5734  ;;  %v2741_v22 = vmul.f32 %v5733_v63, %v6728_v36 }
0x1d9e   :  { %v2742_v47 = vmul.f32 %v5735_v38, %v6732_v53 }
0x1dfc   :  { %v2746_v54 = vpop.permute.xlu1 %2745 }
0x1dfd   :  { %v2751_v55 = vmul.f32 %v5733_v63, %v2746_v54 }
0x1dfe   :  { %v2748_v27 = vpop.permute.xlu0 %2747 }
0x1dff   :  { %2755 = vrot.lane.b32.xlu1 %v2751_v55, %s5906_s24  ;;  %v2752_v21 = vmul.f32 %v5735_v38, %v2748_v27 }
0x1e01   :  { %2757 = vrot.lane.b32.xlu0 %v2752_v21, %s5906_s24 }
0x1e71   :  { %v2756_v60 = vpop.permute.xlu1 %2755 }
0x1e72   :  { %v6760_v58 = vadd.f32 %v2756_v60, %v2741_v22 }
0x1e73   :  { %v2758_v8 = vpop.permute.xlu0 %2757 }
0x1e74   :  { %5736 = vtanh.f32 %v6760_v58  ;;  %v6764_v14 = vadd.f32 %v2758_v8, %v2742_v47 }
0x1e76   :  { %5738 = vtanh.f32 %v6764_v14 }
0x1e81   :  { %v5737_v3 = vpop.eup %5736 }
0x1e82   :  { %2767 = vrot.lane.b32.xlu1 %v5737_v3, %s5906_s24 }
0x1e83   :  { %v5739_v20 = vpop.eup %5738 }
0x1e84   :  { %2769 = vrot.lane.b32.xlu0 %v5739_v20, %s5906_s24 }
0x1ef4   :  { %v2768_v29 = vpop.permute.xlu1 %2767 }
0x1ef5   :  { %v2773_v36 = vmul.f32 %v5733_v63, %v2768_v29 }
0x1ef6   :  { %v2770_v48 = vpop.permute.xlu0 %2769 }
0x1ef7   :  { %v2776_v32 = vpack.c.bf16 %v2773_v36, %v2773_v36  ;;  %v2774_v33 = vmul.f32 %v5735_v38, %v2770_v48 }
0x1ef9   :  { %2778 = vrot.lane.b32.xlu1 %v2776_v32, %s5907_s25  ;;  %v2825_v53 = vpack.c.bf16 %v2774_v33, %v2774_v33 }
0x1efb   :  { %2827 = vrot.lane.b32.xlu0 %v2825_v53, %s5907_s25 }
0x1f6b   :  { %v2779_v30 = vpop.permute.xlu1 %2778 }
0x1f6c   :  { %5300 = vmatmul.mubr.msk.bf16.vlgmr.msra.gmra.mxu0 %vm762_vm9, %v2779_v30 }
0x1f6d   :  { %5312 = vmatpush3.bf16.msra.mxu0 %v6604_v46  ;;  %5315 = vmatprep.mubr.msk.bf16.mxu0 %vm5896_vm13, %v5891_v0  ;;  %v2828_v51 = vpop.permute.xlu0 %2827 }
0x1f6e   :  { %5313 = vmatprep.subr.bf16.mxu0 %v5891_v0  ;;  %5308 = vmatmul.mubr.msk.bf16.vlgmr.msra.gmra.mxu1 %vm762_vm9, %v2828_v51 }
0x1f6f   :  { %5320 = vmatpush3.bf16.msra.mxu1 %v6579_v24  ;;  %5323 = vmatprep.mubr.msk.bf16.mxu1 %vm5896_vm13, %v5891_v0 }
0x1f70   :  { %5321 = vmatprep.subr.bf16.mxu1 %v5891_v0 }
0x1f71   :  { %5314 = vmatpush3.bf16.msra.mxu0 %v6611_v2 }
0x1f72   :  { %5327 = vmatprep.subr.bf16.mxu0 %v5891_v0 }
0x1f73   :  { %5322 = vmatpush3.bf16.msra.mxu1 %v6588_v61 }
0x1f74   :  { %5335 = vmatprep.subr.bf16.mxu1 %v5891_v0 }
0x202c   :  { %v2817_v11 = vpop.f32.mrf.mxu0 }
0x202d   :  { %v2823_v62 = vadd.f32 %v2817_v11, %v6670_v10 }
0x202e   :  { %v5301_v13 = vpop.f32.mrf.mxu0  ;;  %v2866_v19 = vpop.f32.mrf.mxu1 }
0x202f   :  { %5740 = vtanh.f32 %v2823_v62  ;;  %v2872_v12 = vadd.f32 %v2866_v19, %v6678_v18  ;;  %v4900_v34 = vmul.f32 -1.442695, %v2823_v62 }
0x2030   :  { %v2820_v4 = vpop.f32.mrf.mxu0  ;;  %v5309_v56 = vpop.f32.mrf.mxu1 }
0x2031   :  { %5742 = vtanh.f32 %v2872_v12  ;;  %v4901_v26 = vmul.f32 -1.442695, %v2872_v12 }
0x2032   :  { %v5302_v31 = vpop.f32.mrf.mxu0  ;;  %v2869_v39 = vpop.f32.mrf.mxu1  ;;  %5744 = vpow2.f32 %v4900_v34 }
0x2033   :  { %5746 = vpow2.f32 %v4901_v26 }
0x2034   :  { %v5310_v40 = vpop.f32.mrf.mxu1 }
0x203c   :  { %v5741_v28 = vpop.eup %5740 }
0x203d   :  { %2891 = vrot.lane.b32.xlu1 %v5741_v28, %s5906_s24 }
0x203e   :  { %v5743_v23 = vpop.eup %5742 }
0x203f   :  { %2893 = vrot.lane.b32.xlu0 %v5743_v23, %s5906_s24  ;;  %v5745_v10 = vpop.eup %5744 }
0x2040   :  { %v5747_v57 = vpop.eup %5746  ;;  %v2879_v37 = vadd.f32 1.0, %v5745_v10 }
0x2041   :  { %v2880_v18 = vadd.f32 1.0, %v5747_v57 }
0x2042   :  { %5748 = vrcp.f32 %v2879_v37 }
0x2043   :  { %5750 = vrcp.f32 %v2880_v18 }
0x204f   :  { %v5749_v1 = vpop.eup %5748 }
0x2050   :  { %v5751_v55 = vpop.eup %5750  ;;  %v2887_v21 = vmul.f32 %v5749_v1, %v6760_v58 }
0x2051   :  { %v2888_v47 = vmul.f32 %v5751_v55, %v6764_v14 }
0x20af   :  { %v2892_v63 = vpop.permute.xlu1 %2891 }
0x20b0   :  { %v2897_v54 = vmul.f32 %v5749_v1, %v2892_v63 }
0x20b1   :  { %v2894_v38 = vpop.permute.xlu0 %2893 }
0x20b2   :  { %2901 = vrot.lane.b32.xlu1 %v2897_v54, %s5906_s24  ;;  %v2898_v27 = vmul.f32 %v5751_v55, %v2894_v38 }
0x20b4   :  { %2903 = vrot.lane.b32.xlu0 %v2898_v27, %s5906_s24 }
0x2124   :  { %v2902_v22 = vpop.permute.xlu1 %2901 }
0x2125   :  { %v6792_v60 = vadd.f32 %v2902_v22, %v2887_v21 }
0x2126   :  { %v2904_v8 = vpop.permute.xlu0 %2903 }
0x2127   :  { %5752 = vtanh.f32 %v6792_v60  ;;  %v6796_v3 = vadd.f32 %v2904_v8, %v2888_v47 }
0x2129   :  { %5754 = vtanh.f32 %v6796_v3 }
0x2134   :  { %v5753_v20 = vpop.eup %5752 }
0x2135   :  { %2913 = vrot.lane.b32.xlu1 %v5753_v20, %s5906_s24 }
0x2136   :  { %v5755_v29 = vpop.eup %5754 }
0x2137   :  { %2915 = vrot.lane.b32.xlu0 %v5755_v29, %s5906_s24 }
0x21a7   :  { %v2914_v36 = vpop.permute.xlu1 %2913 }
0x21a8   :  { %v2919_v58 = vmul.f32 %v5749_v1, %v2914_v36 }
0x21a9   :  { %v2916_v48 = vpop.permute.xlu0 %2915 }
0x21aa   :  { %v2922_v32 = vpack.c.bf16 %v2919_v58, %v2919_v58  ;;  %v2920_v33 = vmul.f32 %v5751_v55, %v2916_v48 }
0x21ac   :  { %2924 = vrot.lane.b32.xlu1 %v2922_v32, %s5907_s25  ;;  %v2971_v14 = vpack.c.bf16 %v2920_v33, %v2920_v33 }
0x21ae   :  { %2973 = vrot.lane.b32.xlu0 %v2971_v14, %s5907_s25 }
0x221e   :  { %v2925_v53 = vpop.permute.xlu1 %2924 }
0x221f   :  { %5316 = vmatmul.mubr.msk.bf16.vlgmr.msra.gmra.mxu0 %vm762_vm9, %v2925_v53 }
0x2220   :  { %5328 = vmatpush3.bf16.msra.mxu0 %v6604_v46  ;;  %5331 = vmatprep.mubr.msk.bf16.mxu0 %vm5896_vm13, %v5891_v0  ;;  %v2974_v30 = vpop.permute.xlu0 %2973 }
0x2221   :  { %5329 = vmatprep.subr.bf16.mxu0 %v5891_v0  ;;  %5324 = vmatmul.mubr.msk.bf16.vlgmr.msra.gmra.mxu1 %vm762_vm9, %v2974_v30 }
0x2222   :  { %5336 = vmatpush3.bf16.msra.mxu1 %v6579_v24  ;;  %5339 = vmatprep.mubr.msk.bf16.mxu1 %vm5896_vm13, %v5891_v0 }
0x2223   :  { %5337 = vmatprep.subr.bf16.mxu1 %v5891_v0 }
0x2224   :  { %5330 = vmatpush3.bf16.msra.mxu0 %v6611_v2 }
0x2225   :  { %5343 = vmatprep.subr.bf16.mxu0 %v5891_v0 }
0x2226   :  { %5338 = vmatpush3.bf16.msra.mxu1 %v6588_v61 }
0x2227   :  { %5351 = vmatprep.subr.bf16.mxu1 %v5891_v0 }
0x22df   :  { %v2963_v51 = vpop.f32.mrf.mxu0 }
0x22e0   :  { %v2969_v11 = vadd.f32 %v2963_v51, %v6675_v44 }
0x22e1   :  { %v5317_v62 = vpop.f32.mrf.mxu0  ;;  %v3012_v13 = vpop.f32.mrf.mxu1 }
0x22e2   :  { %5756 = vtanh.f32 %v2969_v11  ;;  %v3018_v19 = vadd.f32 %v3012_v13, %v6673_v35  ;;  %v4904_v23 = vmul.f32 -1.442695, %v2969_v11 }
0x22e3   :  { %v2966_v12 = vpop.f32.mrf.mxu0  ;;  %v5325_v4 = vpop.f32.mrf.mxu1 }
0x22e4   :  { %5758 = vtanh.f32 %v3018_v19  ;;  %v4905_v34 = vmul.f32 -1.442695, %v3018_v19 }
0x22e5   :  { %v5318_v56 = vpop.f32.mrf.mxu0  ;;  %v3015_v31 = vpop.f32.mrf.mxu1  ;;  %5760 = vpow2.f32 %v4904_v23 }
0x22e6   :  { %5762 = vpow2.f32 %v4905_v34 }
0x22e7   :  { %v5326_v39 = vpop.f32.mrf.mxu1 }
0x22ef   :  { %v5757_v40 = vpop.eup %5756 }
0x22f0   :  { %3037 = vrot.lane.b32.xlu1 %v5757_v40, %s5906_s24 }
0x22f1   :  { %v5759_v28 = vpop.eup %5758 }
0x22f2   :  { %3039 = vrot.lane.b32.xlu0 %v5759_v28, %s5906_s24  ;;  %v5761_v44 = vpop.eup %5760 }
0x22f3   :  { %v5763_v26 = vpop.eup %5762  ;;  %v3025_v10 = vadd.f32 1.0, %v5761_v44 }
0x22f4   :  { %v3026_v35 = vadd.f32 1.0, %v5763_v26 }
0x22f5   :  { %5764 = vrcp.f32 %v3025_v10 }
0x22f6   :  { %5766 = vrcp.f32 %v3026_v35 }
0x2302   :  { %v5765_v57 = vpop.eup %5764 }
0x2303   :  { %v5767_v1 = vpop.eup %5766  ;;  %v3033_v55 = vmul.f32 %v5765_v57, %v6792_v60 }
0x2304   :  { %v3034_v21 = vmul.f32 %v5767_v1, %v6796_v3 }
0x2362   :  { %v3038_v37 = vpop.permute.xlu1 %3037 }
0x2363   :  { %v3043_v18 = vmul.f32 %v5765_v57, %v3038_v37 }
0x2364   :  { %v3040_v63 = vpop.permute.xlu0 %3039 }
0x2365   :  { %3047 = vrot.lane.b32.xlu1 %v3043_v18, %s5906_s24  ;;  %v3044_v54 = vmul.f32 %v5767_v1, %v3040_v63 }
0x2367   :  { %3049 = vrot.lane.b32.xlu0 %v3044_v54, %s5906_s24 }
0x23d7   :  { %v3048_v38 = vpop.permute.xlu1 %3047 }
0x23d8   :  { %v6824_v27 = vadd.f32 %v3048_v38, %v3033_v55 }
0x23d9   :  { %v3050_v22 = vpop.permute.xlu0 %3049 }
0x23da   :  { %5768 = vtanh.f32 %v6824_v27  ;;  %v6828_v47 = vadd.f32 %v3050_v22, %v3034_v21 }
0x23dc   :  { %5770 = vtanh.f32 %v6828_v47 }
0x23e7   :  { %v5769_v8 = vpop.eup %5768 }
0x23e8   :  { %3059 = vrot.lane.b32.xlu1 %v5769_v8, %s5906_s24  ;;  %v5886_v8 = vld [vmem:[%s6561_s7 + $0x8] sm:$0xff]  }
0x23e9   :  { %v5771_v20 = vpop.eup %5770 }
0x23ea   :  { %3061 = vrot.lane.b32.xlu0 %v5771_v20, %s5906_s24 }
0x245a   :  { %v3060_v29 = vpop.permute.xlu1 %3059 }
0x245b   :  { %v3065_v60 = vmul.f32 %v5765_v57, %v3060_v29  ;;  %v5887_v29 = vld [vmem:[%s6566_s11 + $0x8] sm:$0xff]  }
0x245c   :  { %v3062_v58 = vpop.permute.xlu0 %3061 }
0x245d   :  { %v3068_v36 = vpack.c.bf16 %v3065_v60, %v3065_v60  ;;  %v3066_v32 = vmul.f32 %v5767_v1, %v3062_v58  ;;  %v5888_v60 = vld [vmem:[%s6561_s7] sm:$0xff]  }
0x245f   :  { %3070 = vrot.lane.b32.xlu1 %v3068_v36, %s5907_s25  ;;  %v3117_v3 = vpack.c.bf16 %v3066_v32, %v3066_v32  ;;  %v5889_v36 = vld [vmem:[%s6566_s11] sm:$0xff]  }
0x2461   :  { %3119 = vrot.lane.b32.xlu0 %v3117_v3, %s5907_s25 }
0x24d1   :  { %v3071_v48 = vpop.permute.xlu1 %3070 }
0x24d2   :  { %5332 = vmatmul.mubr.msk.bf16.vlgmr.msra.gmra.mxu0 %vm762_vm9, %v3071_v48 }
0x24d3   :  { %5344 = vmatpush3.bf16.msra.mxu0 %v6604_v46  ;;  %5347 = vmatprep.mubr.msk.bf16.mxu0 %vm5896_vm13, %v5891_v0  ;;  %v3120_v33 = vpop.permute.xlu0 %3119 }
0x24d4   :  { %5345 = vmatprep.subr.bf16.mxu0 %v5891_v0  ;;  %5340 = vmatmul.mubr.msk.bf16.vlgmr.msra.gmra.mxu1 %vm762_vm9, %v3120_v33 }
0x24d5   :  { %5352 = vmatpush3.bf16.msra.mxu1 %v6579_v24  ;;  %5355 = vmatprep.mubr.msk.bf16.mxu1 %vm5896_vm13, %v5891_v0 }
0x24d6   :  { %5353 = vmatprep.subr.bf16.mxu1 %v5891_v0 }
0x24d7   :  { %5346 = vmatpush3.bf16.msra.mxu0 %v6611_v2 }
0x24d8   :  { %5359 = vmatprep.subr.bf16.mxu0 %v5891_v0 }
0x24d9   :  { %5354 = vmatpush3.bf16.msra.mxu1 %v6588_v61 }
0x24da   :  { %5367 = vmatprep.subr.bf16.mxu1 %v5891_v0 }
0x2592   :  { %v3109_v46 = vpop.f32.mrf.mxu0 }
0x2593   :  { %v3115_v14 = vadd.f32 %v3109_v46, %v6680_v49 }
0x2594   :  { %v5333_v53 = vpop.f32.mrf.mxu0  ;;  %v3158_v30 = vpop.f32.mrf.mxu1 }
0x2595   :  { %5772 = vtanh.f32 %v3115_v14  ;;  %v3164_v24 = vadd.f32 %v3158_v30, %v6668_v7  ;;  %v4908_v12 = vmul.f32 -1.442695, %v3115_v14 }
0x2596   :  { %v3112_v51 = vpop.f32.mrf.mxu0  ;;  %v5341_v11 = vpop.f32.mrf.mxu1 }
0x2597   :  { %5774 = vtanh.f32 %v3164_v24  ;;  %v4909_v4 = vmul.f32 -1.442695, %v3164_v24 }
0x2598   :  { %v5334_v2 = vpop.f32.mrf.mxu0  ;;  %v3161_v62 = vpop.f32.mrf.mxu1  ;;  %5776 = vpow2.f32 %v4908_v12 }
0x2599   :  { %5778 = vpow2.f32 %v4909_v4 }
0x259a   :  { %v5342_v13 = vpop.f32.mrf.mxu1 }
0x25a2   :  { %v5773_v19 = vpop.eup %5772 }
0x25a3   :  { %3183 = vrot.lane.b32.xlu1 %v5773_v19, %s5906_s24 }
0x25a4   :  { %v5775_v61 = vpop.eup %5774 }
0x25a5   :  { %3185 = vrot.lane.b32.xlu0 %v5775_v61, %s5906_s24  ;;  %v5777_v49 = vpop.eup %5776 }
0x25a6   :  { %v5779_v56 = vpop.eup %5778  ;;  %v3171_v31 = vadd.f32 1.0, %v5777_v49 }
0x25a7   :  { %v3172_v7 = vadd.f32 1.0, %v5779_v56 }
0x25a8   :  { %5780 = vrcp.f32 %v3171_v31 }
0x25a9   :  { %5782 = vrcp.f32 %v3172_v7 }
0x25b5   :  { %v5781_v39 = vpop.eup %5780 }
0x25b6   :  { %v5783_v23 = vpop.eup %5782  ;;  %v3179_v26 = vmul.f32 %v5781_v39, %v6824_v27 }
0x25b7   :  { %v3180_v57 = vmul.f32 %v5783_v23, %v6828_v47 }
0x2615   :  { %v3184_v40 = vpop.permute.xlu1 %3183 }
0x2616   :  { %v3189_v28 = vmul.f32 %v5781_v39, %v3184_v40 }
0x2617   :  { %v3186_v34 = vpop.permute.xlu0 %3185 }
0x2618   :  { %3193 = vrot.lane.b32.xlu1 %v3189_v28, %s5906_s24  ;;  %v3190_v44 = vmul.f32 %v5783_v23, %v3186_v34 }
0x261a   :  { %3195 = vrot.lane.b32.xlu0 %v3190_v44, %s5906_s24 }
0x268a   :  { %v3194_v10 = vpop.permute.xlu1 %3193 }
0x268b   :  { %v6856_v35 = vadd.f32 %v3194_v10, %v3179_v26 }
0x268c   :  { %v3196_v37 = vpop.permute.xlu0 %3195 }
0x268d   :  { %5784 = vtanh.f32 %v6856_v35  ;;  %v6860_v18 = vadd.f32 %v3196_v37, %v3180_v57 }
0x268f   :  { %5786 = vtanh.f32 %v6860_v18 }
0x269a   :  { %v5785_v1 = vpop.eup %5784 }
0x269b   :  { %3205 = vrot.lane.b32.xlu1 %v5785_v1, %s5906_s24 }
0x269c   :  { %v5787_v63 = vpop.eup %5786 }
0x269d   :  { %3207 = vrot.lane.b32.xlu0 %v5787_v63, %s5906_s24 }
0x270d   :  { %v3206_v54 = vpop.permute.xlu1 %3205 }
0x270e   :  { %v3211_v55 = vmul.f32 %v5781_v39, %v3206_v54 }
0x270f   :  { %v3208_v27 = vpop.permute.xlu0 %3207 }
0x2710   :  { %v3214_v38 = vpack.c.bf16 %v3211_v55, %v3211_v55  ;;  %v3212_v21 = vmul.f32 %v5783_v23, %v3208_v27 }
0x2712   :  { %3216 = vrot.lane.b32.xlu1 %v3214_v38, %s5907_s25  ;;  %v3263_v22 = vpack.c.bf16 %v3212_v21, %v3212_v21 }
0x2714   :  { %3265 = vrot.lane.b32.xlu0 %v3263_v22, %s5907_s25 }
0x2784   :  { %v3217_v47 = vpop.permute.xlu1 %3216 }
0x2785   :  { %5348 = vmatmul.mubr.msk.bf16.vlgmr.msra.gmra.mxu0 %vm762_vm9, %v3217_v47 }
0x2786   :  { %5360 = vmatpush3.bf16.msra.mxu0 %v5886_v8  ;;  %5363 = vmatprep.mubr.msk.bf16.mxu0 %vm5896_vm13, %v5891_v0  ;;  %v3266_v20 = vpop.permute.xlu0 %3265 }
0x2787   :  { %5361 = vmatprep.subr.bf16.mxu0 %v5891_v0  ;;  %5356 = vmatmul.mubr.msk.bf16.vlgmr.msra.gmra.mxu1 %vm762_vm9, %v3266_v20 }
0x2788   :  { %5368 = vmatpush3.bf16.msra.mxu1 %v5887_v29  ;;  %5371 = vmatprep.mubr.msk.bf16.mxu1 %vm5896_vm13, %v5891_v0 }
0x2789   :  { %5369 = vmatprep.subr.bf16.mxu1 %v5891_v0 }
0x278a   :  { %5362 = vmatpush3.bf16.msra.mxu0 %v5888_v60 }
0x278b   :  { %5375 = vmatprep.subr.bf16.mxu0 %v5891_v0 }
0x278c   :  { %5370 = vmatpush3.bf16.msra.mxu1 %v5889_v36 }
0x278d   :  { %5383 = vmatprep.subr.bf16.mxu1 %v5891_v0 }
0x2845   :  { %v3255_v58 = vpop.f32.mrf.mxu0 }
0x2846   :  { %v3261_v32 = vadd.f32 %v3255_v58, %v6685_v15  ;;  %v5554_v58 = vld [vmem:[%s4788_s19 + $0x8] sm:$0xff]  }
0x2847   :  { %v5349_v3 = vpop.f32.mrf.mxu0  ;;  %v3304_v48 = vpop.f32.mrf.mxu1 }
0x2848   :  { %5788 = vtanh.f32 %v3261_v32  ;;  %v3310_v33 = vadd.f32 %v3304_v48, %v6663_v17  ;;  %v4912_v2 = vmul.f32 -1.442695, %v3261_v32 }
0x2849   :  { %v3258_v46 = vpop.f32.mrf.mxu0  ;;  %v5357_v14 = vpop.f32.mrf.mxu1 }
0x284a   :  { %5790 = vtanh.f32 %v3310_v33  ;;  %v4913_v62 = vmul.f32 -1.442695, %v3310_v33  ;;  %v5555_v14 = vld [vmem:[%s4787_s23 + $0x8] sm:$0xff]  }
0x284b   :  { %v5350_v53 = vpop.f32.mrf.mxu0  ;;  %v3307_v30 = vpop.f32.mrf.mxu1  ;;  %5792 = vpow2.f32 %v4912_v2 }
0x284c   :  { %5794 = vpow2.f32 %v4913_v62  ;;  %v5556_v53 = vld [vmem:[%s4788_s19] sm:$0xff]  }
0x284d   :  { %v5358_v24 = vpop.f32.mrf.mxu1  ;;  %v5557_v30 = vld [vmem:[%s4787_s23] sm:$0xff]  }
0x2855   :  { %v5789_v51 = vpop.eup %5788 }
0x2856   :  { %3329 = vrot.lane.b32.xlu1 %v5789_v51, %s5906_s24 }
0x2857   :  { %v5791_v11 = vpop.eup %5790 }
0x2858   :  { %3331 = vrot.lane.b32.xlu0 %v5791_v11, %s5906_s24  ;;  %v5793_v15 = vpop.eup %5792 }
0x2859   :  { %v5795_v13 = vpop.eup %5794  ;;  %v3317_v19 = vadd.f32 1.0, %v5793_v15 }
0x285a   :  { %v3318_v17 = vadd.f32 1.0, %v5795_v13  ;;  %v3502_v13 = vpack.c.bf16 %v6522_v50, %v6522_v50 }
0x285b   :  { %5796 = vrcp.f32 %v3317_v19  ;;  %v3497_v19 = vpack.c.bf16 %v6526_v25, %v6526_v25 }
0x285c   :  { %5798 = vrcp.f32 %v3318_v17 }
0x2868   :  { %v5797_v61 = vpop.eup %5796 }
0x2869   :  { %v5799_v49 = vpop.eup %5798  ;;  %v3325_v7 = vmul.f32 %v5797_v61, %v6856_v35 }
0x286a   :  { %v3326_v28 = vmul.f32 %v5799_v49, %v6860_v18 }
0x28c8   :  { %v3330_v12 = vpop.permute.xlu1 %3329 }
0x28c9   :  { %v3335_v4 = vmul.f32 %v5797_v61, %v3330_v12  ;;  %v5558_v12 = vld [vmem:[%s6921_s29 + $0x8] sm:$0xff]  }
0x28ca   :  { %v3332_v56 = vpop.permute.xlu0 %3331 }
0x28cb   :  { %3339 = vrot.lane.b32.xlu1 %v3335_v4, %s5906_s24  ;;  %v3336_v31 = vmul.f32 %v5799_v49, %v3332_v56 }
0x28cd   :  { %3341 = vrot.lane.b32.xlu0 %v3336_v31, %s5906_s24 }
0x293d   :  { %v3340_v39 = vpop.permute.xlu1 %3339 }
0x293e   :  { %v6888_v40 = vadd.f32 %v3340_v39, %v3325_v7  ;;  %v5559_v7 = vld [vmem:[%s6927_s3 + $0x8] sm:$0xff]  }
0x293f   :  { %v3342_v23 = vpop.permute.xlu0 %3341 }
0x2940   :  { %5800 = vtanh.f32 %v6888_v40  ;;  %v6892_v34 = vadd.f32 %v3342_v23, %v3326_v28  ;;  %v3838_v23 = vld [vmem:[%s4793_s12] sm:$0xf]  ;;  %s4797_s12 = sld [smem:[%s7229_s0 + %s5925_s9]]  }
0x2942   :  { %5802 = vtanh.f32 %v6892_v34 }
0x294d   :  { %v5801_v44 = vpop.eup %5800 }
0x294e   :  { %3351 = vrot.lane.b32.xlu1 %v5801_v44, %s5906_s24  ;;  %v3775_v44 = vld [vmem:[%s6965_s16] sm:$0xff] }
0x294f   :  { %v5803_v26 = vpop.eup %5802 }
0x2950   :  { %3353 = vrot.lane.b32.xlu0 %v5803_v26, %s5906_s24  ;;  %v3840_v26 = vsel %vm444_vm0, %v3838_v23, 0 }
0x29c0   :  { %v3352_v10 = vpop.permute.xlu1 %3351 }
0x29c1   :  { %v3357_v35 = vmul.f32 %v5797_v61, %v3352_v10  ;;  %v3930_v10 = vld [vmem:[%s4794_s20] sm:$0xf] }
0x29c2   :  { %v3354_v37 = vpop.permute.xlu0 %3353 }
0x29c3   :  { %v3360_v57 = vpack.c.bf16 %v3357_v35, %v3357_v35  ;;  %v3358_v1 = vmul.f32 %v5799_v49, %v3354_v37 }
0x29c5   :  { %3362 = vrot.lane.b32.xlu1 %v3360_v57, %s5907_s25  ;;  %v3409_v18 = vpack.c.bf16 %v3358_v1, %v3358_v1  ;;  %v3932_v57 = vsel %vm444_vm0, %v3930_v10, 0  ;;  %v6983_v1 = vld [vmem:[%s6941_s8 + $0x8] sm:$0xff]  }
0x29c7   :  { %3411 = vrot.lane.b32.xlu0 %v3409_v18, %s5907_s25 }
0x2a37   :  { %v3363_v63 = vpop.permute.xlu1 %3362 }
0x2a38   :  { %5364 = vmatmul.mubr.msk.bf16.vlgmr.msra.gmra.mxu0 %vm762_vm9, %v3363_v63 }
0x2a39   :  { %5379 = vmatprep.mubr.msk.bf16.mxu0 %vm5896_vm13, %v5891_v0  ;;  %v3412_v54 = vpop.permute.xlu0 %3411  ;;  %5376 = vmatpush3.bf16.msra.mxu0 %v5554_v58 }
0x2a3a   :  { %5372 = vmatmul.mubr.msk.bf16.vlgmr.msra.gmra.mxu1 %vm762_vm9, %v3412_v54  ;;  %5377 = vmatprep.subr.bf16.mxu0 %v5891_v0 }
0x2a3b   :  { %5387 = vmatprep.mubr.msk.bf16.mxu1 %vm5896_vm13, %v5891_v0  ;;  %5384 = vmatpush3.bf16.msra.mxu1 %v5555_v14 }
0x2a3c   :  { %5385 = vmatprep.subr.bf16.mxu1 %v5891_v0 }
0x2a3d   :  { %5378 = vmatpush3.bf16.msra.mxu0 %v5556_v53 }
0x2a3e   :  { %5391 = vmatprep.subr.bf16.mxu0 %v5891_v0 }
0x2a3f   :  { %5386 = vmatpush3.bf16.msra.mxu1 %v5557_v30 }
0x2a40   :  { %5399 = vmatprep.subr.bf16.mxu1 %v5891_v0 }
0x2af8   :  { %v3401_v55 = vpop.f32.mrf.mxu0 }
0x2af9   :  { %v3407_v38 = vadd.f32 %v3401_v55, %v6690_v45 }
0x2afa   :  { %v5365_v27 = vpop.f32.mrf.mxu0  ;;  %v3450_v21 = vpop.f32.mrf.mxu1 }
0x2afb   :  { %5804 = vtanh.f32 %v3407_v38  ;;  %v3456_v22 = vadd.f32 %v3450_v21, %v6658_v59  ;;  %v4916_v59 = vmul.f32 -1.442695, %v3407_v38 }
0x2afc   :  { %v3404_v47 = vpop.f32.mrf.mxu0  ;;  %v5373_v8 = vpop.f32.mrf.mxu1 }
0x2afd   :  { %5806 = vtanh.f32 %v3456_v22  ;;  %v4917_v32 = vmul.f32 -1.442695, %v3456_v22  ;;  %v4930_v47 = vld [vmem:[%s4791_s26] ss:$0 sm:$0xff] }
0x2afe   :  { %v5366_v20 = vpop.f32.mrf.mxu0  ;;  %v3453_v29 = vpop.f32.mrf.mxu1  ;;  %5808 = vpow2.f32 %v4916_v59 }
0x2aff   :  { %5810 = vpow2.f32 %v4917_v32  ;;  %v7028_v29 = vld [vmem:[%s4792_s30] ss:$0 sm:$0xff] }
0x2b00   :  { %v5374_v60 = vpop.f32.mrf.mxu1 }
0x2b08   :  { %v5805_v36 = vpop.eup %5804 }
0x2b09   :  { %3475 = vrot.lane.b32.xlu1 %v5805_v36, %s5906_s24 }
0x2b0a   :  { %v5807_v45 = vpop.eup %5806 }
0x2b0b   :  { %3477 = vrot.lane.b32.xlu0 %v5807_v45, %s5906_s24  ;;  %v5809_v3 = vpop.eup %5808 }
0x2b0c   :  { %v5811_v48 = vpop.eup %5810  ;;  %v3463_v33 = vadd.f32 1.0, %v5809_v3 }
0x2b0d   :  { %v3464_v46 = vadd.f32 1.0, %v5811_v48 }
0x2b0e   :  { %5812 = vrcp.f32 %v3463_v33 }
0x2b0f   :  { %5814 = vrcp.f32 %v3464_v46 }
0x2b1b   :  { %v5813_v24 = vpop.eup %5812 }
0x2b1c   :  { %v5815_v2 = vpop.eup %5814  ;;  %v3471_v17 = vmul.f32 %v5813_v24, %v6888_v40  ;;  %v5560_v40 = vld [vmem:[%s6921_s29] sm:$0xff]  }
0x2b1d   :  { %v3472_v25 = vmul.f32 %v5815_v2, %v6892_v34  ;;  %v5561_v34 = vld [vmem:[%s6927_s3] sm:$0xff]   ;;  %s4800_s3 = sld [smem:[%s7229_s0 + %s5906_s24]]  }
0x2b7b   :  { %v3476_v51 = vpop.permute.xlu1 %3475 }
0x2b7c   :  { %v3481_v11 = vmul.f32 %v5813_v24, %v3476_v51 }
0x2b7d   :  { %v3478_v62 = vpop.permute.xlu0 %3477 }
0x2b7e   :  { %3485 = vrot.lane.b32.xlu1 %v3481_v11, %s5906_s24  ;;  %v3482_v15 = vmul.f32 %v5815_v2, %v3478_v62 }
0x2b80   :  { %3487 = vrot.lane.b32.xlu0 %v3482_v15, %s5906_s24 }
0x2b82   :  { %3504 = vrot.lane.b32.xlu1 %v3502_v13, %s5917_s4 }
0x2b84   :  { %3562 = vrot.lane.b32.xlu0 %v3497_v19, %s5917_s4 }
0x2bf0   :  { %v3486_v50 = vpop.permute.xlu1 %3485 }
0x2bf1   :  { %v3491_v61 = vadd.f32 %v3486_v50, %v3471_v17 }
0x2bf2   :  { %v3488_v49 = vpop.permute.xlu0 %3487 }
0x2bf3   :  { %v3623_v4 = vpack.c.bf16 %v3491_v61, %v3491_v61  ;;  %v3492_v56 = vadd.f32 %v3488_v49, %v3472_v25 }
0x2bf4   :  { %v3505_v31 = vpop.permute.xlu1 %3504 }
0x2bf5   :  { %5380 = vmatmul.mubr.msk.bf16.vlgmr.msra.gmra.mxu0 %vm762_vm9, %v3505_v31  ;;  %3625 = vrot.lane.b32.xlu1 %v3623_v4, %s5917_s4  ;;  %v3687_v39 = vpack.c.bf16 %v3492_v56, %v3492_v56 }
0x2bf6   :  { %5392 = vmatpush3.bf16.msra.mxu0 %v5558_v12  ;;  %5395 = vmatprep.mubr.msk.bf16.mxu0 %vm5896_vm13, %v5891_v0  ;;  %v3563_v28 = vpop.permute.xlu0 %3562 }
0x2bf7   :  { %5393 = vmatprep.subr.bf16.mxu0 %v5891_v0  ;;  %5388 = vmatmul.mubr.msk.bf16.vlgmr.msra.gmra.mxu1 %vm762_vm9, %v3563_v28 }
0x2bf8   :  { %3689 = vrot.lane.b32.xlu0 %v3687_v39, %s5917_s4  ;;  %5400 = vmatpush3.bf16.msra.mxu1 %v5559_v7 }
0x2bf9   :  { %5403 = vmatprep.mubr.msk.bf16.mxu1 %vm5896_vm13, %v5891_v0  ;;  %5401 = vmatprep.subr.bf16.mxu1 %v5891_v0 }
0x2bfa   :  { %5394 = vmatpush3.bf16.msra.mxu0 %v5560_v40  ;;  %3786 = vperm.xlu1 %5528, %v3775_v44  }
0x2bfb   :  { %5488 = vmatprep.subr.msk.bf16.mxu0 %vm444_vm0, %v3838_v23  ;;  %v3776_v23 = vld [vmem:[%s6965_s16 + $0x8] sm:$0xff] }
0x2bfc   :  { %5402 = vmatpush3.bf16.msra.mxu1 %v5561_v34 }
0x2bfd   :  { %5417 = vmatprep.subr.bf16.mxu1 %v5891_v0 }
0x2c67   :  { %v3626_v35 = vpop.permute.xlu1 %3625 }
0x2c68   :  { %5396 = vmatmul.mubr.msk.bf16.vlgmr.msra.gmra.mxu0 %vm762_vm9, %v3626_v35 }
0x2c69   :  { %5409 = vmatprep.mubr.msk.bf16.mxu0 %vm431_vm8, %v6154_v52  ;;  %5408 = vmatpush3.bf16.msra.mxu0 %v3840_v26  ;;  %v6994_v52 = vld [vmem:[%s6941_s8] sm:$0xff]   ;;  %s4795_s8 = sld [smem:[%s7229_s0 + %s5924_s5]]  }
0x2c6a   :  { %v3690_v37 = vpop.permute.xlu0 %3689  ;;  %5431 = vmatprep.subr.bf16.mxu0 %v5891_v0 }
0x2c6b   :  { %5404 = vmatmul.mubr.msk.bf16.vlgmr.msra.gmra.mxu1 %vm762_vm9, %v3690_v37 }
0x2c6c   :  { %5418 = vmatpush3.bf16.msra.mxu1 %v3932_v57  ;;  %5419 = vmatprep.mubr.msk.bf16.mxu1 %vm5896_vm13, %v5891_v0 }
0x2c6d   :  { %5423 = vmatprep.subr.bf16.mxu1 %v5891_v0 }
0x2c6f   :  { %v7039_v14 = vld [vmem:[%s4795_s8] ss:$0 sm:$0xff] }
0x2c70   :  { %5410 = vmatmul.mubr.msk.bf16.vlgmr.msra.gmra.mxu0 %vm431_vm8, %v6143_v43 }
0x2c71   :  { %5413 = vmatprep.mubr.msk.bf16.mxu0 %vm431_vm8, %v6166_v9  ;;  %5432 = vmatpush3.bf16.msra.mxu0 %v6983_v1 }
0x2c72   :  { %5433 = vmatprep.subr.bf16.mxu0 %v5891_v0 }
0x2c73   :  { %5420 = vmatmul.mubr.msk.bf16.vlgmr.msra.gmra.mxu1 %vm431_vm8, %v6186_v16 }
0x2c74   :  { %5424 = vmatpush3.bf16.msra.mxu1 %v6983_v1  ;;  %5427 = vmatprep.mubr.msk.bf16.mxu1 %vm5896_vm13, %v5891_v0 }
0x2c75   :  { %5425 = vmatprep.subr.bf16.mxu1 %v5891_v0  ;;  %5434 = vmatpush3.bf16.msra.mxu0 %v6994_v52  ;;  %v3787_v60 = vpop.permute.xlu1 %3786 }
0x2c76   :  { %5447 = vmatprep.subr.bf16.mxu0 %v5891_v0  ;;  %v3830_v32 = vmul.f32 %v7028_v29, %v3787_v60 }
0x2c78   :  { %5426 = vmatpush3.bf16.msra.mxu1 %v6994_v52  ;;  %5414 = vmatmul.mubr.msk.bf16.gmra.mxu0 %vm431_vm8, %v6164_v5 }
0x2c79   :  { %5435 = vmatprep.mubr.msk.bf16.mxu0 %vm5896_vm13, %v5891_v0  ;;  %5439 = vmatprep.subr.bf16.mxu1 %v5891_v0 }
0x2c7b   :  { %5428 = vmatmul.mubr.bf16.vlgmr.msra.gmra.mxu1 %v5899_v6 }
0x2c7c   :  { %5440 = vmatpush3.bf16.msra.mxu1 %v6983_v1  ;;  %5443 = vmatprep.mubr.msk.bf16.mxu1 %vm5896_vm13, %v5891_v0 }
0x2c7d   :  { %5441 = vmatprep.subr.bf16.mxu1 %v5891_v0 }
0x2c80   :  { %5442 = vmatpush3.bf16.msra.mxu1 %v6994_v52 }
0x2c81   :  { %5455 = vmatprep.subr.bf16.mxu1 %v5891_v0 }
0x2cb5   :  { %v3555_v43 = vpop.f32.mrf.mxu0 }
0x2cb7   :  { %v5381_v5 = vpop.f32.mrf.mxu0  ;;  %v3613_v9 = vpop.f32.mrf.mxu1 }
0x2cb8   :  { %v3614_v16 = vadd.f32 %v3613_v9, %v3555_v43 }
0x2cb9   :  { %v3558_v18 = vpop.f32.mrf.mxu0  ;;  %v5389_v63 = vpop.f32.mrf.mxu1 }
0x2cbb   :  { %v5382_v54 = vpop.f32.mrf.mxu0  ;;  %v3616_v55 = vpop.f32.mrf.mxu1 }
0x2cbd   :  { %v5390_v6 = vpop.f32.mrf.mxu1 }
0x2d28   :  { %v3676_v38 = vpop.f32.mrf.mxu0 }
0x2d29   :  { %v3682_v27 = vadd.f32 %v3676_v38, %v3614_v16 }
0x2d2a   :  { %v5397_v21 = vpop.f32.mrf.mxu0 }
0x2d2b   :  { %v3740_v22 = vpop.f32.mrf.mxu1 }
0x2d2c   :  { %v3746_v8 = vadd.f32 %v3740_v22, %v3682_v27  ;;  %v3679_v20 = vpop.f32.mrf.mxu0 }
0x2d2d   :  { %v5405_v36 = vpop.f32.mrf.mxu1 }
0x2d2e   :  { %v7030_v45 = vadd.f32 %v4930_v47, %v3746_v8  ;;  %v5398_v58 = vpop.f32.mrf.mxu0 }
0x2d2f   :  { %v3743_v59 = vpop.f32.mrf.mxu1 }
0x2d30   :  { %3769 = vst.msk [vmem:[%s4800_s3] sm:$0xff] %vm762_vm9, %v7030_v45  ;;  %4056 = vrot.lane.b32.xlu1 %v7030_v45, %s5906_s24  ;;  %v7037_v3 = vpop.f32.mrf.mxu0  ;;  %vm3755_vm11 = vcmp.gt.f32.partialorder %v7030_v45, 20.0 }
0x2d31   :  { %v5406_v48 = vpop.f32.mrf.mxu1 }
0x2d32   :  { %v3876_v33 = vpop.f32.mrf.mxu0 }
0x2d33   :  { %v3907_v46 = vadd.f32 %v3876_v33, %v3830_v32  ;;  %v7041_v53 = vpop.f32.mrf.mxu1 }
0x2d34   :  { %v7061_v35 = vpop.f32.mrf.mxu0 }
0x2d35   :  { %v5421_v30 = vpop.f32.mrf.mxu1  ;;  %v3922_v24 = vadd.f32 %v7039_v14, %v3907_v46 }
0x2d36   :  { %v3879_v57 = vpop.f32.mrf.mxu0  ;;  %v3777_v30 = vld [vmem:[%s6965_s16 + $0x10] sm:$0xff] }
0x2d37   :  { %v3971_v51 = vpop.f32.mrf.mxu1  ;;  %v3974_v2 = vadd.f32 %v7041_v53, %v3922_v24 }
0x2d38   :  { %v7063_v43 = vpop.f32.mrf.mxu0 }
0x2d39   :  { %v5422_v11 = vpop.f32.mrf.mxu1 }
0x2d3a   :  { %v7066_v9 = vpop.f32.mrf.mxu0 }
0x2d3b   :  { %v4041_v62 = vpop.f32.mrf.mxu1 }
0x2d3c   :  { %v4047_v15 = vadd.f32 %v4041_v62, %v3974_v2  ;;  %v7068_v18 = vpop.f32.mrf.mxu0 }
0x2d3d   :  { %v5429_v13 = vpop.f32.mrf.mxu1 }
0x2d3e   :  { %5816 = vtanh.f32 %v4047_v15  ;;  %v4940_v61 = vmul.f32 -1.442695, %v4047_v15  ;;  %v7071_v54 = vpop.f32.mrf.mxu0 }
0x2d3f   :  { %v4044_v19 = vpop.f32.mrf.mxu1 }
0x2d40   :  { %5818 = vpow2.f32 %v4940_v61 }
0x2d41   :  { %v5430_v17 = vpop.f32.mrf.mxu1 }
0x2d4b   :  { %v5817_v50 = vpop.eup %5816 }
0x2d4c   :  { %4061 = vrot.lane.b32.xlu0 %v5817_v50, %s5906_s24 }
0x2d4d   :  { %v5819_v25 = vpop.eup %5818 }
0x2d4e   :  { %v4051_v12 = vadd.f32 1.0, %v5819_v25 }
0x2d50   :  { %5820 = vrcp.f32 %v4051_v12 }
0x2d5d   :  { %v5821_v4 = vpop.eup %5820 }
0x2da2   :  { %v4057_v31 = vpop.permute.xlu1 %4056 }
0x2da3   :  { %v4059_v7 = vmul.f32 %v5821_v4, %v4057_v31 }
0x2dbe   :  { %v4062_v49 = vpop.permute.xlu0 %4061 }
0x2dbf   :  { %v4064_v56 = vmul.f32 %v5821_v4, %v4062_v49 }
0x2dc1   :  { %4066 = vrot.lane.b32.xlu0 %v4064_v56, %s5906_s24 }
0x2e33   :  { %v4067_v39 = vpop.permute.xlu0 %4066 }
0x2e34   :  { %v4069_v40 = vadd.f32 %v4067_v39, %v4059_v7 }
0x2e36   :  { %5822 = vtanh.f32 %v4069_v40 }
0x2e43   :  { %v5823_v28 = vpop.eup %5822 }
0x2e44   :  { %4072 = vrot.lane.b32.xlu1 %v5823_v28, %s5906_s24 }
0x2e48   :  { %3791 = vperm.xlu1 %5528, %v3776_v23  }
0x2eb6   :  { %v4073_v34 = vpop.permute.xlu1 %4072 }
0x2eb7   :  { %v7049_v44 = vmul.f32 %v5821_v4, %v4073_v34 }
0x2eb9   :  { %v4082_v26 = vpack.c.bf16 %v7049_v44, %v7049_v44 }
0x2ebb   :  { %4084 = vrot.lane.b32.xlu0 %v4082_v26, %s5907_s25 }
0x2ec3   :  { %v3792_v37 = vpop.permute.xlu1 %3791 }
0x2ec4   :  { %v3831_v5 = vmul.f32 %v7028_v29, %v3792_v37 }
0x2ec6   :  { %v3908_v16 = vadd.f32 %v3879_v57, %v3831_v5 }
0x2ec8   :  { %v3923_v63 = vadd.f32 %v7039_v14, %v3908_v16 }
0x2eca   :  { %v3975_v55 = vadd.f32 %v7041_v53, %v3923_v63 }
0x2f2d   :  { %v4085_v10 = vpop.permute.xlu0 %4084 }
0x2f2e   :  { %5436 = vmatmul.mubr.msk.bf16.vlgmr.msra.gmra.mxu0 %vm762_vm9, %v4085_v10  ;;  %v3778_v10 = vld [vmem:[%s6965_s16 + $0x18] sm:$0xff] }
0x2f2f   :  { %5448 = vmatpush3.bf16.msra.mxu0 %v6983_v1  ;;  %5451 = vmatprep.mubr.msk.bf16.mxu0 %vm5896_vm13, %v5891_v0 }
0x2f30   :  { %5449 = vmatprep.subr.bf16.mxu0 %v5891_v0 }
0x2f33   :  { %5450 = vmatpush3.bf16.msra.mxu0 %v6994_v52 }
0x2f34   :  { %5463 = vmatprep.subr.bf16.mxu0 %v5891_v0 }
0x2fee   :  { %v4123_v6 = vpop.f32.mrf.mxu0 }
0x2fef   :  { %v4129_v38 = vadd.f32 %v4123_v6, %v3975_v55 }
0x2ff0   :  { %v5437_v27 = vpop.f32.mrf.mxu0 }
0x2ff1   :  { %5824 = vtanh.f32 %v4129_v38  ;;  %v4942_v8 = vmul.f32 -1.442695, %v4129_v38 }
0x2ff2   :  { %v4126_v21 = vpop.f32.mrf.mxu0 }
0x2ff3   :  { %5826 = vpow2.f32 %v4942_v8 }
0x2ff4   :  { %v5438_v22 = vpop.f32.mrf.mxu0 }
0x2ffe   :  { %v5825_v47 = vpop.eup %5824 }
0x2fff   :  { %4139 = vrot.lane.b32.xlu0 %v5825_v47, %s5906_s24 }
0x3000   :  { %v5827_v20 = vpop.eup %5826 }
0x3001   :  { %v4133_v60 = vadd.f32 1.0, %v5827_v20 }
0x3003   :  { %5828 = vrcp.f32 %v4133_v60 }
0x3010   :  { %v5829_v36 = vpop.eup %5828 }
0x3011   :  { %v4137_v32 = vmul.f32 %v5829_v36, %v4069_v40 }
0x3071   :  { %v4140_v58 = vpop.permute.xlu0 %4139 }
0x3072   :  { %v4142_v59 = vmul.f32 %v5829_v36, %v4140_v58 }
0x3074   :  { %4144 = vrot.lane.b32.xlu1 %v4142_v59, %s5906_s24 }
0x30e6   :  { %v4145_v48 = vpop.permute.xlu1 %4144 }
0x30e7   :  { %v4147_v33 = vadd.f32 %v4145_v48, %v4137_v32 }
0x30e9   :  { %5830 = vtanh.f32 %v4147_v33 }
0x30f6   :  { %v5831_v46 = vpop.eup %5830 }
0x30f7   :  { %4150 = vrot.lane.b32.xlu0 %v5831_v46, %s5906_s24 }
0x30fb   :  { %3796 = vperm.xlu0 %5529, %v3777_v30  }
0x3169   :  { %v4151_v24 = vpop.permute.xlu0 %4150 }
0x316a   :  { %v7078_v51 = vmul.f32 %v5829_v36, %v4151_v24 }
0x316c   :  { %v4161_v11 = vpack.c.bf16 %v7078_v51, %v7078_v51 }
0x316e   :  { %4163 = vrot.lane.b32.xlu1 %v4161_v11, %s5907_s25  ;;  %v3779_v11 = vld [vmem:[%s6965_s16 + $0x20] sm:$0xff] }
0x3176   :  { %v3797_v62 = vpop.permute.xlu0 %3796 }
0x3177   :  { %v3832_v15 = vmul.f32 %v7028_v29, %v3797_v62 }
0x3179   :  { %v3909_v13 = vadd.f32 %v7037_v3, %v3832_v15 }
0x317b   :  { %v3924_v19 = vadd.f32 %v7039_v14, %v3909_v13 }
0x317d   :  { %v3976_v17 = vadd.f32 %v7041_v53, %v3924_v19 }
0x31e0   :  { %v4164_v2 = vpop.permute.xlu1 %4163 }
0x31e1   :  { %5444 = vmatmul.mubr.msk.bf16.vlgmr.msra.gmra.mxu1 %vm762_vm9, %v4164_v2 }
0x31e2   :  { %5456 = vmatpush3.bf16.msra.mxu1 %v6983_v1  ;;  %5459 = vmatprep.mubr.msk.bf16.mxu1 %vm5896_vm13, %v5891_v0 }
0x31e3   :  { %5457 = vmatprep.subr.bf16.mxu1 %v5891_v0 }
0x31e6   :  { %5458 = vmatpush3.bf16.msra.mxu1 %v6994_v52 }
0x31e7   :  { %5471 = vmatprep.subr.bf16.mxu1 %v5891_v0 }
0x32a1   :  { %v4202_v50 = vpop.f32.mrf.mxu1 }
0x32a2   :  { %v4208_v61 = vadd.f32 %v4202_v50, %v3976_v17 }
0x32a3   :  { %v5445_v25 = vpop.f32.mrf.mxu1 }
0x32a4   :  { %5832 = vtanh.f32 %v4208_v61  ;;  %v4944_v56 = vmul.f32 -1.442695, %v4208_v61 }
0x32a5   :  { %v4205_v12 = vpop.f32.mrf.mxu1 }
0x32a6   :  { %5834 = vpow2.f32 %v4944_v56 }
0x32a7   :  { %v5446_v4 = vpop.f32.mrf.mxu1 }
0x32b1   :  { %v5833_v49 = vpop.eup %5832 }
0x32b2   :  { %4218 = vrot.lane.b32.xlu1 %v5833_v49, %s5906_s24 }
0x32b3   :  { %v5835_v31 = vpop.eup %5834 }
0x32b4   :  { %v4212_v7 = vadd.f32 1.0, %v5835_v31 }
0x32b6   :  { %5836 = vrcp.f32 %v4212_v7 }
0x32c3   :  { %v5837_v3 = vpop.eup %5836 }
0x32c4   :  { %v4216_v28 = vmul.f32 %v5837_v3, %v4147_v33 }
0x3324   :  { %v4219_v39 = vpop.permute.xlu1 %4218 }
0x3325   :  { %v4221_v40 = vmul.f32 %v5837_v3, %v4219_v39 }
0x3327   :  { %4223 = vrot.lane.b32.xlu1 %v4221_v40, %s5906_s24 }
0x3399   :  { %v4224_v23 = vpop.permute.xlu1 %4223 }
0x339a   :  { %v4226_v34 = vadd.f32 %v4224_v23, %v4216_v28 }
0x339c   :  { %5838 = vtanh.f32 %v4226_v34 }
0x33a9   :  { %v5839_v26 = vpop.eup %5838 }
0x33aa   :  { %4229 = vrot.lane.b32.xlu0 %v5839_v26, %s5906_s24 }
0x33ae   :  { %3801 = vperm.xlu0 %5529, %v3778_v10  }
0x341c   :  { %v4230_v57 = vpop.permute.xlu0 %4229 }
0x341d   :  { %v7098_v37 = vmul.f32 %v5837_v3, %v4230_v57 }
0x341f   :  { %v4240_v5 = vpack.c.bf16 %v7098_v37, %v7098_v37 }
0x3421   :  { %4242 = vrot.lane.b32.xlu1 %v4240_v5, %s5907_s25  ;;  %v3780_v5 = vld [vmem:[%s6965_s16 + $0x28] sm:$0xff] }
0x3429   :  { %v3802_v63 = vpop.permute.xlu0 %3801 }
0x342a   :  { %v3833_v55 = vmul.f32 %v7028_v29, %v3802_v63 }
0x342c   :  { %v3910_v6 = vadd.f32 %v7061_v35, %v3833_v55 }
0x342e   :  { %v3925_v38 = vadd.f32 %v7039_v14, %v3910_v6 }
0x3430   :  { %v3977_v27 = vadd.f32 %v7041_v53, %v3925_v38 }
0x3493   :  { %v4243_v16 = vpop.permute.xlu1 %4242 }
0x3494   :  { %5452 = vmatmul.mubr.msk.bf16.vlgmr.msra.gmra.mxu0 %vm762_vm9, %v4243_v16 }
0x3495   :  { %5464 = vmatpush3.bf16.msra.mxu0 %v6983_v1  ;;  %5467 = vmatprep.mubr.msk.bf16.mxu0 %vm5896_vm13, %v5891_v0 }
0x3496   :  { %5465 = vmatprep.subr.bf16.mxu0 %v5891_v0 }
0x3499   :  { %5466 = vmatpush3.bf16.msra.mxu0 %v6994_v52 }
0x349a   :  { %5479 = vmatprep.subr.bf16.mxu0 %v5891_v0 }
0x3554   :  { %v4281_v21 = vpop.f32.mrf.mxu0 }
0x3555   :  { %v4287_v22 = vadd.f32 %v4281_v21, %v3977_v27 }
0x3556   :  { %v5453_v47 = vpop.f32.mrf.mxu0 }
0x3557   :  { %5840 = vtanh.f32 %v4287_v22  ;;  %v4946_v36 = vmul.f32 -1.442695, %v4287_v22 }
0x3558   :  { %v4284_v8 = vpop.f32.mrf.mxu0 }
0x3559   :  { %5842 = vpow2.f32 %v4946_v36 }
0x355a   :  { %v5454_v20 = vpop.f32.mrf.mxu0 }
0x3564   :  { %v5841_v60 = vpop.eup %5840 }
0x3565   :  { %4297 = vrot.lane.b32.xlu1 %v5841_v60, %s5906_s24 }
0x3566   :  { %v5843_v58 = vpop.eup %5842 }
0x3567   :  { %v4291_v59 = vadd.f32 1.0, %v5843_v58 }
0x3569   :  { %5844 = vrcp.f32 %v4291_v59 }
0x3576   :  { %v5845_v35 = vpop.eup %5844 }
0x3577   :  { %v4295_v33 = vmul.f32 %v5845_v35, %v4226_v34 }
0x35d7   :  { %v4298_v32 = vpop.permute.xlu1 %4297 }
0x35d8   :  { %v4300_v48 = vmul.f32 %v5845_v35, %v4298_v32 }
0x35da   :  { %4302 = vrot.lane.b32.xlu0 %v4300_v48, %s5906_s24 }
0x364c   :  { %v4303_v46 = vpop.permute.xlu0 %4302 }
0x364d   :  { %v4305_v30 = vadd.f32 %v4303_v46, %v4295_v33 }
0x364f   :  { %5846 = vtanh.f32 %v4305_v30 }
0x365c   :  { %v5847_v24 = vpop.eup %5846 }
0x365d   :  { %4308 = vrot.lane.b32.xlu1 %v5847_v24, %s5906_s24  ;;  %v3781_v24 = vld [vmem:[%s6965_s16 + $0x30] sm:$0xff] }
0x3661   :  { %3806 = vperm.xlu1 %5528, %v3779_v11  }
0x36cf   :  { %v4309_v2 = vpop.permute.xlu1 %4308 }
0x36d0   :  { %v7118_v62 = vmul.f32 %v5845_v35, %v4309_v2 }
0x36d2   :  { %v4319_v15 = vpack.c.bf16 %v7118_v62, %v7118_v62 }
0x36d4   :  { %4321 = vrot.lane.b32.xlu0 %v4319_v15, %s5907_s25 }
0x36dc   :  { %v3807_v19 = vpop.permute.xlu1 %3806 }
0x36dd   :  { %v3834_v17 = vmul.f32 %v7028_v29, %v3807_v19 }
0x36df   :  { %v3911_v50 = vadd.f32 %v7066_v9, %v3834_v17 }
0x36e1   :  { %v3926_v61 = vadd.f32 %v7039_v14, %v3911_v50 }
0x36e3   :  { %v3978_v25 = vadd.f32 %v7041_v53, %v3926_v61 }
0x3746   :  { %v4322_v13 = vpop.permute.xlu0 %4321 }
0x3747   :  { %5460 = vmatmul.mubr.msk.bf16.vlgmr.msra.gmra.mxu1 %vm762_vm9, %v4322_v13 }
0x3748   :  { %5472 = vmatpush3.bf16.msra.mxu1 %v6983_v1  ;;  %5475 = vmatprep.mubr.msk.bf16.mxu1 %vm5896_vm13, %v5891_v0 }
0x3749   :  { %5473 = vmatprep.subr.bf16.mxu1 %v5891_v0 }
0x374c   :  { %5474 = vmatpush3.bf16.msra.mxu1 %v6994_v52 }
0x3807   :  { %v4360_v12 = vpop.f32.mrf.mxu1 }
0x3808   :  { %v4366_v4 = vadd.f32 %v4360_v12, %v3978_v25 }
0x3809   :  { %v5461_v49 = vpop.f32.mrf.mxu1 }
0x380a   :  { %5848 = vtanh.f32 %v4366_v4  ;;  %v4948_v3 = vmul.f32 -1.442695, %v4366_v4 }
0x380b   :  { %v4363_v56 = vpop.f32.mrf.mxu1 }
0x380c   :  { %5850 = vpow2.f32 %v4948_v3 }
0x380d   :  { %v5462_v31 = vpop.f32.mrf.mxu1 }
0x3817   :  { %v5849_v7 = vpop.eup %5848 }
0x3818   :  { %4376 = vrot.lane.b32.xlu0 %v5849_v7, %s5906_s24 }
0x3819   :  { %v5851_v39 = vpop.eup %5850 }
0x381a   :  { %v4370_v40 = vadd.f32 1.0, %v5851_v39 }
0x381c   :  { %5852 = vrcp.f32 %v4370_v40 }
0x3829   :  { %v5853_v9 = vpop.eup %5852 }
0x382a   :  { %v4374_v34 = vmul.f32 %v5853_v9, %v4305_v30 }
0x388a   :  { %v4377_v28 = vpop.permute.xlu0 %4376 }
0x388b   :  { %v4379_v23 = vmul.f32 %v5853_v9, %v4377_v28 }
0x388d   :  { %4381 = vrot.lane.b32.xlu1 %v4379_v23, %s5906_s24 }
0x38ff   :  { %v4382_v26 = vpop.permute.xlu1 %4381 }
0x3900   :  { %v4384_v10 = vadd.f32 %v4382_v26, %v4374_v34 }
0x3902   :  { %5854 = vtanh.f32 %v4384_v10 }
0x390f   :  { %v5855_v57 = vpop.eup %5854 }
0x3910   :  { %4387 = vrot.lane.b32.xlu0 %v5855_v57, %s5906_s24  ;;  %v3782_v57 = vld [vmem:[%s6965_s16 + $0x38] sm:$0xff]  ;;  %s4798_s16 = sld [smem:[%s7229_s0 + %s5926_s13]]  }
0x3914   :  { %3811 = vperm.xlu0 %5529, %v3780_v5  }
0x3982   :  { %v4388_v16 = vpop.permute.xlu0 %4387 }
0x3983   :  { %v7137_v63 = vmul.f32 %v5853_v9, %v4388_v16 }
0x3985   :  { %v4398_v55 = vpack.c.bf16 %v7137_v63, %v7137_v63 }
0x3987   :  { %4400 = vrot.lane.b32.xlu1 %v4398_v55, %s5907_s25 }
0x398f   :  { %v3812_v38 = vpop.permute.xlu0 %3811 }
0x3990   :  { %v3835_v27 = vmul.f32 %v7028_v29, %v3812_v38 }
0x3992   :  { %v3912_v21 = vadd.f32 %v7071_v54, %v3835_v27 }
0x3994   :  { %v3927_v22 = vadd.f32 %v7039_v14, %v3912_v21 }
0x3996   :  { %v3979_v47 = vadd.f32 %v7041_v53, %v3927_v22 }
0x39f9   :  { %v4401_v6 = vpop.permute.xlu1 %4400 }
0x39fa   :  { %5468 = vmatmul.mubr.msk.bf16.vlgmr.msra.gmra.mxu0 %vm762_vm9, %v4401_v6 }
0x39fb   :  { %5480 = vmatpush3.bf16.msra.mxu0 %v6983_v1  ;;  %5483 = vmatprep.mubr.msk.bf16.mxu0 %vm5896_vm13, %v5891_v0  ;;  %vm4743_vm13 = vcmask 1042434  }
0x39fc   :  { %5481 = vmatprep.subr.bf16.mxu0 %v5891_v0 }
0x39ff   :  { %5482 = vmatpush3.bf16.msra.mxu0 %v6994_v52 }
0x3aba   :  { %v4439_v8 = vpop.f32.mrf.mxu0 }
0x3abb   :  { %v4445_v20 = vadd.f32 %v4439_v8, %v3979_v47 }
0x3abc   :  { %v5469_v60 = vpop.f32.mrf.mxu0 }
0x3abd   :  { %5856 = vtanh.f32 %v4445_v20  ;;  %v4950_v0 = vmul.f32 -1.442695, %v4445_v20 }
0x3abe   :  { %v4442_v1 = vpop.f32.mrf.mxu0 }
0x3abf   :  { %5858 = vpow2.f32 %v4950_v0 }
0x3ac0   :  { %v5470_v36 = vpop.f32.mrf.mxu0 }
0x3aca   :  { %v5857_v58 = vpop.eup %5856 }
0x3acb   :  { %4455 = vrot.lane.b32.xlu1 %v5857_v58, %s5906_s24 }
0x3acc   :  { %v5859_v52 = vpop.eup %5858 }
0x3acd   :  { %v4449_v59 = vadd.f32 1.0, %v5859_v52 }
0x3acf   :  { %5860 = vrcp.f32 %v4449_v59 }
0x3adc   :  { %v5861_v54 = vpop.eup %5860 }
0x3add   :  { %v4453_v48 = vmul.f32 %v5861_v54, %v4384_v10 }
0x3b3d   :  { %v4456_v35 = vpop.permute.xlu1 %4455 }
0x3b3e   :  { %v4458_v32 = vmul.f32 %v5861_v54, %v4456_v35 }
0x3b40   :  { %4460 = vrot.lane.b32.xlu0 %v4458_v32, %s5906_s24 }
0x3bb2   :  { %v4461_v33 = vpop.permute.xlu0 %4460 }
0x3bb3   :  { %v4463_v46 = vadd.f32 %v4461_v33, %v4453_v48 }
0x3bb5   :  { %5862 = vtanh.f32 %v4463_v46 }
0x3bc2   :  { %v5863_v30 = vpop.eup %5862 }
0x3bc3   :  { %4466 = vrot.lane.b32.xlu1 %v5863_v30, %s5906_s24 }
0x3bc7   :  { %3816 = vperm.xlu1 %5528, %v3781_v24  }
0x3c35   :  { %v4467_v11 = vpop.permute.xlu1 %4466 }
0x3c36   :  { %v7156_v2 = vmul.f32 %v5861_v54, %v4467_v11 }
0x3c38   :  { %v4477_v15 = vpack.c.bf16 %v7156_v2, %v7156_v2 }
0x3c3a   :  { %4479 = vrot.lane.b32.xlu0 %v4477_v15, %s5907_s25 }
0x3c42   :  { %v3817_v19 = vpop.permute.xlu1 %3816 }
0x3c43   :  { %v3836_v17 = vmul.f32 %v7028_v29, %v3817_v19  ;;  %v73_v19 = vstv %s4798_s16 }
0x3c44   :  { %74 = vst [vmem:[#allocation5] sm:$0x1] %v73_v19 }
0x3c45   :  { %v3913_v50 = vadd.f32 %v7063_v43, %v3836_v17 }
0x3c47   :  { %v3928_v61 = vadd.f32 %v7039_v14, %v3913_v50 }
0x3c49   :  { %v3980_v25 = vadd.f32 %v7041_v53, %v3928_v61 }
0x3cac   :  { %v4480_v13 = vpop.permute.xlu0 %4479 }
0x3cad   :  { %5476 = vmatmul.mubr.msk.bf16.vlgmr.msra.gmra.mxu1 %vm762_vm9, %v4480_v13 }
0x3d6d   :  { %v4518_v12 = vpop.f32.mrf.mxu1 }
0x3d6e   :  { %v4524_v4 = vadd.f32 %v4518_v12, %v3980_v25 }
0x3d6f   :  { %v5477_v49 = vpop.f32.mrf.mxu1 }
0x3d70   :  { %5864 = vtanh.f32 %v4524_v4  ;;  %v4952_v3 = vmul.f32 -1.442695, %v4524_v4 }
0x3d71   :  { %v4521_v56 = vpop.f32.mrf.mxu1 }
0x3d72   :  { %5866 = vpow2.f32 %v4952_v3 }
0x3d73   :  { %v5478_v31 = vpop.f32.mrf.mxu1 }
0x3d7d   :  { %v5865_v7 = vpop.eup %5864 }
0x3d7e   :  { %4534 = vrot.lane.b32.xlu0 %v5865_v7, %s5906_s24 }
0x3d7f   :  { %v5867_v39 = vpop.eup %5866 }
0x3d80   :  { %v4528_v40 = vadd.f32 1.0, %v5867_v39 }
0x3d82   :  { %5868 = vrcp.f32 %v4528_v40 }
0x3d8f   :  { %v5869_v43 = vpop.eup %5868 }
0x3d90   :  { %v4532_v23 = vmul.f32 %v5869_v43, %v4463_v46 }
0x3df0   :  { %v4535_v9 = vpop.permute.xlu0 %4534 }
0x3df1   :  { %v4537_v28 = vmul.f32 %v5869_v43, %v4535_v9 }
0x3df3   :  { %4539 = vrot.lane.b32.xlu1 %v4537_v28, %s5906_s24 }
0x3e65   :  { %v4540_v34 = vpop.permute.xlu1 %4539 }
0x3e66   :  { %v4542_v26 = vadd.f32 %v4540_v34, %v4532_v23  ;;  %v4956_v34 = vld [vmem:[#allocation5] ss:$0 sm:$0xff] }
0x3e68   :  { %5870 = vtanh.f32 %v4542_v26 }
0x3e75   :  { %v5871_v10 = vpop.eup %5870 }
0x3e76   :  { %4545 = vrot.lane.b32.xlu0 %v5871_v10, %s5906_s24 }
0x3e7a   :  { %3821 = vperm.xlu0 %5529, %v3782_v57  }
0x3ee8   :  { %v4546_v5 = vpop.permute.xlu0 %4545 }
0x3ee9   :  { %v4548_v16 = vmul.f32 %v5869_v43, %v4546_v5 }
0x3eeb   :  { %v4556_v55 = vpack.c.bf16 %v4548_v16, %v4548_v16 }
0x3eed   :  { %4558 = vrot.lane.b32.xlu1 %v4556_v55, %s5907_s25 }
0x3ef5   :  { %v3822_v38 = vpop.permute.xlu0 %3821 }
0x3ef6   :  { %v3837_v27 = vmul.f32 %v7028_v29, %v3822_v38 }
0x3ef8   :  { %v3914_v21 = vadd.f32 %v7068_v18, %v3837_v27 }
0x3efa   :  { %v3929_v22 = vadd.f32 %v7039_v14, %v3914_v21 }
0x3efc   :  { %v3981_v47 = vadd.f32 %v7041_v53, %v3929_v22 }
0x3f5f   :  { %v4559_v6 = vpop.permute.xlu1 %4558 }
0x3f60   :  { %5484 = vmatmul.mubr.msk.bf16.vlgmr.msra.gmra.mxu0 %vm762_vm9, %v4559_v6 }
0x4020   :  { %v4597_v8 = vpop.f32.mrf.mxu0 }
0x4021   :  { %v4603_v20 = vadd.f32 %v4597_v8, %v3981_v47 }
0x4022   :  { %v5485_v60 = vpop.f32.mrf.mxu0 }
0x4023   :  { %5872 = vtanh.f32 %v4603_v20  ;;  %v4954_v0 = vmul.f32 -1.442695, %v4603_v20 }
0x4024   :  { %v4600_v1 = vpop.f32.mrf.mxu0 }
0x4025   :  { %5874 = vpow2.f32 %v4954_v0 }
0x4026   :  { %v5486_v36 = vpop.f32.mrf.mxu0 }
0x4030   :  { %v5873_v58 = vpop.eup %5872 }
0x4031   :  { %4613 = vrot.lane.b32.xlu1 %v5873_v58, %s5906_s24 }
0x4032   :  { %v5875_v52 = vpop.eup %5874 }
0x4033   :  { %v4607_v59 = vadd.f32 1.0, %v5875_v52 }
0x4035   :  { %5876 = vrcp.f32 %v4607_v59 }
0x4042   :  { %v5877_v29 = vpop.eup %5876 }
0x4043   :  { %v4611_v14 = vmul.f32 %v5877_v29, %v4542_v26  ;;  %v3756_v26 = vmin.f32 %v7030_v45, 20.0 }
0x4045   :  { %v3757_v10 = vmul.f32 1.442695, %v3756_v26 }
0x40a3   :  { %v4614_v18 = vpop.permute.xlu1 %4613 }
0x40a4   :  { %v4616_v54 = vmul.f32 %v5877_v29, %v4614_v18  ;;  %v4708_v18 = vand.u32 127, %v626_v41 }
0x40a6   :  { %4618 = vrot.lane.b32.xlu0 %v4616_v54, %s5906_s24 }
0x40aa   :  { %4077 = vrot.lane.b32.xlu0 %v7049_v44, %s5907_s25 }
0x40ae   :  { %4234 = vrot.lane.b32.xlu0 %v7098_v37, %s5907_s25  ;;  %v4955_v37 = vld [vmem:[%s4797_s12] ss:$0 sm:$0xff] }
0x40b2   :  { %4392 = vrot.lane.b32.xlu0 %v7137_v63, %s5907_s25 }
0x40b6   :  { %4550 = vrot.lane.b32.xlu0 %v4548_v16, %s5907_s25 }
0x4118   :  { %v4619_v53 = vpop.permute.xlu0 %4618 }
0x4119   :  { %v4621_v35 = vadd.f32 %v4619_v53, %v4611_v14 }
0x411b   :  { %5878 = vtanh.f32 %v4621_v35  ;;  %v4711_v35 = vsub.s32 %v4708_v18, %v6212_v42 }
0x411c   :  { %v4078_v32 = vpop.permute.xlu0 %4077  ;;  %5880 = vpow2.f32 %v3757_v10 }
0x411d   :  { %4080 = vst.msk [vmem:[#allocation4] sm:$0xff] %vm762_vm9, %v4078_v32 }
0x4120   :  { %v4235_v44 = vpop.permute.xlu0 %4234 }
0x4121   :  { %4238 = vst.msk [vmem:[#allocation4 + $0x10] sm:$0xff] %vm762_vm9, %v4235_v44 }
0x4124   :  { %v4393_v48 = vpop.permute.xlu0 %4392  ;;  %v4635_v63 = vld [vmem:[#allocation4] sm:$0xff] }
0x4125   :  { %4396 = vst.msk [vmem:[#allocation4 + $0x20] sm:$0xff] %vm762_vm9, %v4393_v48  ;;  %v4649_v33 = vmul.f32 %v4955_v37, %v4635_v63 }
0x4127   :  { %v4657_v46 = vsel %vm762_vm9, %v4649_v33, 0.0 }
0x4128   :  { %v5879_v30 = vpop.eup %5878  ;;  %4658 = vadd.xlane.f32.xlu0 %v4657_v46  ;;  %v4551_v24 = vpop.permute.xlu0 %4550  ;;  %v4637_v11 = vld [vmem:[#allocation4 + $0x10] sm:$0xff] }
0x4129   :  { %4554 = vst.msk [vmem:[#allocation4 + $0x30] sm:$0xff] %vm762_vm9, %v4551_v24  ;;  %4624 = vrot.lane.b32.xlu1 %v5879_v30, %s5906_s24  ;;  %v4651_v15 = vmul.f32 %v4955_v37, %v4637_v11  ;;  %v5881_v57 = vpop.eup %5880  ;;  %s5927_s24 = smov 33  }
0x412a   :  { %v3759_v16 = vadd.f32 1.0, %v5881_v57  ;;  %v3762_v27 = vmul.f32 -0.5, %v5881_v57  ;;  %v3765_v47 = vand.u32 2147483647, %v5881_v57  ;;  %s4801_s17 = sld [smem:[%s7229_s0 + %s5927_s24]]  }
0x412b   :  { %v4663_v13 = vsel %vm762_vm9, %v4651_v15, 0.0 }
0x412c   :  { %4664 = vadd.xlane.f32.xlu0 %v4663_v13  ;;  %v4639_v25 = vld [vmem:[#allocation4 + $0x20] sm:$0xff]  ;;  %5882 = vlog2.f32 %v3759_v16  ;;  %v3763_v22 = vadd.f32 1.0, %v3762_v27  ;;  %vm3766_vm10 = vcmp.lt.f32.partialorder %v3765_v47, 0.0004427343 }
0x412d   :  { %4155 = vrot.lane.b32.xlu1 %v7078_v51, %s5907_s25  ;;  %v4653_v49 = vmul.f32 %v4955_v37, %v4639_v25 }
0x412e   :  { %v3764_v20 = vmul.f32 %v5881_v57, %v3763_v22 }
0x412f   :  { %v4669_v31 = vsel %vm762_vm9, %v4653_v49, 0.0 }
0x4130   :  { %v4641_v56 = vld [vmem:[#allocation4 + $0x30] sm:$0xff] }
0x4131   :  { %4313 = vrot.lane.b32.xlu1 %v7118_v62, %s5907_s25  ;;  %v4655_v7 = vmul.f32 %v4955_v37, %v4641_v56 }
0x4133   :  { %v4675_v3 = vsel %vm762_vm9, %v4655_v7, 0.0 }
0x4135   :  { %4471 = vrot.lane.b32.xlu1 %v7156_v2, %s5907_s25 }
0x4139   :  { %v5883_v21 = vpop.eup %5882 }
0x413a   :  { %v3761_v8 = vmul.f32 0.6931472, %v5883_v21 }
0x413c   :  { %v3767_v60 = vsel %vm3766_vm10, %v3764_v20, %v3761_v8 }
0x413d   :  { %v3768_v1 = vsel %vm3755_vm11, %v7030_v45, %v3767_v60 }
0x419b   :  { %v4625_v17 = vpop.permute.xlu1 %4624 }
0x419c   :  { %v4627_v50 = vmul.f32 %v5877_v29, %v4625_v17 }
0x419e   :  { %4629 = vrot.lane.b32.xlu1 %v4627_v50, %s5907_s25 }
0x419f   :  { %v4156_v61 = vpop.permute.xlu1 %4155 }
0x41a0   :  { %4159 = vst.msk [vmem:[#allocation4 + $0x8] sm:$0xff] %vm762_vm9, %v4156_v61 }
0x41a3   :  { %v4314_v51 = vpop.permute.xlu1 %4313 }
0x41a4   :  { %4317 = vst.msk [vmem:[#allocation4 + $0x18] sm:$0xff] %vm762_vm9, %v4314_v51 }
0x41a7   :  { %v4472_v62 = vpop.permute.xlu1 %4471  ;;  %v4636_v39 = vld [vmem:[#allocation4 + $0x8] sm:$0xff] }
0x41a8   :  { %4475 = vst.msk [vmem:[#allocation4 + $0x28] sm:$0xff] %vm762_vm9, %v4472_v62  ;;  %v4650_v40 = vmul.f32 %v4955_v37, %v4636_v39 }
0x41aa   :  { %v4660_v9 = vsel %vm762_vm9, %v4650_v40, 0.0 }
0x41ab   :  { %v4638_v2 = vld [vmem:[#allocation4 + $0x18] sm:$0xff] }
0x41ac   :  { %v4652_v12 = vmul.f32 %v4955_v37, %v4638_v2 }
0x41ae   :  { %v4666_v4 = vsel %vm762_vm9, %v4652_v12, 0.0 }
0x41af   :  { %4667 = vadd.xlane.f32.xlu0 %v4666_v4  ;;  %v4640_v43 = vld [vmem:[#allocation4 + $0x28] sm:$0xff] }
0x41b0   :  { %v4654_v28 = vmul.f32 %v4955_v37, %v4640_v43 }
0x41b1   :  { %v4659_v36 = vpop.xlane.xlu0 %4658 }
0x41b2   :  { %v4672_v23 = vsel %vm762_vm9, %v4654_v28, 0.0 }
0x41b3   :  { %4670 = vadd.xlane.f32.xlu0 %v4669_v31 }
0x41b5   :  { %v4665_v58 = vpop.xlane.xlu0 %4664 }
0x41b7   :  { %4676 = vadd.xlane.f32.xlu0 %v4675_v3 }
0x41c2   :  { %4661 = vadd.xlane.f32.xlu1 %v4660_v9 }
0x41c6   :  { %4673 = vadd.xlane.f32.xlu1 %v4672_v23 }
0x41cd   :  { %4688 = vperm.xlu0 %5529, %v4956_v34  }
0x4210   :  { %v4630_v5 = vpop.permute.xlu1 %4629 }
0x4211   :  { %4633 = vst.msk [vmem:[#allocation4 + $0x38] sm:$0xff] %vm762_vm9, %v4630_v5 }
0x4218   :  { %v4642_v55 = vld [vmem:[#allocation4 + $0x38] sm:$0xff] }
0x4219   :  { %v4656_v6 = vmul.f32 %v4955_v37, %v4642_v55 }
0x421b   :  { %v4678_v38 = vsel %vm762_vm9, %v4656_v6, 0.0 }
0x421c   :  { %4679 = vadd.xlane.f32.xlu1 %v4678_v38 }
0x422d   :  { %3771 = vrot.lane.b32.xlu1 %v3768_v1, %s5917_s4 }
0x4238   :  { %v4668_v0 = vpop.xlane.xlu0 %4667 }
0x423c   :  { %v4671_v52 = vpop.xlane.xlu0 %4670 }
0x4240   :  { %v4677_v59 = vpop.xlane.xlu0 %4676 }
0x4248   :  { %v4689_v54 = vpop.permute.xlu0 %4688 }
0x4249   :  { %v4691_v53 = vadd.f32 %v4689_v54, %v4659_v36  ;;  %v4693_v44 = vadd.f32 %v4689_v54, %v4665_v58  ;;  %v4694_v45 = vadd.f32 %v4689_v54, %v4668_v0  ;;  %v4695_v46 = vadd.f32 %v4689_v54, %v4671_v52 }
0x424a   :  { %v4697_v42 = vadd.f32 %v4689_v54, %v4677_v59 }
0x424b   :  { %v4662_v29 = vpop.xlane.xlu1 %4661  ;;  %v4712_v37 = vrot.slane %v4691_v53, %v4711_v35  ;;  %v4720_v63 = vrot.slane %v4693_v44, %v4711_v35  ;;  %v4724_v24 = vrot.slane %v4694_v45, %v4711_v35  ;;  %v4728_v15 = vrot.slane %v4695_v46, %v4711_v35 }
0x424c   :  { %v4692_v14 = vadd.f32 %v4689_v54, %v4662_v29  ;;  %v4736_v51 = vrot.slane %v4697_v42, %v4711_v35 }
0x424e   :  { %v4716_v32 = vrot.slane %v4692_v14, %v4711_v35 }
0x424f   :  { %v4674_v33 = vpop.xlane.xlu1 %4673 }
0x4250   :  { %v4742_v48 = vsel %vm4741_vm12, %v4716_v32, %v4712_v37  ;;  %v4696_v11 = vadd.f32 %v4689_v54, %v4674_v33 }
0x4251   :  { %v4744_v30 = vsel %vm4743_vm13, %v4720_v63, %v4742_v48 }
0x4252   :  { %v4746_v41 = vsel %vm4745_vm14, %v4724_v24, %v4744_v30  ;;  %v4732_v13 = vrot.slane %v4696_v11, %v4711_v35 }
0x4253   :  { %v4748_v19 = vsel %vm4747_vm15, %v4728_v15, %v4746_v41 }
0x4254   :  { %v4750_v50 = vsel %vm4749_vm1, %v4732_v13, %v4748_v19 }
0x4255   :  { %v4752_v2 = vsel %vm4751_vm2, %v4736_v51, %v4750_v50 }
0x42a5   :  { %v4680_v17 = vpop.xlane.xlu1 %4679 }
0x42a6   :  { %v4698_v61 = vadd.f32 %v4689_v54, %v4680_v17 }
0x42a8   :  { %v4740_v62 = vrot.slane %v4698_v61, %v4711_v35 }
0x42a9   :  { %v3772_v25 = vpop.permute.xlu1 %3771 }
0x42aa   :  { %v4754_v12 = vsel %vm4753_vm3, %v4740_v62, %v4752_v2  ;;  %3774 = vst.msk [vmem:[%s4801_s17] sm:$0xff] %vm762_vm9, %v3772_v25 }
0x42ab   :  { %4756 = vst.msk [vmem:[%s4799_s21] sm:$0xff] %vm431_vm8, %v4754_v12 }

</bundles_post_ra>
